<compile_context>
chip_gen: v6e
topology: v6e:2x2x1
jax: 0.10.0
libtpu: 0.0.40
codegen_flags: <defaults>
</compile_context>

<pallas_src>
import jax
import jax.numpy as jnp
from jax.experimental import pallas as pl
from jax.experimental.pallas import tpu as pltpu


# ------------------------------ fused LSTM kernel -----------------------------
def _make_fused_lstm_kernel(T, Bp, H, num_layers):
    """Kernel closure over static sizes.

    Ref order (single grid step, full blocks):
      x_ref      : (T*Bp, D0)       compute dtype (bf16), time-major flat
      len_ref    : (Bp, 1)          int32 sequence lengths
      per layer l: w_ih_t (D_l,4H), w_hh_t (H,4H)  [compute dtype],
                   bias   (1,4H)    f32  (b_ih + b_hh fused)
      out_ref    : (T*Bp, H)        f32, masked final-layer hidden states
      scratch    : seq (T*Bp,H) compute dtype, gates (T*Bp,4H) f32,
                   h (Bp,H) f32, c (Bp,H) f32
    """

    def kernel(*refs):
        x_ref = refs[0]
        len_ref = refs[1]
        layer_refs = refs[2:2 + 3 * num_layers]
        out_ref = refs[2 + 3 * num_layers]
        seq_scr, gates_scr, h_scr, c_scr = refs[3 + 3 * num_layers:]

        def run_layer(inp_ref, w_ref, u_ref, b_ref, is_last):
            # Hoisted input-side gate contributions for ALL timesteps:
            # one big MXU matmul (T*Bp, D_in) @ (D_in, 4H), f32 accumulation.
            gates_scr[...] = (
                jnp.dot(inp_ref[...], w_ref[...],
                        preferred_element_type=jnp.float32)
                + b_ref[...])

            h_scr[...] = jnp.zeros_like(h_scr)
            c_scr[...] = jnp.zeros_like(c_scr)

            def step(t, carry):
                row = pl.multiple_of(t * Bp, Bp)          # sublane-aligned
                h_prev = h_scr[...]                       # (Bp, H) f32
                c_prev = c_scr[...]                       # (Bp, H) f32

                gates = gates_scr[pl.ds(row, Bp), :] + jnp.dot(
                    h_prev.astype(u_ref.dtype), u_ref[...],
                    preferred_element_type=jnp.float32)   # (Bp, 4H) f32

                i_g = jax.nn.sigmoid(gates[:, 0 * H:1 * H])
                f_g = jax.nn.sigmoid(gates[:, 1 * H:2 * H])
                g_g = jnp.tanh(gates[:, 2 * H:3 * H])
                o_g = jax.nn.sigmoid(gates[:, 3 * H:4 * H])

                c_new = f_g * c_prev + i_g * g_g
                h_new = o_g * jnp.tanh(c_new)

                c_scr[...] = c_new
                h_scr[...] = h_new

                if is_last:
                    # pad_packed_sequence: zero padded positions of the output.
                    valid = t < len_ref[...]              # (Bp, 1) bool
                    out_ref[pl.ds(row, Bp), :] = jnp.where(
                        valid, h_new, 0.0).astype(out_ref.dtype)
                else:
                    # In-place is safe: step t reads seq[row] (prev layer)
                    # before overwriting it; later steps read later rows only.
                    seq_scr[pl.ds(row, Bp), :] = h_new.astype(seq_scr.dtype)
                return carry

            jax.lax.fori_loop(0, T, step, 0, unroll=True)

        for l in range(num_layers):
            w_ref, u_ref, b_ref = layer_refs[3 * l:3 * l + 3]
            inp_ref = x_ref if l == 0 else seq_scr
            run_layer(inp_ref, w_ref, u_ref, b_ref,
                      is_last=(l == num_layers - 1))

    return kernel


def _fused_lstm_call(x_flat, len_col, layers, T, Bp, H, compute_dtype):
    TB, D0 = x_flat.shape
    G = 4 * H
    num_layers = len(layers)

    inputs = [x_flat, len_col]
    in_specs = [
        pl.BlockSpec((TB, D0), lambda i: (0, 0)),
        pl.BlockSpec((Bp, 1), lambda i: (0, 0)),
    ]
    for lp in layers:
        d_in = lp["w_ih_t"].shape[0]
        inputs += [lp["w_ih_t"], lp["w_hh_t"], lp["bias"]]
        in_specs += [
            pl.BlockSpec((d_in, G), lambda i: (0, 0)),
            pl.BlockSpec((H, G), lambda i: (0, 0)),
            pl.BlockSpec((1, G), lambda i: (0, 0)),
        ]

    kernel = _make_fused_lstm_kernel(T, Bp, H, num_layers)

    return pl.pallas_call(
        kernel,
        out_shape=jax.ShapeDtypeStruct((TB, H), jnp.float32),
        grid=(1,),
        in_specs=in_specs,
        out_specs=pl.BlockSpec((TB, H), lambda i: (0, 0)),
        scratch_shapes=[
            pltpu.VMEM((TB, H), compute_dtype),    # inter-layer hidden sequence
            pltpu.VMEM((TB, G), jnp.float32),      # hoisted input-gate preacts
            pltpu.VMEM((Bp, H), jnp.float32),      # h carry
            pltpu.VMEM((Bp, H), jnp.float32),      # c carry
        ],
        compiler_params=pltpu.CompilerParams(
            dimension_semantics=("arbitrary",)),   # sequential recurrence
    )(*inputs)


# --------------------------------- wrapper ------------------------------------
def lstm_model_forward(params, x, lengths):
    """x: (B, T, input_size) batch-first, lengths: (B,). Returns (B, T, output_size)."""
    B, T, D = x.shape
    H = params["lstm"][0]["w_hh_t"].shape[0]
    compute_dtype = params["lstm"][0]["w_ih_t"].dtype

    # Pad batch to a sublane multiple so every per-step slab is (8k, H) aligned.
    Bp = max(8, ((B + 7) // 8) * 8)
    pad_b = Bp - B
    x_p = jnp.pad(x, ((0, pad_b), (0, 0), (0, 0)))
    len_p = jnp.pad(lengths.astype(jnp.int32), (0, pad_b))      # pads -> length 0

    # Time-major flat layout: row index = t * Bp + b.
    x_flat = jnp.transpose(x_p, (1, 0, 2)).reshape(T * Bp, D).astype(compute_dtype)
    len_col = len_p.reshape(Bp, 1)

    # Fused 3-layer LSTM + packed-sequence masking (masked h in f32).
    h_flat = _fused_lstm_call(x_flat, len_col, params["lstm"], T, Bp, H,
                              compute_dtype)                     # (T*Bp, H)

    # Tiny fc head (H -> O=2) as one lane-dense XLA matmul; padded positions
    # (h == 0) become the fc bias, matching pad_packed_sequence + Linear.
    out_flat = h_flat @ params["w_fc_t"] + params["b_fc"]        # (T*Bp, O)
    out = out_flat.reshape(T, Bp, -1)[:, :B, :]
    return jnp.transpose(out, (1, 0, 2))                         # (B, T, O)


# ------------------------- deterministic parameter init -----------------------
def init_params(key, input_size, hidden_size, num_layers, output_size,
                compute_dtype=jnp.bfloat16):
    k = 1.0 / jnp.sqrt(jnp.float32(hidden_size))
    layers = []
    for l in range(num_layers):
        d_in = input_size if l == 0 else hidden_size
        key, k1, k2, k3, k4 = jax.random.split(key, 5)
        w_ih = jax.random.uniform(k1, (4 * hidden_size, d_in), jnp.float32, -k, k)
        w_hh = jax.random.uniform(k2, (4 * hidden_size, hidden_size), jnp.float32, -k, k)
        b_ih = jax.random.uniform(k3, (4 * hidden_size,), jnp.float32, -k, k)
        b_hh = jax.random.uniform(k4, (4 * hidden_size,), jnp.float32, -k, k)
        layers.append({
            "w_ih_t": w_ih.T.astype(compute_dtype),          # (d_in, 4H) bf16
            "w_hh_t": w_hh.T.astype(compute_dtype),          # (H, 4H)   bf16
            "bias": (b_ih + b_hh).reshape(1, -1),            # (1, 4H)   f32
        })
    key, k5, k6 = jax.random.split(key, 3)
    w_fc = jax.random.uniform(k5, (output_size, hidden_size), jnp.float32, -k, k)
    b_fc = jax.random.uniform(k6, (output_size,), jnp.float32, -k, k)
    return {"lstm": layers, "w_fc_t": w_fc.T, "b_fc": b_fc.reshape(1, -1)}


# ------------------------------ pure-JAX reference -----------------------------
def reference_forward(params, x, lengths):
    B, T, _ = x.shape
    h_seq = jnp.transpose(x, (1, 0, 2)).astype(jnp.float32)
    for layer in params["lstm"]:
        H = layer["w_hh_t"].shape[0]
        w_ih_t, w_hh_t, bias = layer["w_ih_t"], layer["w_hh_t"], layer["bias"][0]

        def step(carry, x_t, w_ih_t=w_ih_t, w_hh_t=w_hh_t, bias=bias, H=H):
            h, c = carry
            g = x_t @ w_ih_t + h @ w_hh_t + bias
            i = jax.nn.sigmoid(g[:, :H])
            f = jax.nn.sigmoid(g[:, H:2 * H])
            gg = jnp.tanh(g[:, 2 * H:3 * H])
            o = jax.nn.sigmoid(g[:, 3 * H:])
            c = f * c + i * gg
            h = o * jnp.tanh(c)
            return (h, c), h

        init = (jnp.zeros((B, H), jnp.float32), jnp.zeros((B, H), jnp.float32))
        _, h_seq = jax.lax.scan(step, init, h_seq)
    mask = jnp.arange(T)[:, None, None] < lengths[None, :, None]
    h_seq = jnp.where(mask, h_seq, 0.0)
    out = h_seq @ params["w_fc_t"] + params["b_fc"][0]
    return jnp.transpose(out, (1, 0, 2))


if __name__ == "__main__":
    B, T = 2, 8
    input_size, hidden_size, num_layers, output_size = 16, 32, 3, 2

    key = jax.random.PRNGKey(0)
    key, kp, kx = jax.random.split(key, 3)
    params = init_params(kp, input_size, hidden_size, num_layers, output_size)

    lengths = jnp.array([8, 5], dtype=jnp.int32)
    x = jax.random.normal(kx, (B, T, input_size), dtype=jnp.float32)
    # emulate pad_sequence(padding_value=-1) on the padded tail
    pad_mask = jnp.arange(T)[None, :, None] < lengths[:, None, None]
    x = jnp.where(pad_mask, x, -1.0)

    fwd = jax.jit(lstm_model_forward)
    out = jax.block_until_ready(fwd(params, x, lengths))
    ref = jax.block_until_ready(reference_forward(params, x, lengths))

    assert out.shape == (B, T, output_size), out.shape
    max_diff = float(jnp.max(jnp.abs(out - ref)))
    assert max_diff < 5e-2, f"mismatch vs reference: {max_diff}"
    print("KERNEL_OK")
</pallas_src>

<mosaic_0001>
module attributes {stable_mosaic.version = 11 : i64} {
  func.func @kernel(%arg0: i32, %arg1: memref<64x16xbf16, #tpu.memory_space<vmem>>, %arg2: memref<8x1xi32, #tpu.memory_space<vmem>>, %arg3: memref<16x128xbf16, #tpu.memory_space<vmem>>, %arg4: memref<32x128xbf16, #tpu.memory_space<vmem>>, %arg5: memref<1x128xf32, #tpu.memory_space<vmem>>, %arg6: memref<32x128xbf16, #tpu.memory_space<vmem>>, %arg7: memref<32x128xbf16, #tpu.memory_space<vmem>>, %arg8: memref<1x128xf32, #tpu.memory_space<vmem>>, %arg9: memref<32x128xbf16, #tpu.memory_space<vmem>>, %arg10: memref<32x128xbf16, #tpu.memory_space<vmem>>, %arg11: memref<1x128xf32, #tpu.memory_space<vmem>>, %arg12: memref<64x32xf32, #tpu.memory_space<vmem>>, %arg13: memref<64x32xbf16, #tpu.memory_space<vmem>>, %arg14: memref<64x128xf32, #tpu.memory_space<vmem>>, %arg15: memref<8x32xf32, #tpu.memory_space<vmem>>, %arg16: memref<8x32xf32, #tpu.memory_space<vmem>>) attributes {dimension_semantics = [#tpu.dimension_semantics<arbitrary>], iteration_bounds = array<i64: 1>, scalar_prefetch = 0 : i64, scratch_operands = 4 : i64, tpu.core_type = #tpu.core_type<tc>, window_params = [{pipeline_mode = #tpu.pipeline_mode<synchronous>, transform_indices = @transform_0, window_bounds = array<i64: 64, 16>}, {pipeline_mode = #tpu.pipeline_mode<synchronous>, transform_indices = @transform_1, window_bounds = array<i64: 8, 1>}, {pipeline_mode = #tpu.pipeline_mode<synchronous>, transform_indices = @transform_2, window_bounds = array<i64: 16, 128>}, {pipeline_mode = #tpu.pipeline_mode<synchronous>, transform_indices = @transform_3, window_bounds = array<i64: 32, 128>}, {pipeline_mode = #tpu.pipeline_mode<synchronous>, transform_indices = @transform_4, window_bounds = array<i64: 1, 128>}, {pipeline_mode = #tpu.pipeline_mode<synchronous>, transform_indices = @transform_5, window_bounds = array<i64: 32, 128>}, {pipeline_mode = #tpu.pipeline_mode<synchronous>, transform_indices = @transform_6, window_bounds = array<i64: 32, 128>}, {pipeline_mode = #tpu.pipeline_mode<synchronous>, transform_indices = @transform_7, window_bounds = array<i64: 1, 128>}, {pipeline_mode = #tpu.pipeline_mode<synchronous>, transform_indices = @transform_8, window_bounds = array<i64: 32, 128>}, {pipeline_mode = #tpu.pipeline_mode<synchronous>, transform_indices = @transform_9, window_bounds = array<i64: 32, 128>}, {pipeline_mode = #tpu.pipeline_mode<synchronous>, transform_indices = @transform_10, window_bounds = array<i64: 1, 128>}, {pipeline_mode = #tpu.pipeline_mode<synchronous>, transform_indices = @transform_11, window_bounds = array<i64: 64, 32>}]} {
    %c0 = arith.constant 0 : index
    %c0_0 = arith.constant 0 : index
    %0 = vector.load %arg1[%c0, %c0_0] : memref<64x16xbf16, #tpu.memory_space<vmem>>, vector<64x16xbf16>
    %c0_1 = arith.constant 0 : index
    %c0_2 = arith.constant 0 : index
    %1 = vector.load %arg3[%c0_1, %c0_2] : memref<16x128xbf16, #tpu.memory_space<vmem>>, vector<16x128xbf16>
    %cst = arith.constant dense<0.000000e+00> : vector<64x128xf32>
    %2 = tpu.matmul %0, %1, %cst {dimension_numbers = #tpu.dot_dimension_numbers<[1], [0], [0], [1], [0, 0, 1, 1], [], []>} : vector<64x16xbf16>, vector<16x128xbf16>, vector<64x128xf32> -> vector<64x128xf32>
    %c0_3 = arith.constant 0 : index
    %c0_4 = arith.constant 0 : index
    %3 = vector.load %arg5[%c0_3, %c0_4] : memref<1x128xf32, #tpu.memory_space<vmem>>, vector<1x128xf32>
    %4 = vector.broadcast %3 : vector<1x128xf32> to vector<64x128xf32>
    %5 = arith.addf %2, %4 : vector<64x128xf32>
    %c0_5 = arith.constant 0 : index
    %c0_6 = arith.constant 0 : index
    %6 = vector.load %arg14[%c0_5, %c0_6] : memref<64x128xf32, #tpu.memory_space<vmem>>, vector<64x128xf32>
    tpu.vector_store %arg14[%c0_5, %c0_6], %5 {strides = array<i32>} : memref<64x128xf32, #tpu.memory_space<vmem>>, vector<64x128xf32>,
    %cst_7 = arith.constant 0.000000e+00 : f32
    %7 = vector.broadcast %cst_7 : f32 to vector<8x32xf32>
    %c0_8 = arith.constant 0 : index
    %c0_9 = arith.constant 0 : index
    %8 = vector.load %arg15[%c0_8, %c0_9] : memref<8x32xf32, #tpu.memory_space<vmem>>, vector<8x32xf32>
    tpu.vector_store %arg15[%c0_8, %c0_9], %7 {strides = array<i32>} : memref<8x32xf32, #tpu.memory_space<vmem>>, vector<8x32xf32>,
    %cst_10 = arith.constant 0.000000e+00 : f32
    %9 = vector.broadcast %cst_10 : f32 to vector<8x32xf32>
    %c0_11 = arith.constant 0 : index
    %c0_12 = arith.constant 0 : index
    %10 = vector.load %arg16[%c0_11, %c0_12] : memref<8x32xf32, #tpu.memory_space<vmem>>, vector<8x32xf32>
    tpu.vector_store %arg16[%c0_11, %c0_12], %9 {strides = array<i32>} : memref<8x32xf32, #tpu.memory_space<vmem>>, vector<8x32xf32>,
    %c0_i32 = arith.constant 0 : i32
    %c8_i32 = arith.constant 8 : i32
    %11 = arith.muli %c0_i32, %c8_i32 : i32
    %12 = tpu.assume_multiple %11, 8 : i32
    %c0_13 = arith.constant 0 : index
    %c0_14 = arith.constant 0 : index
    %13 = vector.load %arg15[%c0_13, %c0_14] : memref<8x32xf32, #tpu.memory_space<vmem>>, vector<8x32xf32>
    %c0_15 = arith.constant 0 : index
    %c0_16 = arith.constant 0 : index
    %14 = vector.load %arg16[%c0_15, %c0_16] : memref<8x32xf32, #tpu.memory_space<vmem>>, vector<8x32xf32>
    %15 = arith.index_cast %12 : i32 to index
    %c0_17 = arith.constant 0 : index
    %16 = vector.load %arg14[%15, %c0_17] : memref<64x128xf32, #tpu.memory_space<vmem>>, vector<8x128xf32>
    %17 = arith.truncf %13 : vector<8x32xf32> to vector<8x32xbf16>
    %c0_18 = arith.constant 0 : index
    %c0_19 = arith.constant 0 : index
    %18 = vector.load %arg4[%c0_18, %c0_19] : memref<32x128xbf16, #tpu.memory_space<vmem>>, vector<32x128xbf16>
    %cst_20 = arith.constant dense<0.000000e+00> : vector<8x128xf32>
    %19 = tpu.matmul %17, %18, %cst_20 {dimension_numbers = #tpu.dot_dimension_numbers<[1], [0], [0], [1], [0, 0, 1, 1], [], []>} : vector<8x32xbf16>, vector<32x128xbf16>, vector<8x128xf32> -> vector<8x128xf32>
    %20 = arith.addf %16, %19 : vector<8x128xf32>
    %21 = vector.extract_strided_slice %20 {offsets = [0, 0], sizes = [8, 32], strides = [1, 1]} : vector<8x128xf32> to vector<8x32xf32>
    %22 = arith.negf %21 : vector<8x32xf32>
    %23 = math.exp %22 : vector<8x32xf32>
    %cst_21 = arith.constant 1.000000e+00 : f32
    %24 = vector.broadcast %cst_21 : f32 to vector<8x32xf32>
    %25 = arith.addf %24, %23 : vector<8x32xf32>
    %26 = arith.divf %24, %25 : vector<8x32xf32>
    %27 = vector.extract_strided_slice %20 {offsets = [0, 32], sizes = [8, 32], strides = [1, 1]} : vector<8x128xf32> to vector<8x32xf32>
    %28 = arith.negf %27 : vector<8x32xf32>
    %29 = math.exp %28 : vector<8x32xf32>
    %cst_22 = arith.constant 1.000000e+00 : f32
    %30 = vector.broadcast %cst_22 : f32 to vector<8x32xf32>
    %31 = arith.addf %30, %29 : vector<8x32xf32>
    %32 = arith.divf %30, %31 : vector<8x32xf32>
    %33 = vector.extract_strided_slice %20 {offsets = [0, 64], sizes = [8, 32], strides = [1, 1]} : vector<8x128xf32> to vector<8x32xf32>
    %34 = math.tanh %33 : vector<8x32xf32>
    %35 = vector.extract_strided_slice %20 {offsets = [0, 96], sizes = [8, 32], strides = [1, 1]} : vector<8x128xf32> to vector<8x32xf32>
    %36 = arith.negf %35 : vector<8x32xf32>
    %37 = math.exp %36 : vector<8x32xf32>
    %cst_23 = arith.constant 1.000000e+00 : f32
    %38 = vector.broadcast %cst_23 : f32 to vector<8x32xf32>
    %39 = arith.addf %38, %37 : vector<8x32xf32>
    %40 = arith.divf %38, %39 : vector<8x32xf32>
    %41 = arith.mulf %32, %14 : vector<8x32xf32>
    %42 = arith.mulf %26, %34 : vector<8x32xf32>
    %43 = arith.addf %41, %42 : vector<8x32xf32>
    %44 = math.tanh %43 : vector<8x32xf32>
    %45 = arith.mulf %40, %44 : vector<8x32xf32>
    %c0_24 = arith.constant 0 : index
    %c0_25 = arith.constant 0 : index
    %46 = vector.load %arg16[%c0_24, %c0_25] : memref<8x32xf32, #tpu.memory_space<vmem>>, vector<8x32xf32>
    tpu.vector_store %arg16[%c0_24, %c0_25], %43 {strides = array<i32>} : memref<8x32xf32, #tpu.memory_space<vmem>>, vector<8x32xf32>,
    %c0_26 = arith.constant 0 : index
    %c0_27 = arith.constant 0 : index
    %47 = vector.load %arg15[%c0_26, %c0_27] : memref<8x32xf32, #tpu.memory_space<vmem>>, vector<8x32xf32>
    tpu.vector_store %arg15[%c0_26, %c0_27], %45 {strides = array<i32>} : memref<8x32xf32, #tpu.memory_space<vmem>>, vector<8x32xf32>,
    %48 = arith.truncf %45 : vector<8x32xf32> to vector<8x32xbf16>
    %49 = arith.index_cast %12 : i32 to index
    %c0_28 = arith.constant 0 : index
    %50 = vector.load %arg13[%49, %c0_28] : memref<64x32xbf16, #tpu.memory_space<vmem>>, vector<8x32xbf16>
    tpu.vector_store %arg13[%49, %c0_28], %48 {strides = array<i32>} : memref<64x32xbf16, #tpu.memory_space<vmem>>, vector<8x32xbf16>,
    %c1_i32 = arith.constant 1 : i32
    %c8_i32_29 = arith.constant 8 : i32
    %51 = arith.muli %c1_i32, %c8_i32_29 : i32
    %52 = tpu.assume_multiple %51, 8 : i32
    %c0_30 = arith.constant 0 : index
    %c0_31 = arith.constant 0 : index
    %53 = vector.load %arg15[%c0_30, %c0_31] : memref<8x32xf32, #tpu.memory_space<vmem>>, vector<8x32xf32>
    %c0_32 = arith.constant 0 : index
    %c0_33 = arith.constant 0 : index
    %54 = vector.load %arg16[%c0_32, %c0_33] : memref<8x32xf32, #tpu.memory_space<vmem>>, vector<8x32xf32>
    %55 = arith.index_cast %52 : i32 to index
    %c0_34 = arith.constant 0 : index
    %56 = vector.load %arg14[%55, %c0_34] : memref<64x128xf32, #tpu.memory_space<vmem>>, vector<8x128xf32>
    %57 = arith.truncf %53 : vector<8x32xf32> to vector<8x32xbf16>
    %c0_35 = arith.constant 0 : index
    %c0_36 = arith.constant 0 : index
    %58 = vector.load %arg4[%c0_35, %c0_36] : memref<32x128xbf16, #tpu.memory_space<vmem>>, vector<32x128xbf16>
    %cst_37 = arith.constant dense<0.000000e+00> : vector<8x128xf32>
    %59 = tpu.matmul %57, %58, %cst_37 {dimension_numbers = #tpu.dot_dimension_numbers<[1], [0], [0], [1], [0, 0, 1, 1], [], []>} : vector<8x32xbf16>, vector<32x128xbf16>, vector<8x128xf32> -> vector<8x128xf32>
    %60 = arith.addf %56, %59 : vector<8x128xf32>
    %61 = vector.extract_strided_slice %60 {offsets = [0, 0], sizes = [8, 32], strides = [1, 1]} : vector<8x128xf32> to vector<8x32xf32>
    %62 = arith.negf %61 : vector<8x32xf32>
    %63 = math.exp %62 : vector<8x32xf32>
    %cst_38 = arith.constant 1.000000e+00 : f32
    %64 = vector.broadcast %cst_38 : f32 to vector<8x32xf32>
    %65 = arith.addf %64, %63 : vector<8x32xf32>
    %66 = arith.divf %64, %65 : vector<8x32xf32>
    %67 = vector.extract_strided_slice %60 {offsets = [0, 32], sizes = [8, 32], strides = [1, 1]} : vector<8x128xf32> to vector<8x32xf32>
    %68 = arith.negf %67 : vector<8x32xf32>
    %69 = math.exp %68 : vector<8x32xf32>
    %cst_39 = arith.constant 1.000000e+00 : f32
    %70 = vector.broadcast %cst_39 : f32 to vector<8x32xf32>
    %71 = arith.addf %70, %69 : vector<8x32xf32>
    %72 = arith.divf %70, %71 : vector<8x32xf32>
    %73 = vector.extract_strided_slice %60 {offsets = [0, 64], sizes = [8, 32], strides = [1, 1]} : vector<8x128xf32> to vector<8x32xf32>
    %74 = math.tanh %73 : vector<8x32xf32>
    %75 = vector.extract_strided_slice %60 {offsets = [0, 96], sizes = [8, 32], strides = [1, 1]} : vector<8x128xf32> to vector<8x32xf32>
    %76 = arith.negf %75 : vector<8x32xf32>
    %77 = math.exp %76 : vector<8x32xf32>
    %cst_40 = arith.constant 1.000000e+00 : f32
    %78 = vector.broadcast %cst_40 : f32 to vector<8x32xf32>
    %79 = arith.addf %78, %77 : vector<8x32xf32>
    %80 = arith.divf %78, %79 : vector<8x32xf32>
    %81 = arith.mulf %72, %54 : vector<8x32xf32>
    %82 = arith.mulf %66, %74 : vector<8x32xf32>
    %83 = arith.addf %81, %82 : vector<8x32xf32>
    %84 = math.tanh %83 : vector<8x32xf32>
    %85 = arith.mulf %80, %84 : vector<8x32xf32>
    %c0_41 = arith.constant 0 : index
    %c0_42 = arith.constant 0 : index
    %86 = vector.load %arg16[%c0_41, %c0_42] : memref<8x32xf32, #tpu.memory_space<vmem>>, vector<8x32xf32>
    tpu.vector_store %arg16[%c0_41, %c0_42], %83 {strides = array<i32>} : memref<8x32xf32, #tpu.memory_space<vmem>>, vector<8x32xf32>,
    %c0_43 = arith.constant 0 : index
    %c0_44 = arith.constant 0 : index
    %87 = vector.load %arg15[%c0_43, %c0_44] : memref<8x32xf32, #tpu.memory_space<vmem>>, vector<8x32xf32>
    tpu.vector_store %arg15[%c0_43, %c0_44], %85 {strides = array<i32>} : memref<8x32xf32, #tpu.memory_space<vmem>>, vector<8x32xf32>,
    %88 = arith.truncf %85 : vector<8x32xf32> to vector<8x32xbf16>
    %89 = arith.index_cast %52 : i32 to index
    %c0_45 = arith.constant 0 : index
    %90 = vector.load %arg13[%89, %c0_45] : memref<64x32xbf16, #tpu.memory_space<vmem>>, vector<8x32xbf16>
    tpu.vector_store %arg13[%89, %c0_45], %88 {strides = array<i32>} : memref<64x32xbf16, #tpu.memory_space<vmem>>, vector<8x32xbf16>,
    %c2_i32 = arith.constant 2 : i32
    %c8_i32_46 = arith.constant 8 : i32
    %91 = arith.muli %c2_i32, %c8_i32_46 : i32
    %92 = tpu.assume_multiple %91, 8 : i32
    %c0_47 = arith.constant 0 : index
    %c0_48 = arith.constant 0 : index
    %93 = vector.load %arg15[%c0_47, %c0_48] : memref<8x32xf32, #tpu.memory_space<vmem>>, vector<8x32xf32>
    %c0_49 = arith.constant 0 : index
    %c0_50 = arith.constant 0 : index
    %94 = vector.load %arg16[%c0_49, %c0_50] : memref<8x32xf32, #tpu.memory_space<vmem>>, vector<8x32xf32>
    %95 = arith.index_cast %92 : i32 to index
    %c0_51 = arith.constant 0 : index
    %96 = vector.load %arg14[%95, %c0_51] : memref<64x128xf32, #tpu.memory_space<vmem>>, vector<8x128xf32>
    %97 = arith.truncf %93 : vector<8x32xf32> to vector<8x32xbf16>
    %c0_52 = arith.constant 0 : index
    %c0_53 = arith.constant 0 : index
    %98 = vector.load %arg4[%c0_52, %c0_53] : memref<32x128xbf16, #tpu.memory_space<vmem>>, vector<32x128xbf16>
    %cst_54 = arith.constant dense<0.000000e+00> : vector<8x128xf32>
    %99 = tpu.matmul %97, %98, %cst_54 {dimension_numbers = #tpu.dot_dimension_numbers<[1], [0], [0], [1], [0, 0, 1, 1], [], []>} : vector<8x32xbf16>, vector<32x128xbf16>, vector<8x128xf32> -> vector<8x128xf32>
    %100 = arith.addf %96, %99 : vector<8x128xf32>
    %101 = vector.extract_strided_slice %100 {offsets = [0, 0], sizes = [8, 32], strides = [1, 1]} : vector<8x128xf32> to vector<8x32xf32>
    %102 = arith.negf %101 : vector<8x32xf32>
    %103 = math.exp %102 : vector<8x32xf32>
    %cst_55 = arith.constant 1.000000e+00 : f32
    %104 = vector.broadcast %cst_55 : f32 to vector<8x32xf32>
    %105 = arith.addf %104, %103 : vector<8x32xf32>
    %106 = arith.divf %104, %105 : vector<8x32xf32>
    %107 = vector.extract_strided_slice %100 {offsets = [0, 32], sizes = [8, 32], strides = [1, 1]} : vector<8x128xf32> to vector<8x32xf32>
    %108 = arith.negf %107 : vector<8x32xf32>
    %109 = math.exp %108 : vector<8x32xf32>
    %cst_56 = arith.constant 1.000000e+00 : f32
    %110 = vector.broadcast %cst_56 : f32 to vector<8x32xf32>
    %111 = arith.addf %110, %109 : vector<8x32xf32>
    %112 = arith.divf %110, %111 : vector<8x32xf32>
    %113 = vector.extract_strided_slice %100 {offsets = [0, 64], sizes = [8, 32], strides = [1, 1]} : vector<8x128xf32> to vector<8x32xf32>
    %114 = math.tanh %113 : vector<8x32xf32>
    %115 = vector.extract_strided_slice %100 {offsets = [0, 96], sizes = [8, 32], strides = [1, 1]} : vector<8x128xf32> to vector<8x32xf32>
    %116 = arith.negf %115 : vector<8x32xf32>
    %117 = math.exp %116 : vector<8x32xf32>
    %cst_57 = arith.constant 1.000000e+00 : f32
    %118 = vector.broadcast %cst_57 : f32 to vector<8x32xf32>
    %119 = arith.addf %118, %117 : vector<8x32xf32>
    %120 = arith.divf %118, %119 : vector<8x32xf32>
    %121 = arith.mulf %112, %94 : vector<8x32xf32>
    %122 = arith.mulf %106, %114 : vector<8x32xf32>
    %123 = arith.addf %121, %122 : vector<8x32xf32>
    %124 = math.tanh %123 : vector<8x32xf32>
    %125 = arith.mulf %120, %124 : vector<8x32xf32>
    %c0_58 = arith.constant 0 : index
    %c0_59 = arith.constant 0 : index
    %126 = vector.load %arg16[%c0_58, %c0_59] : memref<8x32xf32, #tpu.memory_space<vmem>>, vector<8x32xf32>
    tpu.vector_store %arg16[%c0_58, %c0_59], %123 {strides = array<i32>} : memref<8x32xf32, #tpu.memory_space<vmem>>, vector<8x32xf32>,
    %c0_60 = arith.constant 0 : index
    %c0_61 = arith.constant 0 : index
    %127 = vector.load %arg15[%c0_60, %c0_61] : memref<8x32xf32, #tpu.memory_space<vmem>>, vector<8x32xf32>
    tpu.vector_store %arg15[%c0_60, %c0_61], %125 {strides = array<i32>} : memref<8x32xf32, #tpu.memory_space<vmem>>, vector<8x32xf32>,
    %128 = arith.truncf %125 : vector<8x32xf32> to vector<8x32xbf16>
    %129 = arith.index_cast %92 : i32 to index
    %c0_62 = arith.constant 0 : index
    %130 = vector.load %arg13[%129, %c0_62] : memref<64x32xbf16, #tpu.memory_space<vmem>>, vector<8x32xbf16>
    tpu.vector_store %arg13[%129, %c0_62], %128 {strides = array<i32>} : memref<64x32xbf16, #tpu.memory_space<vmem>>, vector<8x32xbf16>,
    %c3_i32 = arith.constant 3 : i32
    %c8_i32_63 = arith.constant 8 : i32
    %131 = arith.muli %c3_i32, %c8_i32_63 : i32
    %132 = tpu.assume_multiple %131, 8 : i32
    %c0_64 = arith.constant 0 : index
    %c0_65 = arith.constant 0 : index
    %133 = vector.load %arg15[%c0_64, %c0_65] : memref<8x32xf32, #tpu.memory_space<vmem>>, vector<8x32xf32>
    %c0_66 = arith.constant 0 : index
    %c0_67 = arith.constant 0 : index
    %134 = vector.load %arg16[%c0_66, %c0_67] : memref<8x32xf32, #tpu.memory_space<vmem>>, vector<8x32xf32>
    %135 = arith.index_cast %132 : i32 to index
    %c0_68 = arith.constant 0 : index
    %136 = vector.load %arg14[%135, %c0_68] : memref<64x128xf32, #tpu.memory_space<vmem>>, vector<8x128xf32>
    %137 = arith.truncf %133 : vector<8x32xf32> to vector<8x32xbf16>
    %c0_69 = arith.constant 0 : index
    %c0_70 = arith.constant 0 : index
    %138 = vector.load %arg4[%c0_69, %c0_70] : memref<32x128xbf16, #tpu.memory_space<vmem>>, vector<32x128xbf16>
    %cst_71 = arith.constant dense<0.000000e+00> : vector<8x128xf32>
    %139 = tpu.matmul %137, %138, %cst_71 {dimension_numbers = #tpu.dot_dimension_numbers<[1], [0], [0], [1], [0, 0, 1, 1], [], []>} : vector<8x32xbf16>, vector<32x128xbf16>, vector<8x128xf32> -> vector<8x128xf32>
    %140 = arith.addf %136, %139 : vector<8x128xf32>
    %141 = vector.extract_strided_slice %140 {offsets = [0, 0], sizes = [8, 32], strides = [1, 1]} : vector<8x128xf32> to vector<8x32xf32>
    %142 = arith.negf %141 : vector<8x32xf32>
    %143 = math.exp %142 : vector<8x32xf32>
    %cst_72 = arith.constant 1.000000e+00 : f32
    %144 = vector.broadcast %cst_72 : f32 to vector<8x32xf32>
    %145 = arith.addf %144, %143 : vector<8x32xf32>
    %146 = arith.divf %144, %145 : vector<8x32xf32>
    %147 = vector.extract_strided_slice %140 {offsets = [0, 32], sizes = [8, 32], strides = [1, 1]} : vector<8x128xf32> to vector<8x32xf32>
    %148 = arith.negf %147 : vector<8x32xf32>
    %149 = math.exp %148 : vector<8x32xf32>
    %cst_73 = arith.constant 1.000000e+00 : f32
    %150 = vector.broadcast %cst_73 : f32 to vector<8x32xf32>
    %151 = arith.addf %150, %149 : vector<8x32xf32>
    %152 = arith.divf %150, %151 : vector<8x32xf32>
    %153 = vector.extract_strided_slice %140 {offsets = [0, 64], sizes = [8, 32], strides = [1, 1]} : vector<8x128xf32> to vector<8x32xf32>
    %154 = math.tanh %153 : vector<8x32xf32>
    %155 = vector.extract_strided_slice %140 {offsets = [0, 96], sizes = [8, 32], strides = [1, 1]} : vector<8x128xf32> to vector<8x32xf32>
    %156 = arith.negf %155 : vector<8x32xf32>
    %157 = math.exp %156 : vector<8x32xf32>
    %cst_74 = arith.constant 1.000000e+00 : f32
    %158 = vector.broadcast %cst_74 : f32 to vector<8x32xf32>
    %159 = arith.addf %158, %157 : vector<8x32xf32>
    %160 = arith.divf %158, %159 : vector<8x32xf32>
    %161 = arith.mulf %152, %134 : vector<8x32xf32>
    %162 = arith.mulf %146, %154 : vector<8x32xf32>
    %163 = arith.addf %161, %162 : vector<8x32xf32>
    %164 = math.tanh %163 : vector<8x32xf32>
    %165 = arith.mulf %160, %164 : vector<8x32xf32>
    %c0_75 = arith.constant 0 : index
    %c0_76 = arith.constant 0 : index
    %166 = vector.load %arg16[%c0_75, %c0_76] : memref<8x32xf32, #tpu.memory_space<vmem>>, vector<8x32xf32>
    tpu.vector_store %arg16[%c0_75, %c0_76], %163 {strides = array<i32>} : memref<8x32xf32, #tpu.memory_space<vmem>>, vector<8x32xf32>,
    %c0_77 = arith.constant 0 : index
    %c0_78 = arith.constant 0 : index
    %167 = vector.load %arg15[%c0_77, %c0_78] : memref<8x32xf32, #tpu.memory_space<vmem>>, vector<8x32xf32>
    tpu.vector_store %arg15[%c0_77, %c0_78], %165 {strides = array<i32>} : memref<8x32xf32, #tpu.memory_space<vmem>>, vector<8x32xf32>,
    %168 = arith.truncf %165 : vector<8x32xf32> to vector<8x32xbf16>
    %169 = arith.index_cast %132 : i32 to index
    %c0_79 = arith.constant 0 : index
    %170 = vector.load %arg13[%169, %c0_79] : memref<64x32xbf16, #tpu.memory_space<vmem>>, vector<8x32xbf16>
    tpu.vector_store %arg13[%169, %c0_79], %168 {strides = array<i32>} : memref<64x32xbf16, #tpu.memory_space<vmem>>, vector<8x32xbf16>,
    %c4_i32 = arith.constant 4 : i32
    %c8_i32_80 = arith.constant 8 : i32
    %171 = arith.muli %c4_i32, %c8_i32_80 : i32
    %172 = tpu.assume_multiple %171, 8 : i32
    %c0_81 = arith.constant 0 : index
    %c0_82 = arith.constant 0 : index
    %173 = vector.load %arg15[%c0_81, %c0_82] : memref<8x32xf32, #tpu.memory_space<vmem>>, vector<8x32xf32>
    %c0_83 = arith.constant 0 : index
    %c0_84 = arith.constant 0 : index
    %174 = vector.load %arg16[%c0_83, %c0_84] : memref<8x32xf32, #tpu.memory_space<vmem>>, vector<8x32xf32>
    %175 = arith.index_cast %172 : i32 to index
    %c0_85 = arith.constant 0 : index
    %176 = vector.load %arg14[%175, %c0_85] : memref<64x128xf32, #tpu.memory_space<vmem>>, vector<8x128xf32>
    %177 = arith.truncf %173 : vector<8x32xf32> to vector<8x32xbf16>
    %c0_86 = arith.constant 0 : index
    %c0_87 = arith.constant 0 : index
    %178 = vector.load %arg4[%c0_86, %c0_87] : memref<32x128xbf16, #tpu.memory_space<vmem>>, vector<32x128xbf16>
    %cst_88 = arith.constant dense<0.000000e+00> : vector<8x128xf32>
    %179 = tpu.matmul %177, %178, %cst_88 {dimension_numbers = #tpu.dot_dimension_numbers<[1], [0], [0], [1], [0, 0, 1, 1], [], []>} : vector<8x32xbf16>, vector<32x128xbf16>, vector<8x128xf32> -> vector<8x128xf32>
    %180 = arith.addf %176, %179 : vector<8x128xf32>
    %181 = vector.extract_strided_slice %180 {offsets = [0, 0], sizes = [8, 32], strides = [1, 1]} : vector<8x128xf32> to vector<8x32xf32>
    %182 = arith.negf %181 : vector<8x32xf32>
    %183 = math.exp %182 : vector<8x32xf32>
    %cst_89 = arith.constant 1.000000e+00 : f32
    %184 = vector.broadcast %cst_89 : f32 to vector<8x32xf32>
    %185 = arith.addf %184, %183 : vector<8x32xf32>
    %186 = arith.divf %184, %185 : vector<8x32xf32>
    %187 = vector.extract_strided_slice %180 {offsets = [0, 32], sizes = [8, 32], strides = [1, 1]} : vector<8x128xf32> to vector<8x32xf32>
    %188 = arith.negf %187 : vector<8x32xf32>
    %189 = math.exp %188 : vector<8x32xf32>
    %cst_90 = arith.constant 1.000000e+00 : f32
    %190 = vector.broadcast %cst_90 : f32 to vector<8x32xf32>
    %191 = arith.addf %190, %189 : vector<8x32xf32>
    %192 = arith.divf %190, %191 : vector<8x32xf32>
    %193 = vector.extract_strided_slice %180 {offsets = [0, 64], sizes = [8, 32], strides = [1, 1]} : vector<8x128xf32> to vector<8x32xf32>
    %194 = math.tanh %193 : vector<8x32xf32>
    %195 = vector.extract_strided_slice %180 {offsets = [0, 96], sizes = [8, 32], strides = [1, 1]} : vector<8x128xf32> to vector<8x32xf32>
    %196 = arith.negf %195 : vector<8x32xf32>
    %197 = math.exp %196 : vector<8x32xf32>
    %cst_91 = arith.constant 1.000000e+00 : f32
    %198 = vector.broadcast %cst_91 : f32 to vector<8x32xf32>
    %199 = arith.addf %198, %197 : vector<8x32xf32>
    %200 = arith.divf %198, %199 : vector<8x32xf32>
    %201 = arith.mulf %192, %174 : vector<8x32xf32>
    %202 = arith.mulf %186, %194 : vector<8x32xf32>
    %203 = arith.addf %201, %202 : vector<8x32xf32>
    %204 = math.tanh %203 : vector<8x32xf32>
    %205 = arith.mulf %200, %204 : vector<8x32xf32>
    %c0_92 = arith.constant 0 : index
    %c0_93 = arith.constant 0 : index
    %206 = vector.load %arg16[%c0_92, %c0_93] : memref<8x32xf32, #tpu.memory_space<vmem>>, vector<8x32xf32>
    tpu.vector_store %arg16[%c0_92, %c0_93], %203 {strides = array<i32>} : memref<8x32xf32, #tpu.memory_space<vmem>>, vector<8x32xf32>,
    %c0_94 = arith.constant 0 : index
    %c0_95 = arith.constant 0 : index
    %207 = vector.load %arg15[%c0_94, %c0_95] : memref<8x32xf32, #tpu.memory_space<vmem>>, vector<8x32xf32>
    tpu.vector_store %arg15[%c0_94, %c0_95], %205 {strides = array<i32>} : memref<8x32xf32, #tpu.memory_space<vmem>>, vector<8x32xf32>,
    %208 = arith.truncf %205 : vector<8x32xf32> to vector<8x32xbf16>
    %209 = arith.index_cast %172 : i32 to index
    %c0_96 = arith.constant 0 : index
    %210 = vector.load %arg13[%209, %c0_96] : memref<64x32xbf16, #tpu.memory_space<vmem>>, vector<8x32xbf16>
    tpu.vector_store %arg13[%209, %c0_96], %208 {strides = array<i32>} : memref<64x32xbf16, #tpu.memory_space<vmem>>, vector<8x32xbf16>,
    %c5_i32 = arith.constant 5 : i32
    %c8_i32_97 = arith.constant 8 : i32
    %211 = arith.muli %c5_i32, %c8_i32_97 : i32
    %212 = tpu.assume_multiple %211, 8 : i32
    %c0_98 = arith.constant 0 : index
    %c0_99 = arith.constant 0 : index
    %213 = vector.load %arg15[%c0_98, %c0_99] : memref<8x32xf32, #tpu.memory_space<vmem>>, vector<8x32xf32>
    %c0_100 = arith.constant 0 : index
    %c0_101 = arith.constant 0 : index
    %214 = vector.load %arg16[%c0_100, %c0_101] : memref<8x32xf32, #tpu.memory_space<vmem>>, vector<8x32xf32>
    %215 = arith.index_cast %212 : i32 to index
    %c0_102 = arith.constant 0 : index
    %216 = vector.load %arg14[%215, %c0_102] : memref<64x128xf32, #tpu.memory_space<vmem>>, vector<8x128xf32>
    %217 = arith.truncf %213 : vector<8x32xf32> to vector<8x32xbf16>
    %c0_103 = arith.constant 0 : index
    %c0_104 = arith.constant 0 : index
    %218 = vector.load %arg4[%c0_103, %c0_104] : memref<32x128xbf16, #tpu.memory_space<vmem>>, vector<32x128xbf16>
    %cst_105 = arith.constant dense<0.000000e+00> : vector<8x128xf32>
    %219 = tpu.matmul %217, %218, %cst_105 {dimension_numbers = #tpu.dot_dimension_numbers<[1], [0], [0], [1], [0, 0, 1, 1], [], []>} : vector<8x32xbf16>, vector<32x128xbf16>, vector<8x128xf32> -> vector<8x128xf32>
    %220 = arith.addf %216, %219 : vector<8x128xf32>
    %221 = vector.extract_strided_slice %220 {offsets = [0, 0], sizes = [8, 32], strides = [1, 1]} : vector<8x128xf32> to vector<8x32xf32>
    %222 = arith.negf %221 : vector<8x32xf32>
    %223 = math.exp %222 : vector<8x32xf32>
    %cst_106 = arith.constant 1.000000e+00 : f32
    %224 = vector.broadcast %cst_106 : f32 to vector<8x32xf32>
    %225 = arith.addf %224, %223 : vector<8x32xf32>
    %226 = arith.divf %224, %225 : vector<8x32xf32>
    %227 = vector.extract_strided_slice %220 {offsets = [0, 32], sizes = [8, 32], strides = [1, 1]} : vector<8x128xf32> to vector<8x32xf32>
    %228 = arith.negf %227 : vector<8x32xf32>
    %229 = math.exp %228 : vector<8x32xf32>
    %cst_107 = arith.constant 1.000000e+00 : f32
    %230 = vector.broadcast %cst_107 : f32 to vector<8x32xf32>
    %231 = arith.addf %230, %229 : vector<8x32xf32>
    %232 = arith.divf %230, %231 : vector<8x32xf32>
    %233 = vector.extract_strided_slice %220 {offsets = [0, 64], sizes = [8, 32], strides = [1, 1]} : vector<8x128xf32> to vector<8x32xf32>
    %234 = math.tanh %233 : vector<8x32xf32>
    %235 = vector.extract_strided_slice %220 {offsets = [0, 96], sizes = [8, 32], strides = [1, 1]} : vector<8x128xf32> to vector<8x32xf32>
    %236 = arith.negf %235 : vector<8x32xf32>
    %237 = math.exp %236 : vector<8x32xf32>
    %cst_108 = arith.constant 1.000000e+00 : f32
    %238 = vector.broadcast %cst_108 : f32 to vector<8x32xf32>
    %239 = arith.addf %238, %237 : vector<8x32xf32>
    %240 = arith.divf %238, %239 : vector<8x32xf32>
    %241 = arith.mulf %232, %214 : vector<8x32xf32>
    %242 = arith.mulf %226, %234 : vector<8x32xf32>
    %243 = arith.addf %241, %242 : vector<8x32xf32>
    %244 = math.tanh %243 : vector<8x32xf32>
    %245 = arith.mulf %240, %244 : vector<8x32xf32>
    %c0_109 = arith.constant 0 : index
    %c0_110 = arith.constant 0 : index
    %246 = vector.load %arg16[%c0_109, %c0_110] : memref<8x32xf32, #tpu.memory_space<vmem>>, vector<8x32xf32>
    tpu.vector_store %arg16[%c0_109, %c0_110], %243 {strides = array<i32>} : memref<8x32xf32, #tpu.memory_space<vmem>>, vector<8x32xf32>,
    %c0_111 = arith.constant 0 : index
    %c0_112 = arith.constant 0 : index
    %247 = vector.load %arg15[%c0_111, %c0_112] : memref<8x32xf32, #tpu.memory_space<vmem>>, vector<8x32xf32>
    tpu.vector_store %arg15[%c0_111, %c0_112], %245 {strides = array<i32>} : memref<8x32xf32, #tpu.memory_space<vmem>>, vector<8x32xf32>,
    %248 = arith.truncf %245 : vector<8x32xf32> to vector<8x32xbf16>
    %249 = arith.index_cast %212 : i32 to index
    %c0_113 = arith.constant 0 : index
    %250 = vector.load %arg13[%249, %c0_113] : memref<64x32xbf16, #tpu.memory_space<vmem>>, vector<8x32xbf16>
    tpu.vector_store %arg13[%249, %c0_113], %248 {strides = array<i32>} : memref<64x32xbf16, #tpu.memory_space<vmem>>, vector<8x32xbf16>,
    %c6_i32 = arith.constant 6 : i32
    %c8_i32_114 = arith.constant 8 : i32
    %251 = arith.muli %c6_i32, %c8_i32_114 : i32
    %252 = tpu.assume_multiple %251, 8 : i32
    %c0_115 = arith.constant 0 : index
    %c0_116 = arith.constant 0 : index
    %253 = vector.load %arg15[%c0_115, %c0_116] : memref<8x32xf32, #tpu.memory_space<vmem>>, vector<8x32xf32>
    %c0_117 = arith.constant 0 : index
    %c0_118 = arith.constant 0 : index
    %254 = vector.load %arg16[%c0_117, %c0_118] : memref<8x32xf32, #tpu.memory_space<vmem>>, vector<8x32xf32>
    %255 = arith.index_cast %252 : i32 to index
    %c0_119 = arith.constant 0 : index
    %256 = vector.load %arg14[%255, %c0_119] : memref<64x128xf32, #tpu.memory_space<vmem>>, vector<8x128xf32>
    %257 = arith.truncf %253 : vector<8x32xf32> to vector<8x32xbf16>
    %c0_120 = arith.constant 0 : index
    %c0_121 = arith.constant 0 : index
    %258 = vector.load %arg4[%c0_120, %c0_121] : memref<32x128xbf16, #tpu.memory_space<vmem>>, vector<32x128xbf16>
    %cst_122 = arith.constant dense<0.000000e+00> : vector<8x128xf32>
    %259 = tpu.matmul %257, %258, %cst_122 {dimension_numbers = #tpu.dot_dimension_numbers<[1], [0], [0], [1], [0, 0, 1, 1], [], []>} : vector<8x32xbf16>, vector<32x128xbf16>, vector<8x128xf32> -> vector<8x128xf32>
    %260 = arith.addf %256, %259 : vector<8x128xf32>
    %261 = vector.extract_strided_slice %260 {offsets = [0, 0], sizes = [8, 32], strides = [1, 1]} : vector<8x128xf32> to vector<8x32xf32>
    %262 = arith.negf %261 : vector<8x32xf32>
    %263 = math.exp %262 : vector<8x32xf32>
    %cst_123 = arith.constant 1.000000e+00 : f32
    %264 = vector.broadcast %cst_123 : f32 to vector<8x32xf32>
    %265 = arith.addf %264, %263 : vector<8x32xf32>
    %266 = arith.divf %264, %265 : vector<8x32xf32>
    %267 = vector.extract_strided_slice %260 {offsets = [0, 32], sizes = [8, 32], strides = [1, 1]} : vector<8x128xf32> to vector<8x32xf32>
    %268 = arith.negf %267 : vector<8x32xf32>
    %269 = math.exp %268 : vector<8x32xf32>
    %cst_124 = arith.constant 1.000000e+00 : f32
    %270 = vector.broadcast %cst_124 : f32 to vector<8x32xf32>
    %271 = arith.addf %270, %269 : vector<8x32xf32>
    %272 = arith.divf %270, %271 : vector<8x32xf32>
    %273 = vector.extract_strided_slice %260 {offsets = [0, 64], sizes = [8, 32], strides = [1, 1]} : vector<8x128xf32> to vector<8x32xf32>
    %274 = math.tanh %273 : vector<8x32xf32>
    %275 = vector.extract_strided_slice %260 {offsets = [0, 96], sizes = [8, 32], strides = [1, 1]} : vector<8x128xf32> to vector<8x32xf32>
    %276 = arith.negf %275 : vector<8x32xf32>
    %277 = math.exp %276 : vector<8x32xf32>
    %cst_125 = arith.constant 1.000000e+00 : f32
    %278 = vector.broadcast %cst_125 : f32 to vector<8x32xf32>
    %279 = arith.addf %278, %277 : vector<8x32xf32>
    %280 = arith.divf %278, %279 : vector<8x32xf32>
    %281 = arith.mulf %272, %254 : vector<8x32xf32>
    %282 = arith.mulf %266, %274 : vector<8x32xf32>
    %283 = arith.addf %281, %282 : vector<8x32xf32>
    %284 = math.tanh %283 : vector<8x32xf32>
    %285 = arith.mulf %280, %284 : vector<8x32xf32>
    %c0_126 = arith.constant 0 : index
    %c0_127 = arith.constant 0 : index
    %286 = vector.load %arg16[%c0_126, %c0_127] : memref<8x32xf32, #tpu.memory_space<vmem>>, vector<8x32xf32>
    tpu.vector_store %arg16[%c0_126, %c0_127], %283 {strides = array<i32>} : memref<8x32xf32, #tpu.memory_space<vmem>>, vector<8x32xf32>,
    %c0_128 = arith.constant 0 : index
    %c0_129 = arith.constant 0 : index
    %287 = vector.load %arg15[%c0_128, %c0_129] : memref<8x32xf32, #tpu.memory_space<vmem>>, vector<8x32xf32>
    tpu.vector_store %arg15[%c0_128, %c0_129], %285 {strides = array<i32>} : memref<8x32xf32, #tpu.memory_space<vmem>>, vector<8x32xf32>,
    %288 = arith.truncf %285 : vector<8x32xf32> to vector<8x32xbf16>
    %289 = arith.index_cast %252 : i32 to index
    %c0_130 = arith.constant 0 : index
    %290 = vector.load %arg13[%289, %c0_130] : memref<64x32xbf16, #tpu.memory_space<vmem>>, vector<8x32xbf16>
    tpu.vector_store %arg13[%289, %c0_130], %288 {strides = array<i32>} : memref<64x32xbf16, #tpu.memory_space<vmem>>, vector<8x32xbf16>,
    %c7_i32 = arith.constant 7 : i32
    %c8_i32_131 = arith.constant 8 : i32
    %291 = arith.muli %c7_i32, %c8_i32_131 : i32
    %292 = tpu.assume_multiple %291, 8 : i32
    %c0_132 = arith.constant 0 : index
    %c0_133 = arith.constant 0 : index
    %293 = vector.load %arg15[%c0_132, %c0_133] : memref<8x32xf32, #tpu.memory_space<vmem>>, vector<8x32xf32>
    %c0_134 = arith.constant 0 : index
    %c0_135 = arith.constant 0 : index
    %294 = vector.load %arg16[%c0_134, %c0_135] : memref<8x32xf32, #tpu.memory_space<vmem>>, vector<8x32xf32>
    %295 = arith.index_cast %292 : i32 to index
    %c0_136 = arith.constant 0 : index
    %296 = vector.load %arg14[%295, %c0_136] : memref<64x128xf32, #tpu.memory_space<vmem>>, vector<8x128xf32>
    %297 = arith.truncf %293 : vector<8x32xf32> to vector<8x32xbf16>
    %c0_137 = arith.constant 0 : index
    %c0_138 = arith.constant 0 : index
    %298 = vector.load %arg4[%c0_137, %c0_138] : memref<32x128xbf16, #tpu.memory_space<vmem>>, vector<32x128xbf16>
    %cst_139 = arith.constant dense<0.000000e+00> : vector<8x128xf32>
    %299 = tpu.matmul %297, %298, %cst_139 {dimension_numbers = #tpu.dot_dimension_numbers<[1], [0], [0], [1], [0, 0, 1, 1], [], []>} : vector<8x32xbf16>, vector<32x128xbf16>, vector<8x128xf32> -> vector<8x128xf32>
    %300 = arith.addf %296, %299 : vector<8x128xf32>
    %301 = vector.extract_strided_slice %300 {offsets = [0, 0], sizes = [8, 32], strides = [1, 1]} : vector<8x128xf32> to vector<8x32xf32>
    %302 = arith.negf %301 : vector<8x32xf32>
    %303 = math.exp %302 : vector<8x32xf32>
    %cst_140 = arith.constant 1.000000e+00 : f32
    %304 = vector.broadcast %cst_140 : f32 to vector<8x32xf32>
    %305 = arith.addf %304, %303 : vector<8x32xf32>
    %306 = arith.divf %304, %305 : vector<8x32xf32>
    %307 = vector.extract_strided_slice %300 {offsets = [0, 32], sizes = [8, 32], strides = [1, 1]} : vector<8x128xf32> to vector<8x32xf32>
    %308 = arith.negf %307 : vector<8x32xf32>
    %309 = math.exp %308 : vector<8x32xf32>
    %cst_141 = arith.constant 1.000000e+00 : f32
    %310 = vector.broadcast %cst_141 : f32 to vector<8x32xf32>
    %311 = arith.addf %310, %309 : vector<8x32xf32>
    %312 = arith.divf %310, %311 : vector<8x32xf32>
    %313 = vector.extract_strided_slice %300 {offsets = [0, 64], sizes = [8, 32], strides = [1, 1]} : vector<8x128xf32> to vector<8x32xf32>
    %314 = math.tanh %313 : vector<8x32xf32>
    %315 = vector.extract_strided_slice %300 {offsets = [0, 96], sizes = [8, 32], strides = [1, 1]} : vector<8x128xf32> to vector<8x32xf32>
    %316 = arith.negf %315 : vector<8x32xf32>
    %317 = math.exp %316 : vector<8x32xf32>
    %cst_142 = arith.constant 1.000000e+00 : f32
    %318 = vector.broadcast %cst_142 : f32 to vector<8x32xf32>
    %319 = arith.addf %318, %317 : vector<8x32xf32>
    %320 = arith.divf %318, %319 : vector<8x32xf32>
    %321 = arith.mulf %312, %294 : vector<8x32xf32>
    %322 = arith.mulf %306, %314 : vector<8x32xf32>
    %323 = arith.addf %321, %322 : vector<8x32xf32>
    %324 = math.tanh %323 : vector<8x32xf32>
    %325 = arith.mulf %320, %324 : vector<8x32xf32>
    %c0_143 = arith.constant 0 : index
    %c0_144 = arith.constant 0 : index
    %326 = vector.load %arg16[%c0_143, %c0_144] : memref<8x32xf32, #tpu.memory_space<vmem>>, vector<8x32xf32>
    tpu.vector_store %arg16[%c0_143, %c0_144], %323 {strides = array<i32>} : memref<8x32xf32, #tpu.memory_space<vmem>>, vector<8x32xf32>,
    %c0_145 = arith.constant 0 : index
    %c0_146 = arith.constant 0 : index
    %327 = vector.load %arg15[%c0_145, %c0_146] : memref<8x32xf32, #tpu.memory_space<vmem>>, vector<8x32xf32>
    tpu.vector_store %arg15[%c0_145, %c0_146], %325 {strides = array<i32>} : memref<8x32xf32, #tpu.memory_space<vmem>>, vector<8x32xf32>,
    %328 = arith.truncf %325 : vector<8x32xf32> to vector<8x32xbf16>
    %329 = arith.index_cast %292 : i32 to index
    %c0_147 = arith.constant 0 : index
    %330 = vector.load %arg13[%329, %c0_147] : memref<64x32xbf16, #tpu.memory_space<vmem>>, vector<8x32xbf16>
    tpu.vector_store %arg13[%329, %c0_147], %328 {strides = array<i32>} : memref<64x32xbf16, #tpu.memory_space<vmem>>, vector<8x32xbf16>,
    %c8_i32_148 = arith.constant 8 : i32
    %c0_149 = arith.constant 0 : index
    %c0_150 = arith.constant 0 : index
    %331 = vector.load %arg13[%c0_149, %c0_150] : memref<64x32xbf16, #tpu.memory_space<vmem>>, vector<64x32xbf16>
    %c0_151 = arith.constant 0 : index
    %c0_152 = arith.constant 0 : index
    %332 = vector.load %arg6[%c0_151, %c0_152] : memref<32x128xbf16, #tpu.memory_space<vmem>>, vector<32x128xbf16>
    %cst_153 = arith.constant dense<0.000000e+00> : vector<64x128xf32>
    %333 = tpu.matmul %331, %332, %cst_153 {dimension_numbers = #tpu.dot_dimension_numbers<[1], [0], [0], [1], [0, 0, 1, 1], [], []>} : vector<64x32xbf16>, vector<32x128xbf16>, vector<64x128xf32> -> vector<64x128xf32>
    %c0_154 = arith.constant 0 : index
    %c0_155 = arith.constant 0 : index
    %334 = vector.load %arg8[%c0_154, %c0_155] : memref<1x128xf32, #tpu.memory_space<vmem>>, vector<1x128xf32>
    %335 = vector.broadcast %334 : vector<1x128xf32> to vector<64x128xf32>
    %336 = arith.addf %333, %335 : vector<64x128xf32>
    %c0_156 = arith.constant 0 : index
    %c0_157 = arith.constant 0 : index
    %337 = vector.load %arg14[%c0_156, %c0_157] : memref<64x128xf32, #tpu.memory_space<vmem>>, vector<64x128xf32>
    tpu.vector_store %arg14[%c0_156, %c0_157], %336 {strides = array<i32>} : memref<64x128xf32, #tpu.memory_space<vmem>>, vector<64x128xf32>,
    %cst_158 = arith.constant 0.000000e+00 : f32
    %338 = vector.broadcast %cst_158 : f32 to vector<8x32xf32>
    %c0_159 = arith.constant 0 : index
    %c0_160 = arith.constant 0 : index
    %339 = vector.load %arg15[%c0_159, %c0_160] : memref<8x32xf32, #tpu.memory_space<vmem>>, vector<8x32xf32>
    tpu.vector_store %arg15[%c0_159, %c0_160], %338 {strides = array<i32>} : memref<8x32xf32, #tpu.memory_space<vmem>>, vector<8x32xf32>,
    %cst_161 = arith.constant 0.000000e+00 : f32
    %340 = vector.broadcast %cst_161 : f32 to vector<8x32xf32>
    %c0_162 = arith.constant 0 : index
    %c0_163 = arith.constant 0 : index
    %341 = vector.load %arg16[%c0_162, %c0_163] : memref<8x32xf32, #tpu.memory_space<vmem>>, vector<8x32xf32>
    tpu.vector_store %arg16[%c0_162, %c0_163], %340 {strides = array<i32>} : memref<8x32xf32, #tpu.memory_space<vmem>>, vector<8x32xf32>,
    %c0_i32_164 = arith.constant 0 : i32
    %c8_i32_165 = arith.constant 8 : i32
    %342 = arith.muli %c0_i32_164, %c8_i32_165 : i32
    %343 = tpu.assume_multiple %342, 8 : i32
    %c0_166 = arith.constant 0 : index
    %c0_167 = arith.constant 0 : index
    %344 = vector.load %arg15[%c0_166, %c0_167] : memref<8x32xf32, #tpu.memory_space<vmem>>, vector<8x32xf32>
    %c0_168 = arith.constant 0 : index
    %c0_169 = arith.constant 0 : index
    %345 = vector.load %arg16[%c0_168, %c0_169] : memref<8x32xf32, #tpu.memory_space<vmem>>, vector<8x32xf32>
    %346 = arith.index_cast %343 : i32 to index
    %c0_170 = arith.constant 0 : index
    %347 = vector.load %arg14[%346, %c0_170] : memref<64x128xf32, #tpu.memory_space<vmem>>, vector<8x128xf32>
    %348 = arith.truncf %344 : vector<8x32xf32> to vector<8x32xbf16>
    %c0_171 = arith.constant 0 : index
    %c0_172 = arith.constant 0 : index
    %349 = vector.load %arg7[%c0_171, %c0_172] : memref<32x128xbf16, #tpu.memory_space<vmem>>, vector<32x128xbf16>
    %cst_173 = arith.constant dense<0.000000e+00> : vector<8x128xf32>
    %350 = tpu.matmul %348, %349, %cst_173 {dimension_numbers = #tpu.dot_dimension_numbers<[1], [0], [0], [1], [0, 0, 1, 1], [], []>} : vector<8x32xbf16>, vector<32x128xbf16>, vector<8x128xf32> -> vector<8x128xf32>
    %351 = arith.addf %347, %350 : vector<8x128xf32>
    %352 = vector.extract_strided_slice %351 {offsets = [0, 0], sizes = [8, 32], strides = [1, 1]} : vector<8x128xf32> to vector<8x32xf32>
    %353 = arith.negf %352 : vector<8x32xf32>
    %354 = math.exp %353 : vector<8x32xf32>
    %cst_174 = arith.constant 1.000000e+00 : f32
    %355 = vector.broadcast %cst_174 : f32 to vector<8x32xf32>
    %356 = arith.addf %355, %354 : vector<8x32xf32>
    %357 = arith.divf %355, %356 : vector<8x32xf32>
    %358 = vector.extract_strided_slice %351 {offsets = [0, 32], sizes = [8, 32], strides = [1, 1]} : vector<8x128xf32> to vector<8x32xf32>
    %359 = arith.negf %358 : vector<8x32xf32>
    %360 = math.exp %359 : vector<8x32xf32>
    %cst_175 = arith.constant 1.000000e+00 : f32
    %361 = vector.broadcast %cst_175 : f32 to vector<8x32xf32>
    %362 = arith.addf %361, %360 : vector<8x32xf32>
    %363 = arith.divf %361, %362 : vector<8x32xf32>
    %364 = vector.extract_strided_slice %351 {offsets = [0, 64], sizes = [8, 32], strides = [1, 1]} : vector<8x128xf32> to vector<8x32xf32>
    %365 = math.tanh %364 : vector<8x32xf32>
    %366 = vector.extract_strided_slice %351 {offsets = [0, 96], sizes = [8, 32], strides = [1, 1]} : vector<8x128xf32> to vector<8x32xf32>
    %367 = arith.negf %366 : vector<8x32xf32>
    %368 = math.exp %367 : vector<8x32xf32>
    %cst_176 = arith.constant 1.000000e+00 : f32
    %369 = vector.broadcast %cst_176 : f32 to vector<8x32xf32>
    %370 = arith.addf %369, %368 : vector<8x32xf32>
    %371 = arith.divf %369, %370 : vector<8x32xf32>
    %372 = arith.mulf %363, %345 : vector<8x32xf32>
    %373 = arith.mulf %357, %365 : vector<8x32xf32>
    %374 = arith.addf %372, %373 : vector<8x32xf32>
    %375 = math.tanh %374 : vector<8x32xf32>
    %376 = arith.mulf %371, %375 : vector<8x32xf32>
    %c0_177 = arith.constant 0 : index
    %c0_178 = arith.constant 0 : index
    %377 = vector.load %arg16[%c0_177, %c0_178] : memref<8x32xf32, #tpu.memory_space<vmem>>, vector<8x32xf32>
    tpu.vector_store %arg16[%c0_177, %c0_178], %374 {strides = array<i32>} : memref<8x32xf32, #tpu.memory_space<vmem>>, vector<8x32xf32>,
    %c0_179 = arith.constant 0 : index
    %c0_180 = arith.constant 0 : index
    %378 = vector.load %arg15[%c0_179, %c0_180] : memref<8x32xf32, #tpu.memory_space<vmem>>, vector<8x32xf32>
    tpu.vector_store %arg15[%c0_179, %c0_180], %376 {strides = array<i32>} : memref<8x32xf32, #tpu.memory_space<vmem>>, vector<8x32xf32>,
    %379 = arith.truncf %376 : vector<8x32xf32> to vector<8x32xbf16>
    %380 = arith.index_cast %343 : i32 to index
    %c0_181 = arith.constant 0 : index
    %381 = vector.load %arg13[%380, %c0_181] : memref<64x32xbf16, #tpu.memory_space<vmem>>, vector<8x32xbf16>
    tpu.vector_store %arg13[%380, %c0_181], %379 {strides = array<i32>} : memref<64x32xbf16, #tpu.memory_space<vmem>>, vector<8x32xbf16>,
    %c1_i32_182 = arith.constant 1 : i32
    %c8_i32_183 = arith.constant 8 : i32
    %382 = arith.muli %c1_i32_182, %c8_i32_183 : i32
    %383 = tpu.assume_multiple %382, 8 : i32
    %c0_184 = arith.constant 0 : index
    %c0_185 = arith.constant 0 : index
    %384 = vector.load %arg15[%c0_184, %c0_185] : memref<8x32xf32, #tpu.memory_space<vmem>>, vector<8x32xf32>
    %c0_186 = arith.constant 0 : index
    %c0_187 = arith.constant 0 : index
    %385 = vector.load %arg16[%c0_186, %c0_187] : memref<8x32xf32, #tpu.memory_space<vmem>>, vector<8x32xf32>
    %386 = arith.index_cast %383 : i32 to index
    %c0_188 = arith.constant 0 : index
    %387 = vector.load %arg14[%386, %c0_188] : memref<64x128xf32, #tpu.memory_space<vmem>>, vector<8x128xf32>
    %388 = arith.truncf %384 : vector<8x32xf32> to vector<8x32xbf16>
    %c0_189 = arith.constant 0 : index
    %c0_190 = arith.constant 0 : index
    %389 = vector.load %arg7[%c0_189, %c0_190] : memref<32x128xbf16, #tpu.memory_space<vmem>>, vector<32x128xbf16>
    %cst_191 = arith.constant dense<0.000000e+00> : vector<8x128xf32>
    %390 = tpu.matmul %388, %389, %cst_191 {dimension_numbers = #tpu.dot_dimension_numbers<[1], [0], [0], [1], [0, 0, 1, 1], [], []>} : vector<8x32xbf16>, vector<32x128xbf16>, vector<8x128xf32> -> vector<8x128xf32>
    %391 = arith.addf %387, %390 : vector<8x128xf32>
    %392 = vector.extract_strided_slice %391 {offsets = [0, 0], sizes = [8, 32], strides = [1, 1]} : vector<8x128xf32> to vector<8x32xf32>
    %393 = arith.negf %392 : vector<8x32xf32>
    %394 = math.exp %393 : vector<8x32xf32>
    %cst_192 = arith.constant 1.000000e+00 : f32
    %395 = vector.broadcast %cst_192 : f32 to vector<8x32xf32>
    %396 = arith.addf %395, %394 : vector<8x32xf32>
    %397 = arith.divf %395, %396 : vector<8x32xf32>
    %398 = vector.extract_strided_slice %391 {offsets = [0, 32], sizes = [8, 32], strides = [1, 1]} : vector<8x128xf32> to vector<8x32xf32>
    %399 = arith.negf %398 : vector<8x32xf32>
    %400 = math.exp %399 : vector<8x32xf32>
    %cst_193 = arith.constant 1.000000e+00 : f32
    %401 = vector.broadcast %cst_193 : f32 to vector<8x32xf32>
    %402 = arith.addf %401, %400 : vector<8x32xf32>
    %403 = arith.divf %401, %402 : vector<8x32xf32>
    %404 = vector.extract_strided_slice %391 {offsets = [0, 64], sizes = [8, 32], strides = [1, 1]} : vector<8x128xf32> to vector<8x32xf32>
    %405 = math.tanh %404 : vector<8x32xf32>
    %406 = vector.extract_strided_slice %391 {offsets = [0, 96], sizes = [8, 32], strides = [1, 1]} : vector<8x128xf32> to vector<8x32xf32>
    %407 = arith.negf %406 : vector<8x32xf32>
    %408 = math.exp %407 : vector<8x32xf32>
    %cst_194 = arith.constant 1.000000e+00 : f32
    %409 = vector.broadcast %cst_194 : f32 to vector<8x32xf32>
    %410 = arith.addf %409, %408 : vector<8x32xf32>
    %411 = arith.divf %409, %410 : vector<8x32xf32>
    %412 = arith.mulf %403, %385 : vector<8x32xf32>
    %413 = arith.mulf %397, %405 : vector<8x32xf32>
    %414 = arith.addf %412, %413 : vector<8x32xf32>
    %415 = math.tanh %414 : vector<8x32xf32>
    %416 = arith.mulf %411, %415 : vector<8x32xf32>
    %c0_195 = arith.constant 0 : index
    %c0_196 = arith.constant 0 : index
    %417 = vector.load %arg16[%c0_195, %c0_196] : memref<8x32xf32, #tpu.memory_space<vmem>>, vector<8x32xf32>
    tpu.vector_store %arg16[%c0_195, %c0_196], %414 {strides = array<i32>} : memref<8x32xf32, #tpu.memory_space<vmem>>, vector<8x32xf32>,
    %c0_197 = arith.constant 0 : index
    %c0_198 = arith.constant 0 : index
    %418 = vector.load %arg15[%c0_197, %c0_198] : memref<8x32xf32, #tpu.memory_space<vmem>>, vector<8x32xf32>
    tpu.vector_store %arg15[%c0_197, %c0_198], %416 {strides = array<i32>} : memref<8x32xf32, #tpu.memory_space<vmem>>, vector<8x32xf32>,
    %419 = arith.truncf %416 : vector<8x32xf32> to vector<8x32xbf16>
    %420 = arith.index_cast %383 : i32 to index
    %c0_199 = arith.constant 0 : index
    %421 = vector.load %arg13[%420, %c0_199] : memref<64x32xbf16, #tpu.memory_space<vmem>>, vector<8x32xbf16>
    tpu.vector_store %arg13[%420, %c0_199], %419 {strides = array<i32>} : memref<64x32xbf16, #tpu.memory_space<vmem>>, vector<8x32xbf16>,
    %c2_i32_200 = arith.constant 2 : i32
    %c8_i32_201 = arith.constant 8 : i32
    %422 = arith.muli %c2_i32_200, %c8_i32_201 : i32
    %423 = tpu.assume_multiple %422, 8 : i32
    %c0_202 = arith.constant 0 : index
    %c0_203 = arith.constant 0 : index
    %424 = vector.load %arg15[%c0_202, %c0_203] : memref<8x32xf32, #tpu.memory_space<vmem>>, vector<8x32xf32>
    %c0_204 = arith.constant 0 : index
    %c0_205 = arith.constant 0 : index
    %425 = vector.load %arg16[%c0_204, %c0_205] : memref<8x32xf32, #tpu.memory_space<vmem>>, vector<8x32xf32>
    %426 = arith.index_cast %423 : i32 to index
    %c0_206 = arith.constant 0 : index
    %427 = vector.load %arg14[%426, %c0_206] : memref<64x128xf32, #tpu.memory_space<vmem>>, vector<8x128xf32>
    %428 = arith.truncf %424 : vector<8x32xf32> to vector<8x32xbf16>
    %c0_207 = arith.constant 0 : index
    %c0_208 = arith.constant 0 : index
    %429 = vector.load %arg7[%c0_207, %c0_208] : memref<32x128xbf16, #tpu.memory_space<vmem>>, vector<32x128xbf16>
    %cst_209 = arith.constant dense<0.000000e+00> : vector<8x128xf32>
    %430 = tpu.matmul %428, %429, %cst_209 {dimension_numbers = #tpu.dot_dimension_numbers<[1], [0], [0], [1], [0, 0, 1, 1], [], []>} : vector<8x32xbf16>, vector<32x128xbf16>, vector<8x128xf32> -> vector<8x128xf32>
    %431 = arith.addf %427, %430 : vector<8x128xf32>
    %432 = vector.extract_strided_slice %431 {offsets = [0, 0], sizes = [8, 32], strides = [1, 1]} : vector<8x128xf32> to vector<8x32xf32>
    %433 = arith.negf %432 : vector<8x32xf32>
    %434 = math.exp %433 : vector<8x32xf32>
    %cst_210 = arith.constant 1.000000e+00 : f32
    %435 = vector.broadcast %cst_210 : f32 to vector<8x32xf32>
    %436 = arith.addf %435, %434 : vector<8x32xf32>
    %437 = arith.divf %435, %436 : vector<8x32xf32>
    %438 = vector.extract_strided_slice %431 {offsets = [0, 32], sizes = [8, 32], strides = [1, 1]} : vector<8x128xf32> to vector<8x32xf32>
    %439 = arith.negf %438 : vector<8x32xf32>
    %440 = math.exp %439 : vector<8x32xf32>
    %cst_211 = arith.constant 1.000000e+00 : f32
    %441 = vector.broadcast %cst_211 : f32 to vector<8x32xf32>
    %442 = arith.addf %441, %440 : vector<8x32xf32>
    %443 = arith.divf %441, %442 : vector<8x32xf32>
    %444 = vector.extract_strided_slice %431 {offsets = [0, 64], sizes = [8, 32], strides = [1, 1]} : vector<8x128xf32> to vector<8x32xf32>
    %445 = math.tanh %444 : vector<8x32xf32>
    %446 = vector.extract_strided_slice %431 {offsets = [0, 96], sizes = [8, 32], strides = [1, 1]} : vector<8x128xf32> to vector<8x32xf32>
    %447 = arith.negf %446 : vector<8x32xf32>
    %448 = math.exp %447 : vector<8x32xf32>
    %cst_212 = arith.constant 1.000000e+00 : f32
    %449 = vector.broadcast %cst_212 : f32 to vector<8x32xf32>
    %450 = arith.addf %449, %448 : vector<8x32xf32>
    %451 = arith.divf %449, %450 : vector<8x32xf32>
    %452 = arith.mulf %443, %425 : vector<8x32xf32>
    %453 = arith.mulf %437, %445 : vector<8x32xf32>
    %454 = arith.addf %452, %453 : vector<8x32xf32>
    %455 = math.tanh %454 : vector<8x32xf32>
    %456 = arith.mulf %451, %455 : vector<8x32xf32>
    %c0_213 = arith.constant 0 : index
    %c0_214 = arith.constant 0 : index
    %457 = vector.load %arg16[%c0_213, %c0_214] : memref<8x32xf32, #tpu.memory_space<vmem>>, vector<8x32xf32>
    tpu.vector_store %arg16[%c0_213, %c0_214], %454 {strides = array<i32>} : memref<8x32xf32, #tpu.memory_space<vmem>>, vector<8x32xf32>,
    %c0_215 = arith.constant 0 : index
    %c0_216 = arith.constant 0 : index
    %458 = vector.load %arg15[%c0_215, %c0_216] : memref<8x32xf32, #tpu.memory_space<vmem>>, vector<8x32xf32>
    tpu.vector_store %arg15[%c0_215, %c0_216], %456 {strides = array<i32>} : memref<8x32xf32, #tpu.memory_space<vmem>>, vector<8x32xf32>,
    %459 = arith.truncf %456 : vector<8x32xf32> to vector<8x32xbf16>
    %460 = arith.index_cast %423 : i32 to index
    %c0_217 = arith.constant 0 : index
    %461 = vector.load %arg13[%460, %c0_217] : memref<64x32xbf16, #tpu.memory_space<vmem>>, vector<8x32xbf16>
    tpu.vector_store %arg13[%460, %c0_217], %459 {strides = array<i32>} : memref<64x32xbf16, #tpu.memory_space<vmem>>, vector<8x32xbf16>,
    %c3_i32_218 = arith.constant 3 : i32
    %c8_i32_219 = arith.constant 8 : i32
    %462 = arith.muli %c3_i32_218, %c8_i32_219 : i32
    %463 = tpu.assume_multiple %462, 8 : i32
    %c0_220 = arith.constant 0 : index
    %c0_221 = arith.constant 0 : index
    %464 = vector.load %arg15[%c0_220, %c0_221] : memref<8x32xf32, #tpu.memory_space<vmem>>, vector<8x32xf32>
    %c0_222 = arith.constant 0 : index
    %c0_223 = arith.constant 0 : index
    %465 = vector.load %arg16[%c0_222, %c0_223] : memref<8x32xf32, #tpu.memory_space<vmem>>, vector<8x32xf32>
    %466 = arith.index_cast %463 : i32 to index
    %c0_224 = arith.constant 0 : index
    %467 = vector.load %arg14[%466, %c0_224] : memref<64x128xf32, #tpu.memory_space<vmem>>, vector<8x128xf32>
    %468 = arith.truncf %464 : vector<8x32xf32> to vector<8x32xbf16>
    %c0_225 = arith.constant 0 : index
    %c0_226 = arith.constant 0 : index
    %469 = vector.load %arg7[%c0_225, %c0_226] : memref<32x128xbf16, #tpu.memory_space<vmem>>, vector<32x128xbf16>
    %cst_227 = arith.constant dense<0.000000e+00> : vector<8x128xf32>
    %470 = tpu.matmul %468, %469, %cst_227 {dimension_numbers = #tpu.dot_dimension_numbers<[1], [0], [0], [1], [0, 0, 1, 1], [], []>} : vector<8x32xbf16>, vector<32x128xbf16>, vector<8x128xf32> -> vector<8x128xf32>
    %471 = arith.addf %467, %470 : vector<8x128xf32>
    %472 = vector.extract_strided_slice %471 {offsets = [0, 0], sizes = [8, 32], strides = [1, 1]} : vector<8x128xf32> to vector<8x32xf32>
    %473 = arith.negf %472 : vector<8x32xf32>
    %474 = math.exp %473 : vector<8x32xf32>
    %cst_228 = arith.constant 1.000000e+00 : f32
    %475 = vector.broadcast %cst_228 : f32 to vector<8x32xf32>
    %476 = arith.addf %475, %474 : vector<8x32xf32>
    %477 = arith.divf %475, %476 : vector<8x32xf32>
    %478 = vector.extract_strided_slice %471 {offsets = [0, 32], sizes = [8, 32], strides = [1, 1]} : vector<8x128xf32> to vector<8x32xf32>
    %479 = arith.negf %478 : vector<8x32xf32>
    %480 = math.exp %479 : vector<8x32xf32>
    %cst_229 = arith.constant 1.000000e+00 : f32
    %481 = vector.broadcast %cst_229 : f32 to vector<8x32xf32>
    %482 = arith.addf %481, %480 : vector<8x32xf32>
    %483 = arith.divf %481, %482 : vector<8x32xf32>
    %484 = vector.extract_strided_slice %471 {offsets = [0, 64], sizes = [8, 32], strides = [1, 1]} : vector<8x128xf32> to vector<8x32xf32>
    %485 = math.tanh %484 : vector<8x32xf32>
    %486 = vector.extract_strided_slice %471 {offsets = [0, 96], sizes = [8, 32], strides = [1, 1]} : vector<8x128xf32> to vector<8x32xf32>
    %487 = arith.negf %486 : vector<8x32xf32>
    %488 = math.exp %487 : vector<8x32xf32>
    %cst_230 = arith.constant 1.000000e+00 : f32
    %489 = vector.broadcast %cst_230 : f32 to vector<8x32xf32>
    %490 = arith.addf %489, %488 : vector<8x32xf32>
    %491 = arith.divf %489, %490 : vector<8x32xf32>
    %492 = arith.mulf %483, %465 : vector<8x32xf32>
    %493 = arith.mulf %477, %485 : vector<8x32xf32>
    %494 = arith.addf %492, %493 : vector<8x32xf32>
    %495 = math.tanh %494 : vector<8x32xf32>
    %496 = arith.mulf %491, %495 : vector<8x32xf32>
    %c0_231 = arith.constant 0 : index
    %c0_232 = arith.constant 0 : index
    %497 = vector.load %arg16[%c0_231, %c0_232] : memref<8x32xf32, #tpu.memory_space<vmem>>, vector<8x32xf32>
    tpu.vector_store %arg16[%c0_231, %c0_232], %494 {strides = array<i32>} : memref<8x32xf32, #tpu.memory_space<vmem>>, vector<8x32xf32>,
    %c0_233 = arith.constant 0 : index
    %c0_234 = arith.constant 0 : index
    %498 = vector.load %arg15[%c0_233, %c0_234] : memref<8x32xf32, #tpu.memory_space<vmem>>, vector<8x32xf32>
    tpu.vector_store %arg15[%c0_233, %c0_234], %496 {strides = array<i32>} : memref<8x32xf32, #tpu.memory_space<vmem>>, vector<8x32xf32>,
    %499 = arith.truncf %496 : vector<8x32xf32> to vector<8x32xbf16>
    %500 = arith.index_cast %463 : i32 to index
    %c0_235 = arith.constant 0 : index
    %501 = vector.load %arg13[%500, %c0_235] : memref<64x32xbf16, #tpu.memory_space<vmem>>, vector<8x32xbf16>
    tpu.vector_store %arg13[%500, %c0_235], %499 {strides = array<i32>} : memref<64x32xbf16, #tpu.memory_space<vmem>>, vector<8x32xbf16>,
    %c4_i32_236 = arith.constant 4 : i32
    %c8_i32_237 = arith.constant 8 : i32
    %502 = arith.muli %c4_i32_236, %c8_i32_237 : i32
    %503 = tpu.assume_multiple %502, 8 : i32
    %c0_238 = arith.constant 0 : index
    %c0_239 = arith.constant 0 : index
    %504 = vector.load %arg15[%c0_238, %c0_239] : memref<8x32xf32, #tpu.memory_space<vmem>>, vector<8x32xf32>
    %c0_240 = arith.constant 0 : index
    %c0_241 = arith.constant 0 : index
    %505 = vector.load %arg16[%c0_240, %c0_241] : memref<8x32xf32, #tpu.memory_space<vmem>>, vector<8x32xf32>
    %506 = arith.index_cast %503 : i32 to index
    %c0_242 = arith.constant 0 : index
    %507 = vector.load %arg14[%506, %c0_242] : memref<64x128xf32, #tpu.memory_space<vmem>>, vector<8x128xf32>
    %508 = arith.truncf %504 : vector<8x32xf32> to vector<8x32xbf16>
    %c0_243 = arith.constant 0 : index
    %c0_244 = arith.constant 0 : index
    %509 = vector.load %arg7[%c0_243, %c0_244] : memref<32x128xbf16, #tpu.memory_space<vmem>>, vector<32x128xbf16>
    %cst_245 = arith.constant dense<0.000000e+00> : vector<8x128xf32>
    %510 = tpu.matmul %508, %509, %cst_245 {dimension_numbers = #tpu.dot_dimension_numbers<[1], [0], [0], [1], [0, 0, 1, 1], [], []>} : vector<8x32xbf16>, vector<32x128xbf16>, vector<8x128xf32> -> vector<8x128xf32>
    %511 = arith.addf %507, %510 : vector<8x128xf32>
    %512 = vector.extract_strided_slice %511 {offsets = [0, 0], sizes = [8, 32], strides = [1, 1]} : vector<8x128xf32> to vector<8x32xf32>
    %513 = arith.negf %512 : vector<8x32xf32>
    %514 = math.exp %513 : vector<8x32xf32>
    %cst_246 = arith.constant 1.000000e+00 : f32
    %515 = vector.broadcast %cst_246 : f32 to vector<8x32xf32>
    %516 = arith.addf %515, %514 : vector<8x32xf32>
    %517 = arith.divf %515, %516 : vector<8x32xf32>
    %518 = vector.extract_strided_slice %511 {offsets = [0, 32], sizes = [8, 32], strides = [1, 1]} : vector<8x128xf32> to vector<8x32xf32>
    %519 = arith.negf %518 : vector<8x32xf32>
    %520 = math.exp %519 : vector<8x32xf32>
    %cst_247 = arith.constant 1.000000e+00 : f32
    %521 = vector.broadcast %cst_247 : f32 to vector<8x32xf32>
    %522 = arith.addf %521, %520 : vector<8x32xf32>
    %523 = arith.divf %521, %522 : vector<8x32xf32>
    %524 = vector.extract_strided_slice %511 {offsets = [0, 64], sizes = [8, 32], strides = [1, 1]} : vector<8x128xf32> to vector<8x32xf32>
    %525 = math.tanh %524 : vector<8x32xf32>
    %526 = vector.extract_strided_slice %511 {offsets = [0, 96], sizes = [8, 32], strides = [1, 1]} : vector<8x128xf32> to vector<8x32xf32>
    %527 = arith.negf %526 : vector<8x32xf32>
    %528 = math.exp %527 : vector<8x32xf32>
    %cst_248 = arith.constant 1.000000e+00 : f32
    %529 = vector.broadcast %cst_248 : f32 to vector<8x32xf32>
    %530 = arith.addf %529, %528 : vector<8x32xf32>
    %531 = arith.divf %529, %530 : vector<8x32xf32>
    %532 = arith.mulf %523, %505 : vector<8x32xf32>
    %533 = arith.mulf %517, %525 : vector<8x32xf32>
    %534 = arith.addf %532, %533 : vector<8x32xf32>
    %535 = math.tanh %534 : vector<8x32xf32>
    %536 = arith.mulf %531, %535 : vector<8x32xf32>
    %c0_249 = arith.constant 0 : index
    %c0_250 = arith.constant 0 : index
    %537 = vector.load %arg16[%c0_249, %c0_250] : memref<8x32xf32, #tpu.memory_space<vmem>>, vector<8x32xf32>
    tpu.vector_store %arg16[%c0_249, %c0_250], %534 {strides = array<i32>} : memref<8x32xf32, #tpu.memory_space<vmem>>, vector<8x32xf32>,
    %c0_251 = arith.constant 0 : index
    %c0_252 = arith.constant 0 : index
    %538 = vector.load %arg15[%c0_251, %c0_252] : memref<8x32xf32, #tpu.memory_space<vmem>>, vector<8x32xf32>
    tpu.vector_store %arg15[%c0_251, %c0_252], %536 {strides = array<i32>} : memref<8x32xf32, #tpu.memory_space<vmem>>, vector<8x32xf32>,
    %539 = arith.truncf %536 : vector<8x32xf32> to vector<8x32xbf16>
    %540 = arith.index_cast %503 : i32 to index
    %c0_253 = arith.constant 0 : index
    %541 = vector.load %arg13[%540, %c0_253] : memref<64x32xbf16, #tpu.memory_space<vmem>>, vector<8x32xbf16>
    tpu.vector_store %arg13[%540, %c0_253], %539 {strides = array<i32>} : memref<64x32xbf16, #tpu.memory_space<vmem>>, vector<8x32xbf16>,
    %c5_i32_254 = arith.constant 5 : i32
    %c8_i32_255 = arith.constant 8 : i32
    %542 = arith.muli %c5_i32_254, %c8_i32_255 : i32
    %543 = tpu.assume_multiple %542, 8 : i32
    %c0_256 = arith.constant 0 : index
    %c0_257 = arith.constant 0 : index
    %544 = vector.load %arg15[%c0_256, %c0_257] : memref<8x32xf32, #tpu.memory_space<vmem>>, vector<8x32xf32>
    %c0_258 = arith.constant 0 : index
    %c0_259 = arith.constant 0 : index
    %545 = vector.load %arg16[%c0_258, %c0_259] : memref<8x32xf32, #tpu.memory_space<vmem>>, vector<8x32xf32>
    %546 = arith.index_cast %543 : i32 to index
    %c0_260 = arith.constant 0 : index
    %547 = vector.load %arg14[%546, %c0_260] : memref<64x128xf32, #tpu.memory_space<vmem>>, vector<8x128xf32>
    %548 = arith.truncf %544 : vector<8x32xf32> to vector<8x32xbf16>
    %c0_261 = arith.constant 0 : index
    %c0_262 = arith.constant 0 : index
    %549 = vector.load %arg7[%c0_261, %c0_262] : memref<32x128xbf16, #tpu.memory_space<vmem>>, vector<32x128xbf16>
    %cst_263 = arith.constant dense<0.000000e+00> : vector<8x128xf32>
    %550 = tpu.matmul %548, %549, %cst_263 {dimension_numbers = #tpu.dot_dimension_numbers<[1], [0], [0], [1], [0, 0, 1, 1], [], []>} : vector<8x32xbf16>, vector<32x128xbf16>, vector<8x128xf32> -> vector<8x128xf32>
    %551 = arith.addf %547, %550 : vector<8x128xf32>
    %552 = vector.extract_strided_slice %551 {offsets = [0, 0], sizes = [8, 32], strides = [1, 1]} : vector<8x128xf32> to vector<8x32xf32>
    %553 = arith.negf %552 : vector<8x32xf32>
    %554 = math.exp %553 : vector<8x32xf32>
    %cst_264 = arith.constant 1.000000e+00 : f32
    %555 = vector.broadcast %cst_264 : f32 to vector<8x32xf32>
    %556 = arith.addf %555, %554 : vector<8x32xf32>
    %557 = arith.divf %555, %556 : vector<8x32xf32>
    %558 = vector.extract_strided_slice %551 {offsets = [0, 32], sizes = [8, 32], strides = [1, 1]} : vector<8x128xf32> to vector<8x32xf32>
    %559 = arith.negf %558 : vector<8x32xf32>
    %560 = math.exp %559 : vector<8x32xf32>
    %cst_265 = arith.constant 1.000000e+00 : f32
    %561 = vector.broadcast %cst_265 : f32 to vector<8x32xf32>
    %562 = arith.addf %561, %560 : vector<8x32xf32>
    %563 = arith.divf %561, %562 : vector<8x32xf32>
    %564 = vector.extract_strided_slice %551 {offsets = [0, 64], sizes = [8, 32], strides = [1, 1]} : vector<8x128xf32> to vector<8x32xf32>
    %565 = math.tanh %564 : vector<8x32xf32>
    %566 = vector.extract_strided_slice %551 {offsets = [0, 96], sizes = [8, 32], strides = [1, 1]} : vector<8x128xf32> to vector<8x32xf32>
    %567 = arith.negf %566 : vector<8x32xf32>
    %568 = math.exp %567 : vector<8x32xf32>
    %cst_266 = arith.constant 1.000000e+00 : f32
    %569 = vector.broadcast %cst_266 : f32 to vector<8x32xf32>
    %570 = arith.addf %569, %568 : vector<8x32xf32>
    %571 = arith.divf %569, %570 : vector<8x32xf32>
    %572 = arith.mulf %563, %545 : vector<8x32xf32>
    %573 = arith.mulf %557, %565 : vector<8x32xf32>
    %574 = arith.addf %572, %573 : vector<8x32xf32>
    %575 = math.tanh %574 : vector<8x32xf32>
    %576 = arith.mulf %571, %575 : vector<8x32xf32>
    %c0_267 = arith.constant 0 : index
    %c0_268 = arith.constant 0 : index
    %577 = vector.load %arg16[%c0_267, %c0_268] : memref<8x32xf32, #tpu.memory_space<vmem>>, vector<8x32xf32>
    tpu.vector_store %arg16[%c0_267, %c0_268], %574 {strides = array<i32>} : memref<8x32xf32, #tpu.memory_space<vmem>>, vector<8x32xf32>,
    %c0_269 = arith.constant 0 : index
    %c0_270 = arith.constant 0 : index
    %578 = vector.load %arg15[%c0_269, %c0_270] : memref<8x32xf32, #tpu.memory_space<vmem>>, vector<8x32xf32>
    tpu.vector_store %arg15[%c0_269, %c0_270], %576 {strides = array<i32>} : memref<8x32xf32, #tpu.memory_space<vmem>>, vector<8x32xf32>,
    %579 = arith.truncf %576 : vector<8x32xf32> to vector<8x32xbf16>
    %580 = arith.index_cast %543 : i32 to index
    %c0_271 = arith.constant 0 : index
    %581 = vector.load %arg13[%580, %c0_271] : memref<64x32xbf16, #tpu.memory_space<vmem>>, vector<8x32xbf16>
    tpu.vector_store %arg13[%580, %c0_271], %579 {strides = array<i32>} : memref<64x32xbf16, #tpu.memory_space<vmem>>, vector<8x32xbf16>,
    %c6_i32_272 = arith.constant 6 : i32
    %c8_i32_273 = arith.constant 8 : i32
    %582 = arith.muli %c6_i32_272, %c8_i32_273 : i32
    %583 = tpu.assume_multiple %582, 8 : i32
    %c0_274 = arith.constant 0 : index
    %c0_275 = arith.constant 0 : index
    %584 = vector.load %arg15[%c0_274, %c0_275] : memref<8x32xf32, #tpu.memory_space<vmem>>, vector<8x32xf32>
    %c0_276 = arith.constant 0 : index
    %c0_277 = arith.constant 0 : index
    %585 = vector.load %arg16[%c0_276, %c0_277] : memref<8x32xf32, #tpu.memory_space<vmem>>, vector<8x32xf32>
    %586 = arith.index_cast %583 : i32 to index
    %c0_278 = arith.constant 0 : index
    %587 = vector.load %arg14[%586, %c0_278] : memref<64x128xf32, #tpu.memory_space<vmem>>, vector<8x128xf32>
    %588 = arith.truncf %584 : vector<8x32xf32> to vector<8x32xbf16>
    %c0_279 = arith.constant 0 : index
    %c0_280 = arith.constant 0 : index
    %589 = vector.load %arg7[%c0_279, %c0_280] : memref<32x128xbf16, #tpu.memory_space<vmem>>, vector<32x128xbf16>
    %cst_281 = arith.constant dense<0.000000e+00> : vector<8x128xf32>
    %590 = tpu.matmul %588, %589, %cst_281 {dimension_numbers = #tpu.dot_dimension_numbers<[1], [0], [0], [1], [0, 0, 1, 1], [], []>} : vector<8x32xbf16>, vector<32x128xbf16>, vector<8x128xf32> -> vector<8x128xf32>
    %591 = arith.addf %587, %590 : vector<8x128xf32>
    %592 = vector.extract_strided_slice %591 {offsets = [0, 0], sizes = [8, 32], strides = [1, 1]} : vector<8x128xf32> to vector<8x32xf32>
    %593 = arith.negf %592 : vector<8x32xf32>
    %594 = math.exp %593 : vector<8x32xf32>
    %cst_282 = arith.constant 1.000000e+00 : f32
    %595 = vector.broadcast %cst_282 : f32 to vector<8x32xf32>
    %596 = arith.addf %595, %594 : vector<8x32xf32>
    %597 = arith.divf %595, %596 : vector<8x32xf32>
    %598 = vector.extract_strided_slice %591 {offsets = [0, 32], sizes = [8, 32], strides = [1, 1]} : vector<8x128xf32> to vector<8x32xf32>
    %599 = arith.negf %598 : vector<8x32xf32>
    %600 = math.exp %599 : vector<8x32xf32>
    %cst_283 = arith.constant 1.000000e+00 : f32
    %601 = vector.broadcast %cst_283 : f32 to vector<8x32xf32>
    %602 = arith.addf %601, %600 : vector<8x32xf32>
    %603 = arith.divf %601, %602 : vector<8x32xf32>
    %604 = vector.extract_strided_slice %591 {offsets = [0, 64], sizes = [8, 32], strides = [1, 1]} : vector<8x128xf32> to vector<8x32xf32>
    %605 = math.tanh %604 : vector<8x32xf32>
    %606 = vector.extract_strided_slice %591 {offsets = [0, 96], sizes = [8, 32], strides = [1, 1]} : vector<8x128xf32> to vector<8x32xf32>
    %607 = arith.negf %606 : vector<8x32xf32>
    %608 = math.exp %607 : vector<8x32xf32>
    %cst_284 = arith.constant 1.000000e+00 : f32
    %609 = vector.broadcast %cst_284 : f32 to vector<8x32xf32>
    %610 = arith.addf %609, %608 : vector<8x32xf32>
    %611 = arith.divf %609, %610 : vector<8x32xf32>
    %612 = arith.mulf %603, %585 : vector<8x32xf32>
    %613 = arith.mulf %597, %605 : vector<8x32xf32>
    %614 = arith.addf %612, %613 : vector<8x32xf32>
    %615 = math.tanh %614 : vector<8x32xf32>
    %616 = arith.mulf %611, %615 : vector<8x32xf32>
    %c0_285 = arith.constant 0 : index
    %c0_286 = arith.constant 0 : index
    %617 = vector.load %arg16[%c0_285, %c0_286] : memref<8x32xf32, #tpu.memory_space<vmem>>, vector<8x32xf32>
    tpu.vector_store %arg16[%c0_285, %c0_286], %614 {strides = array<i32>} : memref<8x32xf32, #tpu.memory_space<vmem>>, vector<8x32xf32>,
    %c0_287 = arith.constant 0 : index
    %c0_288 = arith.constant 0 : index
    %618 = vector.load %arg15[%c0_287, %c0_288] : memref<8x32xf32, #tpu.memory_space<vmem>>, vector<8x32xf32>
    tpu.vector_store %arg15[%c0_287, %c0_288], %616 {strides = array<i32>} : memref<8x32xf32, #tpu.memory_space<vmem>>, vector<8x32xf32>,
    %619 = arith.truncf %616 : vector<8x32xf32> to vector<8x32xbf16>
    %620 = arith.index_cast %583 : i32 to index
    %c0_289 = arith.constant 0 : index
    %621 = vector.load %arg13[%620, %c0_289] : memref<64x32xbf16, #tpu.memory_space<vmem>>, vector<8x32xbf16>
    tpu.vector_store %arg13[%620, %c0_289], %619 {strides = array<i32>} : memref<64x32xbf16, #tpu.memory_space<vmem>>, vector<8x32xbf16>,
    %c7_i32_290 = arith.constant 7 : i32
    %c8_i32_291 = arith.constant 8 : i32
    %622 = arith.muli %c7_i32_290, %c8_i32_291 : i32
    %623 = tpu.assume_multiple %622, 8 : i32
    %c0_292 = arith.constant 0 : index
    %c0_293 = arith.constant 0 : index
    %624 = vector.load %arg15[%c0_292, %c0_293] : memref<8x32xf32, #tpu.memory_space<vmem>>, vector<8x32xf32>
    %c0_294 = arith.constant 0 : index
    %c0_295 = arith.constant 0 : index
    %625 = vector.load %arg16[%c0_294, %c0_295] : memref<8x32xf32, #tpu.memory_space<vmem>>, vector<8x32xf32>
    %626 = arith.index_cast %623 : i32 to index
    %c0_296 = arith.constant 0 : index
    %627 = vector.load %arg14[%626, %c0_296] : memref<64x128xf32, #tpu.memory_space<vmem>>, vector<8x128xf32>
    %628 = arith.truncf %624 : vector<8x32xf32> to vector<8x32xbf16>
    %c0_297 = arith.constant 0 : index
    %c0_298 = arith.constant 0 : index
    %629 = vector.load %arg7[%c0_297, %c0_298] : memref<32x128xbf16, #tpu.memory_space<vmem>>, vector<32x128xbf16>
    %cst_299 = arith.constant dense<0.000000e+00> : vector<8x128xf32>
    %630 = tpu.matmul %628, %629, %cst_299 {dimension_numbers = #tpu.dot_dimension_numbers<[1], [0], [0], [1], [0, 0, 1, 1], [], []>} : vector<8x32xbf16>, vector<32x128xbf16>, vector<8x128xf32> -> vector<8x128xf32>
    %631 = arith.addf %627, %630 : vector<8x128xf32>
    %632 = vector.extract_strided_slice %631 {offsets = [0, 0], sizes = [8, 32], strides = [1, 1]} : vector<8x128xf32> to vector<8x32xf32>
    %633 = arith.negf %632 : vector<8x32xf32>
    %634 = math.exp %633 : vector<8x32xf32>
    %cst_300 = arith.constant 1.000000e+00 : f32
    %635 = vector.broadcast %cst_300 : f32 to vector<8x32xf32>
    %636 = arith.addf %635, %634 : vector<8x32xf32>
    %637 = arith.divf %635, %636 : vector<8x32xf32>
    %638 = vector.extract_strided_slice %631 {offsets = [0, 32], sizes = [8, 32], strides = [1, 1]} : vector<8x128xf32> to vector<8x32xf32>
    %639 = arith.negf %638 : vector<8x32xf32>
    %640 = math.exp %639 : vector<8x32xf32>
    %cst_301 = arith.constant 1.000000e+00 : f32
    %641 = vector.broadcast %cst_301 : f32 to vector<8x32xf32>
    %642 = arith.addf %641, %640 : vector<8x32xf32>
    %643 = arith.divf %641, %642 : vector<8x32xf32>
    %644 = vector.extract_strided_slice %631 {offsets = [0, 64], sizes = [8, 32], strides = [1, 1]} : vector<8x128xf32> to vector<8x32xf32>
    %645 = math.tanh %644 : vector<8x32xf32>
    %646 = vector.extract_strided_slice %631 {offsets = [0, 96], sizes = [8, 32], strides = [1, 1]} : vector<8x128xf32> to vector<8x32xf32>
    %647 = arith.negf %646 : vector<8x32xf32>
    %648 = math.exp %647 : vector<8x32xf32>
    %cst_302 = arith.constant 1.000000e+00 : f32
    %649 = vector.broadcast %cst_302 : f32 to vector<8x32xf32>
    %650 = arith.addf %649, %648 : vector<8x32xf32>
    %651 = arith.divf %649, %650 : vector<8x32xf32>
    %652 = arith.mulf %643, %625 : vector<8x32xf32>
    %653 = arith.mulf %637, %645 : vector<8x32xf32>
    %654 = arith.addf %652, %653 : vector<8x32xf32>
    %655 = math.tanh %654 : vector<8x32xf32>
    %656 = arith.mulf %651, %655 : vector<8x32xf32>
    %c0_303 = arith.constant 0 : index
    %c0_304 = arith.constant 0 : index
    %657 = vector.load %arg16[%c0_303, %c0_304] : memref<8x32xf32, #tpu.memory_space<vmem>>, vector<8x32xf32>
    tpu.vector_store %arg16[%c0_303, %c0_304], %654 {strides = array<i32>} : memref<8x32xf32, #tpu.memory_space<vmem>>, vector<8x32xf32>,
    %c0_305 = arith.constant 0 : index
    %c0_306 = arith.constant 0 : index
    %658 = vector.load %arg15[%c0_305, %c0_306] : memref<8x32xf32, #tpu.memory_space<vmem>>, vector<8x32xf32>
    tpu.vector_store %arg15[%c0_305, %c0_306], %656 {strides = array<i32>} : memref<8x32xf32, #tpu.memory_space<vmem>>, vector<8x32xf32>,
    %659 = arith.truncf %656 : vector<8x32xf32> to vector<8x32xbf16>
    %660 = arith.index_cast %623 : i32 to index
    %c0_307 = arith.constant 0 : index
    %661 = vector.load %arg13[%660, %c0_307] : memref<64x32xbf16, #tpu.memory_space<vmem>>, vector<8x32xbf16>
    tpu.vector_store %arg13[%660, %c0_307], %659 {strides = array<i32>} : memref<64x32xbf16, #tpu.memory_space<vmem>>, vector<8x32xbf16>,
    %c8_i32_308 = arith.constant 8 : i32
    %c0_309 = arith.constant 0 : index
    %c0_310 = arith.constant 0 : index
    %662 = vector.load %arg13[%c0_309, %c0_310] : memref<64x32xbf16, #tpu.memory_space<vmem>>, vector<64x32xbf16>
    %c0_311 = arith.constant 0 : index
    %c0_312 = arith.constant 0 : index
    %663 = vector.load %arg9[%c0_311, %c0_312] : memref<32x128xbf16, #tpu.memory_space<vmem>>, vector<32x128xbf16>
    %cst_313 = arith.constant dense<0.000000e+00> : vector<64x128xf32>
    %664 = tpu.matmul %662, %663, %cst_313 {dimension_numbers = #tpu.dot_dimension_numbers<[1], [0], [0], [1], [0, 0, 1, 1], [], []>} : vector<64x32xbf16>, vector<32x128xbf16>, vector<64x128xf32> -> vector<64x128xf32>
    %c0_314 = arith.constant 0 : index
    %c0_315 = arith.constant 0 : index
    %665 = vector.load %arg11[%c0_314, %c0_315] : memref<1x128xf32, #tpu.memory_space<vmem>>, vector<1x128xf32>
    %666 = vector.broadcast %665 : vector<1x128xf32> to vector<64x128xf32>
    %667 = arith.addf %664, %666 : vector<64x128xf32>
    %c0_316 = arith.constant 0 : index
    %c0_317 = arith.constant 0 : index
    %668 = vector.load %arg14[%c0_316, %c0_317] : memref<64x128xf32, #tpu.memory_space<vmem>>, vector<64x128xf32>
    tpu.vector_store %arg14[%c0_316, %c0_317], %667 {strides = array<i32>} : memref<64x128xf32, #tpu.memory_space<vmem>>, vector<64x128xf32>,
    %cst_318 = arith.constant 0.000000e+00 : f32
    %669 = vector.broadcast %cst_318 : f32 to vector<8x32xf32>
    %c0_319 = arith.constant 0 : index
    %c0_320 = arith.constant 0 : index
    %670 = vector.load %arg15[%c0_319, %c0_320] : memref<8x32xf32, #tpu.memory_space<vmem>>, vector<8x32xf32>
    tpu.vector_store %arg15[%c0_319, %c0_320], %669 {strides = array<i32>} : memref<8x32xf32, #tpu.memory_space<vmem>>, vector<8x32xf32>,
    %cst_321 = arith.constant 0.000000e+00 : f32
    %671 = vector.broadcast %cst_321 : f32 to vector<8x32xf32>
    %c0_322 = arith.constant 0 : index
    %c0_323 = arith.constant 0 : index
    %672 = vector.load %arg16[%c0_322, %c0_323] : memref<8x32xf32, #tpu.memory_space<vmem>>, vector<8x32xf32>
    tpu.vector_store %arg16[%c0_322, %c0_323], %671 {strides = array<i32>} : memref<8x32xf32, #tpu.memory_space<vmem>>, vector<8x32xf32>,
    %c0_i32_324 = arith.constant 0 : i32
    %c8_i32_325 = arith.constant 8 : i32
    %673 = arith.muli %c0_i32_324, %c8_i32_325 : i32
    %674 = tpu.assume_multiple %673, 8 : i32
    %c0_326 = arith.constant 0 : index
    %c0_327 = arith.constant 0 : index
    %675 = vector.load %arg15[%c0_326, %c0_327] : memref<8x32xf32, #tpu.memory_space<vmem>>, vector<8x32xf32>
    %c0_328 = arith.constant 0 : index
    %c0_329 = arith.constant 0 : index
    %676 = vector.load %arg16[%c0_328, %c0_329] : memref<8x32xf32, #tpu.memory_space<vmem>>, vector<8x32xf32>
    %677 = arith.index_cast %674 : i32 to index
    %c0_330 = arith.constant 0 : index
    %678 = vector.load %arg14[%677, %c0_330] : memref<64x128xf32, #tpu.memory_space<vmem>>, vector<8x128xf32>
    %679 = arith.truncf %675 : vector<8x32xf32> to vector<8x32xbf16>
    %c0_331 = arith.constant 0 : index
    %c0_332 = arith.constant 0 : index
    %680 = vector.load %arg10[%c0_331, %c0_332] : memref<32x128xbf16, #tpu.memory_space<vmem>>, vector<32x128xbf16>
    %cst_333 = arith.constant dense<0.000000e+00> : vector<8x128xf32>
    %681 = tpu.matmul %679, %680, %cst_333 {dimension_numbers = #tpu.dot_dimension_numbers<[1], [0], [0], [1], [0, 0, 1, 1], [], []>} : vector<8x32xbf16>, vector<32x128xbf16>, vector<8x128xf32> -> vector<8x128xf32>
    %682 = arith.addf %678, %681 : vector<8x128xf32>
    %683 = vector.extract_strided_slice %682 {offsets = [0, 0], sizes = [8, 32], strides = [1, 1]} : vector<8x128xf32> to vector<8x32xf32>
    %684 = arith.negf %683 : vector<8x32xf32>
    %685 = math.exp %684 : vector<8x32xf32>
    %cst_334 = arith.constant 1.000000e+00 : f32
    %686 = vector.broadcast %cst_334 : f32 to vector<8x32xf32>
    %687 = arith.addf %686, %685 : vector<8x32xf32>
    %688 = arith.divf %686, %687 : vector<8x32xf32>
    %689 = vector.extract_strided_slice %682 {offsets = [0, 32], sizes = [8, 32], strides = [1, 1]} : vector<8x128xf32> to vector<8x32xf32>
    %690 = arith.negf %689 : vector<8x32xf32>
    %691 = math.exp %690 : vector<8x32xf32>
    %cst_335 = arith.constant 1.000000e+00 : f32
    %692 = vector.broadcast %cst_335 : f32 to vector<8x32xf32>
    %693 = arith.addf %692, %691 : vector<8x32xf32>
    %694 = arith.divf %692, %693 : vector<8x32xf32>
    %695 = vector.extract_strided_slice %682 {offsets = [0, 64], sizes = [8, 32], strides = [1, 1]} : vector<8x128xf32> to vector<8x32xf32>
    %696 = math.tanh %695 : vector<8x32xf32>
    %697 = vector.extract_strided_slice %682 {offsets = [0, 96], sizes = [8, 32], strides = [1, 1]} : vector<8x128xf32> to vector<8x32xf32>
    %698 = arith.negf %697 : vector<8x32xf32>
    %699 = math.exp %698 : vector<8x32xf32>
    %cst_336 = arith.constant 1.000000e+00 : f32
    %700 = vector.broadcast %cst_336 : f32 to vector<8x32xf32>
    %701 = arith.addf %700, %699 : vector<8x32xf32>
    %702 = arith.divf %700, %701 : vector<8x32xf32>
    %703 = arith.mulf %694, %676 : vector<8x32xf32>
    %704 = arith.mulf %688, %696 : vector<8x32xf32>
    %705 = arith.addf %703, %704 : vector<8x32xf32>
    %706 = math.tanh %705 : vector<8x32xf32>
    %707 = arith.mulf %702, %706 : vector<8x32xf32>
    %c0_337 = arith.constant 0 : index
    %c0_338 = arith.constant 0 : index
    %708 = vector.load %arg16[%c0_337, %c0_338] : memref<8x32xf32, #tpu.memory_space<vmem>>, vector<8x32xf32>
    tpu.vector_store %arg16[%c0_337, %c0_338], %705 {strides = array<i32>} : memref<8x32xf32, #tpu.memory_space<vmem>>, vector<8x32xf32>,
    %c0_339 = arith.constant 0 : index
    %c0_340 = arith.constant 0 : index
    %709 = vector.load %arg15[%c0_339, %c0_340] : memref<8x32xf32, #tpu.memory_space<vmem>>, vector<8x32xf32>
    tpu.vector_store %arg15[%c0_339, %c0_340], %707 {strides = array<i32>} : memref<8x32xf32, #tpu.memory_space<vmem>>, vector<8x32xf32>,
    %c0_341 = arith.constant 0 : index
    %c0_342 = arith.constant 0 : index
    %710 = vector.load %arg2[%c0_341, %c0_342] : memref<8x1xi32, #tpu.memory_space<vmem>>, vector<8x1xi32>
    %711 = vector.broadcast %c0_i32_324 : i32 to vector<8x1xi32>
    %712 = arith.cmpi slt, %711, %710 : vector<8x1xi32>
    %cst_343 = arith.constant 0.000000e+00 : f32
    %713 = vector.shape_cast %712 : vector<8x1xi1> to vector<8x1xi1>
    %714 = vector.broadcast %713 : vector<8x1xi1> to vector<8x32xi1>
    %715 = vector.broadcast %cst_343 : f32 to vector<8x32xf32>
    %716 = arith.select %714, %707, %715 : vector<8x32xi1>, vector<8x32xf32>
    %717 = arith.index_cast %674 : i32 to index
    %c0_344 = arith.constant 0 : index
    %718 = vector.load %arg12[%717, %c0_344] : memref<64x32xf32, #tpu.memory_space<vmem>>, vector<8x32xf32>
    tpu.vector_store %arg12[%717, %c0_344], %716 {strides = array<i32>} : memref<64x32xf32, #tpu.memory_space<vmem>>, vector<8x32xf32>,
    %c1_i32_345 = arith.constant 1 : i32
    %c8_i32_346 = arith.constant 8 : i32
    %719 = arith.muli %c1_i32_345, %c8_i32_346 : i32
    %720 = tpu.assume_multiple %719, 8 : i32
    %c0_347 = arith.constant 0 : index
    %c0_348 = arith.constant 0 : index
    %721 = vector.load %arg15[%c0_347, %c0_348] : memref<8x32xf32, #tpu.memory_space<vmem>>, vector<8x32xf32>
    %c0_349 = arith.constant 0 : index
    %c0_350 = arith.constant 0 : index
    %722 = vector.load %arg16[%c0_349, %c0_350] : memref<8x32xf32, #tpu.memory_space<vmem>>, vector<8x32xf32>
    %723 = arith.index_cast %720 : i32 to index
    %c0_351 = arith.constant 0 : index
    %724 = vector.load %arg14[%723, %c0_351] : memref<64x128xf32, #tpu.memory_space<vmem>>, vector<8x128xf32>
    %725 = arith.truncf %721 : vector<8x32xf32> to vector<8x32xbf16>
    %c0_352 = arith.constant 0 : index
    %c0_353 = arith.constant 0 : index
    %726 = vector.load %arg10[%c0_352, %c0_353] : memref<32x128xbf16, #tpu.memory_space<vmem>>, vector<32x128xbf16>
    %cst_354 = arith.constant dense<0.000000e+00> : vector<8x128xf32>
    %727 = tpu.matmul %725, %726, %cst_354 {dimension_numbers = #tpu.dot_dimension_numbers<[1], [0], [0], [1], [0, 0, 1, 1], [], []>} : vector<8x32xbf16>, vector<32x128xbf16>, vector<8x128xf32> -> vector<8x128xf32>
    %728 = arith.addf %724, %727 : vector<8x128xf32>
    %729 = vector.extract_strided_slice %728 {offsets = [0, 0], sizes = [8, 32], strides = [1, 1]} : vector<8x128xf32> to vector<8x32xf32>
    %730 = arith.negf %729 : vector<8x32xf32>
    %731 = math.exp %730 : vector<8x32xf32>
    %cst_355 = arith.constant 1.000000e+00 : f32
    %732 = vector.broadcast %cst_355 : f32 to vector<8x32xf32>
    %733 = arith.addf %732, %731 : vector<8x32xf32>
    %734 = arith.divf %732, %733 : vector<8x32xf32>
    %735 = vector.extract_strided_slice %728 {offsets = [0, 32], sizes = [8, 32], strides = [1, 1]} : vector<8x128xf32> to vector<8x32xf32>
    %736 = arith.negf %735 : vector<8x32xf32>
    %737 = math.exp %736 : vector<8x32xf32>
    %cst_356 = arith.constant 1.000000e+00 : f32
    %738 = vector.broadcast %cst_356 : f32 to vector<8x32xf32>
    %739 = arith.addf %738, %737 : vector<8x32xf32>
    %740 = arith.divf %738, %739 : vector<8x32xf32>
    %741 = vector.extract_strided_slice %728 {offsets = [0, 64], sizes = [8, 32], strides = [1, 1]} : vector<8x128xf32> to vector<8x32xf32>
    %742 = math.tanh %741 : vector<8x32xf32>
    %743 = vector.extract_strided_slice %728 {offsets = [0, 96], sizes = [8, 32], strides = [1, 1]} : vector<8x128xf32> to vector<8x32xf32>
    %744 = arith.negf %743 : vector<8x32xf32>
    %745 = math.exp %744 : vector<8x32xf32>
    %cst_357 = arith.constant 1.000000e+00 : f32
    %746 = vector.broadcast %cst_357 : f32 to vector<8x32xf32>
    %747 = arith.addf %746, %745 : vector<8x32xf32>
    %748 = arith.divf %746, %747 : vector<8x32xf32>
    %749 = arith.mulf %740, %722 : vector<8x32xf32>
    %750 = arith.mulf %734, %742 : vector<8x32xf32>
    %751 = arith.addf %749, %750 : vector<8x32xf32>
    %752 = math.tanh %751 : vector<8x32xf32>
    %753 = arith.mulf %748, %752 : vector<8x32xf32>
    %c0_358 = arith.constant 0 : index
    %c0_359 = arith.constant 0 : index
    %754 = vector.load %arg16[%c0_358, %c0_359] : memref<8x32xf32, #tpu.memory_space<vmem>>, vector<8x32xf32>
    tpu.vector_store %arg16[%c0_358, %c0_359], %751 {strides = array<i32>} : memref<8x32xf32, #tpu.memory_space<vmem>>, vector<8x32xf32>,
    %c0_360 = arith.constant 0 : index
    %c0_361 = arith.constant 0 : index
    %755 = vector.load %arg15[%c0_360, %c0_361] : memref<8x32xf32, #tpu.memory_space<vmem>>, vector<8x32xf32>
    tpu.vector_store %arg15[%c0_360, %c0_361], %753 {strides = array<i32>} : memref<8x32xf32, #tpu.memory_space<vmem>>, vector<8x32xf32>,
    %c0_362 = arith.constant 0 : index
    %c0_363 = arith.constant 0 : index
    %756 = vector.load %arg2[%c0_362, %c0_363] : memref<8x1xi32, #tpu.memory_space<vmem>>, vector<8x1xi32>
    %757 = vector.broadcast %c1_i32_345 : i32 to vector<8x1xi32>
    %758 = arith.cmpi slt, %757, %756 : vector<8x1xi32>
    %cst_364 = arith.constant 0.000000e+00 : f32
    %759 = vector.shape_cast %758 : vector<8x1xi1> to vector<8x1xi1>
    %760 = vector.broadcast %759 : vector<8x1xi1> to vector<8x32xi1>
    %761 = vector.broadcast %cst_364 : f32 to vector<8x32xf32>
    %762 = arith.select %760, %753, %761 : vector<8x32xi1>, vector<8x32xf32>
    %763 = arith.index_cast %720 : i32 to index
    %c0_365 = arith.constant 0 : index
    %764 = vector.load %arg12[%763, %c0_365] : memref<64x32xf32, #tpu.memory_space<vmem>>, vector<8x32xf32>
    tpu.vector_store %arg12[%763, %c0_365], %762 {strides = array<i32>} : memref<64x32xf32, #tpu.memory_space<vmem>>, vector<8x32xf32>,
    %c2_i32_366 = arith.constant 2 : i32
    %c8_i32_367 = arith.constant 8 : i32
    %765 = arith.muli %c2_i32_366, %c8_i32_367 : i32
    %766 = tpu.assume_multiple %765, 8 : i32
    %c0_368 = arith.constant 0 : index
    %c0_369 = arith.constant 0 : index
    %767 = vector.load %arg15[%c0_368, %c0_369] : memref<8x32xf32, #tpu.memory_space<vmem>>, vector<8x32xf32>
    %c0_370 = arith.constant 0 : index
    %c0_371 = arith.constant 0 : index
    %768 = vector.load %arg16[%c0_370, %c0_371] : memref<8x32xf32, #tpu.memory_space<vmem>>, vector<8x32xf32>
    %769 = arith.index_cast %766 : i32 to index
    %c0_372 = arith.constant 0 : index
    %770 = vector.load %arg14[%769, %c0_372] : memref<64x128xf32, #tpu.memory_space<vmem>>, vector<8x128xf32>
    %771 = arith.truncf %767 : vector<8x32xf32> to vector<8x32xbf16>
    %c0_373 = arith.constant 0 : index
    %c0_374 = arith.constant 0 : index
    %772 = vector.load %arg10[%c0_373, %c0_374] : memref<32x128xbf16, #tpu.memory_space<vmem>>, vector<32x128xbf16>
    %cst_375 = arith.constant dense<0.000000e+00> : vector<8x128xf32>
    %773 = tpu.matmul %771, %772, %cst_375 {dimension_numbers = #tpu.dot_dimension_numbers<[1], [0], [0], [1], [0, 0, 1, 1], [], []>} : vector<8x32xbf16>, vector<32x128xbf16>, vector<8x128xf32> -> vector<8x128xf32>
    %774 = arith.addf %770, %773 : vector<8x128xf32>
    %775 = vector.extract_strided_slice %774 {offsets = [0, 0], sizes = [8, 32], strides = [1, 1]} : vector<8x128xf32> to vector<8x32xf32>
    %776 = arith.negf %775 : vector<8x32xf32>
    %777 = math.exp %776 : vector<8x32xf32>
    %cst_376 = arith.constant 1.000000e+00 : f32
    %778 = vector.broadcast %cst_376 : f32 to vector<8x32xf32>
    %779 = arith.addf %778, %777 : vector<8x32xf32>
    %780 = arith.divf %778, %779 : vector<8x32xf32>
    %781 = vector.extract_strided_slice %774 {offsets = [0, 32], sizes = [8, 32], strides = [1, 1]} : vector<8x128xf32> to vector<8x32xf32>
    %782 = arith.negf %781 : vector<8x32xf32>
    %783 = math.exp %782 : vector<8x32xf32>
    %cst_377 = arith.constant 1.000000e+00 : f32
    %784 = vector.broadcast %cst_377 : f32 to vector<8x32xf32>
    %785 = arith.addf %784, %783 : vector<8x32xf32>
    %786 = arith.divf %784, %785 : vector<8x32xf32>
    %787 = vector.extract_strided_slice %774 {offsets = [0, 64], sizes = [8, 32], strides = [1, 1]} : vector<8x128xf32> to vector<8x32xf32>
    %788 = math.tanh %787 : vector<8x32xf32>
    %789 = vector.extract_strided_slice %774 {offsets = [0, 96], sizes = [8, 32], strides = [1, 1]} : vector<8x128xf32> to vector<8x32xf32>
    %790 = arith.negf %789 : vector<8x32xf32>
    %791 = math.exp %790 : vector<8x32xf32>
    %cst_378 = arith.constant 1.000000e+00 : f32
    %792 = vector.broadcast %cst_378 : f32 to vector<8x32xf32>
    %793 = arith.addf %792, %791 : vector<8x32xf32>
    %794 = arith.divf %792, %793 : vector<8x32xf32>
    %795 = arith.mulf %786, %768 : vector<8x32xf32>
    %796 = arith.mulf %780, %788 : vector<8x32xf32>
    %797 = arith.addf %795, %796 : vector<8x32xf32>
    %798 = math.tanh %797 : vector<8x32xf32>
    %799 = arith.mulf %794, %798 : vector<8x32xf32>
    %c0_379 = arith.constant 0 : index
    %c0_380 = arith.constant 0 : index
    %800 = vector.load %arg16[%c0_379, %c0_380] : memref<8x32xf32, #tpu.memory_space<vmem>>, vector<8x32xf32>
    tpu.vector_store %arg16[%c0_379, %c0_380], %797 {strides = array<i32>} : memref<8x32xf32, #tpu.memory_space<vmem>>, vector<8x32xf32>,
    %c0_381 = arith.constant 0 : index
    %c0_382 = arith.constant 0 : index
    %801 = vector.load %arg15[%c0_381, %c0_382] : memref<8x32xf32, #tpu.memory_space<vmem>>, vector<8x32xf32>
    tpu.vector_store %arg15[%c0_381, %c0_382], %799 {strides = array<i32>} : memref<8x32xf32, #tpu.memory_space<vmem>>, vector<8x32xf32>,
    %c0_383 = arith.constant 0 : index
    %c0_384 = arith.constant 0 : index
    %802 = vector.load %arg2[%c0_383, %c0_384] : memref<8x1xi32, #tpu.memory_space<vmem>>, vector<8x1xi32>
    %803 = vector.broadcast %c2_i32_366 : i32 to vector<8x1xi32>
    %804 = arith.cmpi slt, %803, %802 : vector<8x1xi32>
    %cst_385 = arith.constant 0.000000e+00 : f32
    %805 = vector.shape_cast %804 : vector<8x1xi1> to vector<8x1xi1>
    %806 = vector.broadcast %805 : vector<8x1xi1> to vector<8x32xi1>
    %807 = vector.broadcast %cst_385 : f32 to vector<8x32xf32>
    %808 = arith.select %806, %799, %807 : vector<8x32xi1>, vector<8x32xf32>
    %809 = arith.index_cast %766 : i32 to index
    %c0_386 = arith.constant 0 : index
    %810 = vector.load %arg12[%809, %c0_386] : memref<64x32xf32, #tpu.memory_space<vmem>>, vector<8x32xf32>
    tpu.vector_store %arg12[%809, %c0_386], %808 {strides = array<i32>} : memref<64x32xf32, #tpu.memory_space<vmem>>, vector<8x32xf32>,
    %c3_i32_387 = arith.constant 3 : i32
    %c8_i32_388 = arith.constant 8 : i32
    %811 = arith.muli %c3_i32_387, %c8_i32_388 : i32
    %812 = tpu.assume_multiple %811, 8 : i32
    %c0_389 = arith.constant 0 : index
    %c0_390 = arith.constant 0 : index
    %813 = vector.load %arg15[%c0_389, %c0_390] : memref<8x32xf32, #tpu.memory_space<vmem>>, vector<8x32xf32>
    %c0_391 = arith.constant 0 : index
    %c0_392 = arith.constant 0 : index
    %814 = vector.load %arg16[%c0_391, %c0_392] : memref<8x32xf32, #tpu.memory_space<vmem>>, vector<8x32xf32>
    %815 = arith.index_cast %812 : i32 to index
    %c0_393 = arith.constant 0 : index
    %816 = vector.load %arg14[%815, %c0_393] : memref<64x128xf32, #tpu.memory_space<vmem>>, vector<8x128xf32>
    %817 = arith.truncf %813 : vector<8x32xf32> to vector<8x32xbf16>
    %c0_394 = arith.constant 0 : index
    %c0_395 = arith.constant 0 : index
    %818 = vector.load %arg10[%c0_394, %c0_395] : memref<32x128xbf16, #tpu.memory_space<vmem>>, vector<32x128xbf16>
    %cst_396 = arith.constant dense<0.000000e+00> : vector<8x128xf32>
    %819 = tpu.matmul %817, %818, %cst_396 {dimension_numbers = #tpu.dot_dimension_numbers<[1], [0], [0], [1], [0, 0, 1, 1], [], []>} : vector<8x32xbf16>, vector<32x128xbf16>, vector<8x128xf32> -> vector<8x128xf32>
    %820 = arith.addf %816, %819 : vector<8x128xf32>
    %821 = vector.extract_strided_slice %820 {offsets = [0, 0], sizes = [8, 32], strides = [1, 1]} : vector<8x128xf32> to vector<8x32xf32>
    %822 = arith.negf %821 : vector<8x32xf32>
    %823 = math.exp %822 : vector<8x32xf32>
    %cst_397 = arith.constant 1.000000e+00 : f32
    %824 = vector.broadcast %cst_397 : f32 to vector<8x32xf32>
    %825 = arith.addf %824, %823 : vector<8x32xf32>
    %826 = arith.divf %824, %825 : vector<8x32xf32>
    %827 = vector.extract_strided_slice %820 {offsets = [0, 32], sizes = [8, 32], strides = [1, 1]} : vector<8x128xf32> to vector<8x32xf32>
    %828 = arith.negf %827 : vector<8x32xf32>
    %829 = math.exp %828 : vector<8x32xf32>
    %cst_398 = arith.constant 1.000000e+00 : f32
    %830 = vector.broadcast %cst_398 : f32 to vector<8x32xf32>
    %831 = arith.addf %830, %829 : vector<8x32xf32>
    %832 = arith.divf %830, %831 : vector<8x32xf32>
    %833 = vector.extract_strided_slice %820 {offsets = [0, 64], sizes = [8, 32], strides = [1, 1]} : vector<8x128xf32> to vector<8x32xf32>
    %834 = math.tanh %833 : vector<8x32xf32>
    %835 = vector.extract_strided_slice %820 {offsets = [0, 96], sizes = [8, 32], strides = [1, 1]} : vector<8x128xf32> to vector<8x32xf32>
    %836 = arith.negf %835 : vector<8x32xf32>
    %837 = math.exp %836 : vector<8x32xf32>
    %cst_399 = arith.constant 1.000000e+00 : f32
    %838 = vector.broadcast %cst_399 : f32 to vector<8x32xf32>
    %839 = arith.addf %838, %837 : vector<8x32xf32>
    %840 = arith.divf %838, %839 : vector<8x32xf32>
    %841 = arith.mulf %832, %814 : vector<8x32xf32>
    %842 = arith.mulf %826, %834 : vector<8x32xf32>
    %843 = arith.addf %841, %842 : vector<8x32xf32>
    %844 = math.tanh %843 : vector<8x32xf32>
    %845 = arith.mulf %840, %844 : vector<8x32xf32>
    %c0_400 = arith.constant 0 : index
    %c0_401 = arith.constant 0 : index
    %846 = vector.load %arg16[%c0_400, %c0_401] : memref<8x32xf32, #tpu.memory_space<vmem>>, vector<8x32xf32>
    tpu.vector_store %arg16[%c0_400, %c0_401], %843 {strides = array<i32>} : memref<8x32xf32, #tpu.memory_space<vmem>>, vector<8x32xf32>,
    %c0_402 = arith.constant 0 : index
    %c0_403 = arith.constant 0 : index
    %847 = vector.load %arg15[%c0_402, %c0_403] : memref<8x32xf32, #tpu.memory_space<vmem>>, vector<8x32xf32>
    tpu.vector_store %arg15[%c0_402, %c0_403], %845 {strides = array<i32>} : memref<8x32xf32, #tpu.memory_space<vmem>>, vector<8x32xf32>,
    %c0_404 = arith.constant 0 : index
    %c0_405 = arith.constant 0 : index
    %848 = vector.load %arg2[%c0_404, %c0_405] : memref<8x1xi32, #tpu.memory_space<vmem>>, vector<8x1xi32>
    %849 = vector.broadcast %c3_i32_387 : i32 to vector<8x1xi32>
    %850 = arith.cmpi slt, %849, %848 : vector<8x1xi32>
    %cst_406 = arith.constant 0.000000e+00 : f32
    %851 = vector.shape_cast %850 : vector<8x1xi1> to vector<8x1xi1>
    %852 = vector.broadcast %851 : vector<8x1xi1> to vector<8x32xi1>
    %853 = vector.broadcast %cst_406 : f32 to vector<8x32xf32>
    %854 = arith.select %852, %845, %853 : vector<8x32xi1>, vector<8x32xf32>
    %855 = arith.index_cast %812 : i32 to index
    %c0_407 = arith.constant 0 : index
    %856 = vector.load %arg12[%855, %c0_407] : memref<64x32xf32, #tpu.memory_space<vmem>>, vector<8x32xf32>
    tpu.vector_store %arg12[%855, %c0_407], %854 {strides = array<i32>} : memref<64x32xf32, #tpu.memory_space<vmem>>, vector<8x32xf32>,
    %c4_i32_408 = arith.constant 4 : i32
    %c8_i32_409 = arith.constant 8 : i32
    %857 = arith.muli %c4_i32_408, %c8_i32_409 : i32
    %858 = tpu.assume_multiple %857, 8 : i32
    %c0_410 = arith.constant 0 : index
    %c0_411 = arith.constant 0 : index
    %859 = vector.load %arg15[%c0_410, %c0_411] : memref<8x32xf32, #tpu.memory_space<vmem>>, vector<8x32xf32>
    %c0_412 = arith.constant 0 : index
    %c0_413 = arith.constant 0 : index
    %860 = vector.load %arg16[%c0_412, %c0_413] : memref<8x32xf32, #tpu.memory_space<vmem>>, vector<8x32xf32>
    %861 = arith.index_cast %858 : i32 to index
    %c0_414 = arith.constant 0 : index
    %862 = vector.load %arg14[%861, %c0_414] : memref<64x128xf32, #tpu.memory_space<vmem>>, vector<8x128xf32>
    %863 = arith.truncf %859 : vector<8x32xf32> to vector<8x32xbf16>
    %c0_415 = arith.constant 0 : index
    %c0_416 = arith.constant 0 : index
    %864 = vector.load %arg10[%c0_415, %c0_416] : memref<32x128xbf16, #tpu.memory_space<vmem>>, vector<32x128xbf16>
    %cst_417 = arith.constant dense<0.000000e+00> : vector<8x128xf32>
    %865 = tpu.matmul %863, %864, %cst_417 {dimension_numbers = #tpu.dot_dimension_numbers<[1], [0], [0], [1], [0, 0, 1, 1], [], []>} : vector<8x32xbf16>, vector<32x128xbf16>, vector<8x128xf32> -> vector<8x128xf32>
    %866 = arith.addf %862, %865 : vector<8x128xf32>
    %867 = vector.extract_strided_slice %866 {offsets = [0, 0], sizes = [8, 32], strides = [1, 1]} : vector<8x128xf32> to vector<8x32xf32>
    %868 = arith.negf %867 : vector<8x32xf32>
    %869 = math.exp %868 : vector<8x32xf32>
    %cst_418 = arith.constant 1.000000e+00 : f32
    %870 = vector.broadcast %cst_418 : f32 to vector<8x32xf32>
    %871 = arith.addf %870, %869 : vector<8x32xf32>
    %872 = arith.divf %870, %871 : vector<8x32xf32>
    %873 = vector.extract_strided_slice %866 {offsets = [0, 32], sizes = [8, 32], strides = [1, 1]} : vector<8x128xf32> to vector<8x32xf32>
    %874 = arith.negf %873 : vector<8x32xf32>
    %875 = math.exp %874 : vector<8x32xf32>
    %cst_419 = arith.constant 1.000000e+00 : f32
    %876 = vector.broadcast %cst_419 : f32 to vector<8x32xf32>
    %877 = arith.addf %876, %875 : vector<8x32xf32>
    %878 = arith.divf %876, %877 : vector<8x32xf32>
    %879 = vector.extract_strided_slice %866 {offsets = [0, 64], sizes = [8, 32], strides = [1, 1]} : vector<8x128xf32> to vector<8x32xf32>
    %880 = math.tanh %879 : vector<8x32xf32>
    %881 = vector.extract_strided_slice %866 {offsets = [0, 96], sizes = [8, 32], strides = [1, 1]} : vector<8x128xf32> to vector<8x32xf32>
    %882 = arith.negf %881 : vector<8x32xf32>
    %883 = math.exp %882 : vector<8x32xf32>
    %cst_420 = arith.constant 1.000000e+00 : f32
    %884 = vector.broadcast %cst_420 : f32 to vector<8x32xf32>
    %885 = arith.addf %884, %883 : vector<8x32xf32>
    %886 = arith.divf %884, %885 : vector<8x32xf32>
    %887 = arith.mulf %878, %860 : vector<8x32xf32>
    %888 = arith.mulf %872, %880 : vector<8x32xf32>
    %889 = arith.addf %887, %888 : vector<8x32xf32>
    %890 = math.tanh %889 : vector<8x32xf32>
    %891 = arith.mulf %886, %890 : vector<8x32xf32>
    %c0_421 = arith.constant 0 : index
    %c0_422 = arith.constant 0 : index
    %892 = vector.load %arg16[%c0_421, %c0_422] : memref<8x32xf32, #tpu.memory_space<vmem>>, vector<8x32xf32>
    tpu.vector_store %arg16[%c0_421, %c0_422], %889 {strides = array<i32>} : memref<8x32xf32, #tpu.memory_space<vmem>>, vector<8x32xf32>,
    %c0_423 = arith.constant 0 : index
    %c0_424 = arith.constant 0 : index
    %893 = vector.load %arg15[%c0_423, %c0_424] : memref<8x32xf32, #tpu.memory_space<vmem>>, vector<8x32xf32>
    tpu.vector_store %arg15[%c0_423, %c0_424], %891 {strides = array<i32>} : memref<8x32xf32, #tpu.memory_space<vmem>>, vector<8x32xf32>,
    %c0_425 = arith.constant 0 : index
    %c0_426 = arith.constant 0 : index
    %894 = vector.load %arg2[%c0_425, %c0_426] : memref<8x1xi32, #tpu.memory_space<vmem>>, vector<8x1xi32>
    %895 = vector.broadcast %c4_i32_408 : i32 to vector<8x1xi32>
    %896 = arith.cmpi slt, %895, %894 : vector<8x1xi32>
    %cst_427 = arith.constant 0.000000e+00 : f32
    %897 = vector.shape_cast %896 : vector<8x1xi1> to vector<8x1xi1>
    %898 = vector.broadcast %897 : vector<8x1xi1> to vector<8x32xi1>
    %899 = vector.broadcast %cst_427 : f32 to vector<8x32xf32>
    %900 = arith.select %898, %891, %899 : vector<8x32xi1>, vector<8x32xf32>
    %901 = arith.index_cast %858 : i32 to index
    %c0_428 = arith.constant 0 : index
    %902 = vector.load %arg12[%901, %c0_428] : memref<64x32xf32, #tpu.memory_space<vmem>>, vector<8x32xf32>
    tpu.vector_store %arg12[%901, %c0_428], %900 {strides = array<i32>} : memref<64x32xf32, #tpu.memory_space<vmem>>, vector<8x32xf32>,
    %c5_i32_429 = arith.constant 5 : i32
    %c8_i32_430 = arith.constant 8 : i32
    %903 = arith.muli %c5_i32_429, %c8_i32_430 : i32
    %904 = tpu.assume_multiple %903, 8 : i32
    %c0_431 = arith.constant 0 : index
    %c0_432 = arith.constant 0 : index
    %905 = vector.load %arg15[%c0_431, %c0_432] : memref<8x32xf32, #tpu.memory_space<vmem>>, vector<8x32xf32>
    %c0_433 = arith.constant 0 : index
    %c0_434 = arith.constant 0 : index
    %906 = vector.load %arg16[%c0_433, %c0_434] : memref<8x32xf32, #tpu.memory_space<vmem>>, vector<8x32xf32>
    %907 = arith.index_cast %904 : i32 to index
    %c0_435 = arith.constant 0 : index
    %908 = vector.load %arg14[%907, %c0_435] : memref<64x128xf32, #tpu.memory_space<vmem>>, vector<8x128xf32>
    %909 = arith.truncf %905 : vector<8x32xf32> to vector<8x32xbf16>
    %c0_436 = arith.constant 0 : index
    %c0_437 = arith.constant 0 : index
    %910 = vector.load %arg10[%c0_436, %c0_437] : memref<32x128xbf16, #tpu.memory_space<vmem>>, vector<32x128xbf16>
    %cst_438 = arith.constant dense<0.000000e+00> : vector<8x128xf32>
    %911 = tpu.matmul %909, %910, %cst_438 {dimension_numbers = #tpu.dot_dimension_numbers<[1], [0], [0], [1], [0, 0, 1, 1], [], []>} : vector<8x32xbf16>, vector<32x128xbf16>, vector<8x128xf32> -> vector<8x128xf32>
    %912 = arith.addf %908, %911 : vector<8x128xf32>
    %913 = vector.extract_strided_slice %912 {offsets = [0, 0], sizes = [8, 32], strides = [1, 1]} : vector<8x128xf32> to vector<8x32xf32>
    %914 = arith.negf %913 : vector<8x32xf32>
    %915 = math.exp %914 : vector<8x32xf32>
    %cst_439 = arith.constant 1.000000e+00 : f32
    %916 = vector.broadcast %cst_439 : f32 to vector<8x32xf32>
    %917 = arith.addf %916, %915 : vector<8x32xf32>
    %918 = arith.divf %916, %917 : vector<8x32xf32>
    %919 = vector.extract_strided_slice %912 {offsets = [0, 32], sizes = [8, 32], strides = [1, 1]} : vector<8x128xf32> to vector<8x32xf32>
    %920 = arith.negf %919 : vector<8x32xf32>
    %921 = math.exp %920 : vector<8x32xf32>
    %cst_440 = arith.constant 1.000000e+00 : f32
    %922 = vector.broadcast %cst_440 : f32 to vector<8x32xf32>
    %923 = arith.addf %922, %921 : vector<8x32xf32>
    %924 = arith.divf %922, %923 : vector<8x32xf32>
    %925 = vector.extract_strided_slice %912 {offsets = [0, 64], sizes = [8, 32], strides = [1, 1]} : vector<8x128xf32> to vector<8x32xf32>
    %926 = math.tanh %925 : vector<8x32xf32>
    %927 = vector.extract_strided_slice %912 {offsets = [0, 96], sizes = [8, 32], strides = [1, 1]} : vector<8x128xf32> to vector<8x32xf32>
    %928 = arith.negf %927 : vector<8x32xf32>
    %929 = math.exp %928 : vector<8x32xf32>
    %cst_441 = arith.constant 1.000000e+00 : f32
    %930 = vector.broadcast %cst_441 : f32 to vector<8x32xf32>
    %931 = arith.addf %930, %929 : vector<8x32xf32>
    %932 = arith.divf %930, %931 : vector<8x32xf32>
    %933 = arith.mulf %924, %906 : vector<8x32xf32>
    %934 = arith.mulf %918, %926 : vector<8x32xf32>
    %935 = arith.addf %933, %934 : vector<8x32xf32>
    %936 = math.tanh %935 : vector<8x32xf32>
    %937 = arith.mulf %932, %936 : vector<8x32xf32>
    %c0_442 = arith.constant 0 : index
    %c0_443 = arith.constant 0 : index
    %938 = vector.load %arg16[%c0_442, %c0_443] : memref<8x32xf32, #tpu.memory_space<vmem>>, vector<8x32xf32>
    tpu.vector_store %arg16[%c0_442, %c0_443], %935 {strides = array<i32>} : memref<8x32xf32, #tpu.memory_space<vmem>>, vector<8x32xf32>,
    %c0_444 = arith.constant 0 : index
    %c0_445 = arith.constant 0 : index
    %939 = vector.load %arg15[%c0_444, %c0_445] : memref<8x32xf32, #tpu.memory_space<vmem>>, vector<8x32xf32>
    tpu.vector_store %arg15[%c0_444, %c0_445], %937 {strides = array<i32>} : memref<8x32xf32, #tpu.memory_space<vmem>>, vector<8x32xf32>,
    %c0_446 = arith.constant 0 : index
    %c0_447 = arith.constant 0 : index
    %940 = vector.load %arg2[%c0_446, %c0_447] : memref<8x1xi32, #tpu.memory_space<vmem>>, vector<8x1xi32>
    %941 = vector.broadcast %c5_i32_429 : i32 to vector<8x1xi32>
    %942 = arith.cmpi slt, %941, %940 : vector<8x1xi32>
    %cst_448 = arith.constant 0.000000e+00 : f32
    %943 = vector.shape_cast %942 : vector<8x1xi1> to vector<8x1xi1>
    %944 = vector.broadcast %943 : vector<8x1xi1> to vector<8x32xi1>
    %945 = vector.broadcast %cst_448 : f32 to vector<8x32xf32>
    %946 = arith.select %944, %937, %945 : vector<8x32xi1>, vector<8x32xf32>
    %947 = arith.index_cast %904 : i32 to index
    %c0_449 = arith.constant 0 : index
    %948 = vector.load %arg12[%947, %c0_449] : memref<64x32xf32, #tpu.memory_space<vmem>>, vector<8x32xf32>
    tpu.vector_store %arg12[%947, %c0_449], %946 {strides = array<i32>} : memref<64x32xf32, #tpu.memory_space<vmem>>, vector<8x32xf32>,
    %c6_i32_450 = arith.constant 6 : i32
    %c8_i32_451 = arith.constant 8 : i32
    %949 = arith.muli %c6_i32_450, %c8_i32_451 : i32
    %950 = tpu.assume_multiple %949, 8 : i32
    %c0_452 = arith.constant 0 : index
    %c0_453 = arith.constant 0 : index
    %951 = vector.load %arg15[%c0_452, %c0_453] : memref<8x32xf32, #tpu.memory_space<vmem>>, vector<8x32xf32>
    %c0_454 = arith.constant 0 : index
    %c0_455 = arith.constant 0 : index
    %952 = vector.load %arg16[%c0_454, %c0_455] : memref<8x32xf32, #tpu.memory_space<vmem>>, vector<8x32xf32>
    %953 = arith.index_cast %950 : i32 to index
    %c0_456 = arith.constant 0 : index
    %954 = vector.load %arg14[%953, %c0_456] : memref<64x128xf32, #tpu.memory_space<vmem>>, vector<8x128xf32>
    %955 = arith.truncf %951 : vector<8x32xf32> to vector<8x32xbf16>
    %c0_457 = arith.constant 0 : index
    %c0_458 = arith.constant 0 : index
    %956 = vector.load %arg10[%c0_457, %c0_458] : memref<32x128xbf16, #tpu.memory_space<vmem>>, vector<32x128xbf16>
    %cst_459 = arith.constant dense<0.000000e+00> : vector<8x128xf32>
    %957 = tpu.matmul %955, %956, %cst_459 {dimension_numbers = #tpu.dot_dimension_numbers<[1], [0], [0], [1], [0, 0, 1, 1], [], []>} : vector<8x32xbf16>, vector<32x128xbf16>, vector<8x128xf32> -> vector<8x128xf32>
    %958 = arith.addf %954, %957 : vector<8x128xf32>
    %959 = vector.extract_strided_slice %958 {offsets = [0, 0], sizes = [8, 32], strides = [1, 1]} : vector<8x128xf32> to vector<8x32xf32>
    %960 = arith.negf %959 : vector<8x32xf32>
    %961 = math.exp %960 : vector<8x32xf32>
    %cst_460 = arith.constant 1.000000e+00 : f32
    %962 = vector.broadcast %cst_460 : f32 to vector<8x32xf32>
    %963 = arith.addf %962, %961 : vector<8x32xf32>
    %964 = arith.divf %962, %963 : vector<8x32xf32>
    %965 = vector.extract_strided_slice %958 {offsets = [0, 32], sizes = [8, 32], strides = [1, 1]} : vector<8x128xf32> to vector<8x32xf32>
    %966 = arith.negf %965 : vector<8x32xf32>
    %967 = math.exp %966 : vector<8x32xf32>
    %cst_461 = arith.constant 1.000000e+00 : f32
    %968 = vector.broadcast %cst_461 : f32 to vector<8x32xf32>
    %969 = arith.addf %968, %967 : vector<8x32xf32>
    %970 = arith.divf %968, %969 : vector<8x32xf32>
    %971 = vector.extract_strided_slice %958 {offsets = [0, 64], sizes = [8, 32], strides = [1, 1]} : vector<8x128xf32> to vector<8x32xf32>
    %972 = math.tanh %971 : vector<8x32xf32>
    %973 = vector.extract_strided_slice %958 {offsets = [0, 96], sizes = [8, 32], strides = [1, 1]} : vector<8x128xf32> to vector<8x32xf32>
    %974 = arith.negf %973 : vector<8x32xf32>
    %975 = math.exp %974 : vector<8x32xf32>
    %cst_462 = arith.constant 1.000000e+00 : f32
    %976 = vector.broadcast %cst_462 : f32 to vector<8x32xf32>
    %977 = arith.addf %976, %975 : vector<8x32xf32>
    %978 = arith.divf %976, %977 : vector<8x32xf32>
    %979 = arith.mulf %970, %952 : vector<8x32xf32>
    %980 = arith.mulf %964, %972 : vector<8x32xf32>
    %981 = arith.addf %979, %980 : vector<8x32xf32>
    %982 = math.tanh %981 : vector<8x32xf32>
    %983 = arith.mulf %978, %982 : vector<8x32xf32>
    %c0_463 = arith.constant 0 : index
    %c0_464 = arith.constant 0 : index
    %984 = vector.load %arg16[%c0_463, %c0_464] : memref<8x32xf32, #tpu.memory_space<vmem>>, vector<8x32xf32>
    tpu.vector_store %arg16[%c0_463, %c0_464], %981 {strides = array<i32>} : memref<8x32xf32, #tpu.memory_space<vmem>>, vector<8x32xf32>,
    %c0_465 = arith.constant 0 : index
    %c0_466 = arith.constant 0 : index
    %985 = vector.load %arg15[%c0_465, %c0_466] : memref<8x32xf32, #tpu.memory_space<vmem>>, vector<8x32xf32>
    tpu.vector_store %arg15[%c0_465, %c0_466], %983 {strides = array<i32>} : memref<8x32xf32, #tpu.memory_space<vmem>>, vector<8x32xf32>,
    %c0_467 = arith.constant 0 : index
    %c0_468 = arith.constant 0 : index
    %986 = vector.load %arg2[%c0_467, %c0_468] : memref<8x1xi32, #tpu.memory_space<vmem>>, vector<8x1xi32>
    %987 = vector.broadcast %c6_i32_450 : i32 to vector<8x1xi32>
    %988 = arith.cmpi slt, %987, %986 : vector<8x1xi32>
    %cst_469 = arith.constant 0.000000e+00 : f32
    %989 = vector.shape_cast %988 : vector<8x1xi1> to vector<8x1xi1>
    %990 = vector.broadcast %989 : vector<8x1xi1> to vector<8x32xi1>
    %991 = vector.broadcast %cst_469 : f32 to vector<8x32xf32>
    %992 = arith.select %990, %983, %991 : vector<8x32xi1>, vector<8x32xf32>
    %993 = arith.index_cast %950 : i32 to index
    %c0_470 = arith.constant 0 : index
    %994 = vector.load %arg12[%993, %c0_470] : memref<64x32xf32, #tpu.memory_space<vmem>>, vector<8x32xf32>
    tpu.vector_store %arg12[%993, %c0_470], %992 {strides = array<i32>} : memref<64x32xf32, #tpu.memory_space<vmem>>, vector<8x32xf32>,
    %c7_i32_471 = arith.constant 7 : i32
    %c8_i32_472 = arith.constant 8 : i32
    %995 = arith.muli %c7_i32_471, %c8_i32_472 : i32
    %996 = tpu.assume_multiple %995, 8 : i32
    %c0_473 = arith.constant 0 : index
    %c0_474 = arith.constant 0 : index
    %997 = vector.load %arg15[%c0_473, %c0_474] : memref<8x32xf32, #tpu.memory_space<vmem>>, vector<8x32xf32>
    %c0_475 = arith.constant 0 : index
    %c0_476 = arith.constant 0 : index
    %998 = vector.load %arg16[%c0_475, %c0_476] : memref<8x32xf32, #tpu.memory_space<vmem>>, vector<8x32xf32>
    %999 = arith.index_cast %996 : i32 to index
    %c0_477 = arith.constant 0 : index
    %1000 = vector.load %arg14[%999, %c0_477] : memref<64x128xf32, #tpu.memory_space<vmem>>, vector<8x128xf32>
    %1001 = arith.truncf %997 : vector<8x32xf32> to vector<8x32xbf16>
    %c0_478 = arith.constant 0 : index
    %c0_479 = arith.constant 0 : index
    %1002 = vector.load %arg10[%c0_478, %c0_479] : memref<32x128xbf16, #tpu.memory_space<vmem>>, vector<32x128xbf16>
    %cst_480 = arith.constant dense<0.000000e+00> : vector<8x128xf32>
    %1003 = tpu.matmul %1001, %1002, %cst_480 {dimension_numbers = #tpu.dot_dimension_numbers<[1], [0], [0], [1], [0, 0, 1, 1], [], []>} : vector<8x32xbf16>, vector<32x128xbf16>, vector<8x128xf32> -> vector<8x128xf32>
    %1004 = arith.addf %1000, %1003 : vector<8x128xf32>
    %1005 = vector.extract_strided_slice %1004 {offsets = [0, 0], sizes = [8, 32], strides = [1, 1]} : vector<8x128xf32> to vector<8x32xf32>
    %1006 = arith.negf %1005 : vector<8x32xf32>
    %1007 = math.exp %1006 : vector<8x32xf32>
    %cst_481 = arith.constant 1.000000e+00 : f32
    %1008 = vector.broadcast %cst_481 : f32 to vector<8x32xf32>
    %1009 = arith.addf %1008, %1007 : vector<8x32xf32>
    %1010 = arith.divf %1008, %1009 : vector<8x32xf32>
    %1011 = vector.extract_strided_slice %1004 {offsets = [0, 32], sizes = [8, 32], strides = [1, 1]} : vector<8x128xf32> to vector<8x32xf32>
    %1012 = arith.negf %1011 : vector<8x32xf32>
    %1013 = math.exp %1012 : vector<8x32xf32>
    %cst_482 = arith.constant 1.000000e+00 : f32
    %1014 = vector.broadcast %cst_482 : f32 to vector<8x32xf32>
    %1015 = arith.addf %1014, %1013 : vector<8x32xf32>
    %1016 = arith.divf %1014, %1015 : vector<8x32xf32>
    %1017 = vector.extract_strided_slice %1004 {offsets = [0, 64], sizes = [8, 32], strides = [1, 1]} : vector<8x128xf32> to vector<8x32xf32>
    %1018 = math.tanh %1017 : vector<8x32xf32>
    %1019 = vector.extract_strided_slice %1004 {offsets = [0, 96], sizes = [8, 32], strides = [1, 1]} : vector<8x128xf32> to vector<8x32xf32>
    %1020 = arith.negf %1019 : vector<8x32xf32>
    %1021 = math.exp %1020 : vector<8x32xf32>
    %cst_483 = arith.constant 1.000000e+00 : f32
    %1022 = vector.broadcast %cst_483 : f32 to vector<8x32xf32>
    %1023 = arith.addf %1022, %1021 : vector<8x32xf32>
    %1024 = arith.divf %1022, %1023 : vector<8x32xf32>
    %1025 = arith.mulf %1016, %998 : vector<8x32xf32>
    %1026 = arith.mulf %1010, %1018 : vector<8x32xf32>
    %1027 = arith.addf %1025, %1026 : vector<8x32xf32>
    %1028 = math.tanh %1027 : vector<8x32xf32>
    %1029 = arith.mulf %1024, %1028 : vector<8x32xf32>
    %c0_484 = arith.constant 0 : index
    %c0_485 = arith.constant 0 : index
    %1030 = vector.load %arg16[%c0_484, %c0_485] : memref<8x32xf32, #tpu.memory_space<vmem>>, vector<8x32xf32>
    tpu.vector_store %arg16[%c0_484, %c0_485], %1027 {strides = array<i32>} : memref<8x32xf32, #tpu.memory_space<vmem>>, vector<8x32xf32>,
    %c0_486 = arith.constant 0 : index
    %c0_487 = arith.constant 0 : index
    %1031 = vector.load %arg15[%c0_486, %c0_487] : memref<8x32xf32, #tpu.memory_space<vmem>>, vector<8x32xf32>
    tpu.vector_store %arg15[%c0_486, %c0_487], %1029 {strides = array<i32>} : memref<8x32xf32, #tpu.memory_space<vmem>>, vector<8x32xf32>,
    %c0_488 = arith.constant 0 : index
    %c0_489 = arith.constant 0 : index
    %1032 = vector.load %arg2[%c0_488, %c0_489] : memref<8x1xi32, #tpu.memory_space<vmem>>, vector<8x1xi32>
    %1033 = vector.broadcast %c7_i32_471 : i32 to vector<8x1xi32>
    %1034 = arith.cmpi slt, %1033, %1032 : vector<8x1xi32>
    %cst_490 = arith.constant 0.000000e+00 : f32
    %1035 = vector.shape_cast %1034 : vector<8x1xi1> to vector<8x1xi1>
    %1036 = vector.broadcast %1035 : vector<8x1xi1> to vector<8x32xi1>
    %1037 = vector.broadcast %cst_490 : f32 to vector<8x32xf32>
    %1038 = arith.select %1036, %1029, %1037 : vector<8x32xi1>, vector<8x32xf32>
    %1039 = arith.index_cast %996 : i32 to index
    %c0_491 = arith.constant 0 : index
    %1040 = vector.load %arg12[%1039, %c0_491] : memref<64x32xf32, #tpu.memory_space<vmem>>, vector<8x32xf32>
    tpu.vector_store %arg12[%1039, %c0_491], %1038 {strides = array<i32>} : memref<64x32xf32, #tpu.memory_space<vmem>>, vector<8x32xf32>,
    %c8_i32_492 = arith.constant 8 : i32
    return
  }
  func.func @transform_0(%arg0: i32) -> (i32, i32) {
    %c0_i32 = arith.constant 0 : i32
    %c0_i32_0 = arith.constant 0 : i32
    %c0_i32_1 = arith.constant 0 : i32
    return %c0_i32, %c0_i32_0 : i32, i32
  }
  func.func @transform_1(%arg0: i32) -> (i32, i32) {
    %c0_i32 = arith.constant 0 : i32
    %c0_i32_0 = arith.constant 0 : i32
    %c0_i32_1 = arith.constant 0 : i32
    return %c0_i32, %c0_i32_0 : i32, i32
  }
  func.func @transform_2(%arg0: i32) -> (i32, i32) {
    %c0_i32 = arith.constant 0 : i32
    %c0_i32_0 = arith.constant 0 : i32
    %c0_i32_1 = arith.constant 0 : i32
    return %c0_i32, %c0_i32_0 : i32, i32
  }
  func.func @transform_3(%arg0: i32) -> (i32, i32) {
    %c0_i32 = arith.constant 0 : i32
    %c0_i32_0 = arith.constant 0 : i32
    %c0_i32_1 = arith.constant 0 : i32
    return %c0_i32, %c0_i32_0 : i32, i32
  }
  func.func @transform_4(%arg0: i32) -> (i32, i32) {
    %c0_i32 = arith.constant 0 : i32
    %c0_i32_0 = arith.constant 0 : i32
    %c0_i32_1 = arith.constant 0 : i32
    return %c0_i32, %c0_i32_0 : i32, i32
  }
  func.func @transform_5(%arg0: i32) -> (i32, i32) {
    %c0_i32 = arith.constant 0 : i32
    %c0_i32_0 = arith.constant 0 : i32
    %c0_i32_1 = arith.constant 0 : i32
    return %c0_i32, %c0_i32_0 : i32, i32
  }
  func.func @transform_6(%arg0: i32) -> (i32, i32) {
    %c0_i32 = arith.constant 0 : i32
    %c0_i32_0 = arith.constant 0 : i32
    %c0_i32_1 = arith.constant 0 : i32
    return %c0_i32, %c0_i32_0 : i32, i32
  }
  func.func @transform_7(%arg0: i32) -> (i32, i32) {
    %c0_i32 = arith.constant 0 : i32
    %c0_i32_0 = arith.constant 0 : i32
    %c0_i32_1 = arith.constant 0 : i32
    return %c0_i32, %c0_i32_0 : i32, i32
  }
  func.func @transform_8(%arg0: i32) -> (i32, i32) {
    %c0_i32 = arith.constant 0 : i32
    %c0_i32_0 = arith.constant 0 : i32
    %c0_i32_1 = arith.constant 0 : i32
    return %c0_i32, %c0_i32_0 : i32, i32
  }
  func.func @transform_9(%arg0: i32) -> (i32, i32) {
    %c0_i32 = arith.constant 0 : i32
    %c0_i32_0 = arith.constant 0 : i32
    %c0_i32_1 = arith.constant 0 : i32
    return %c0_i32, %c0_i32_0 : i32, i32
  }
  func.func @transform_10(%arg0: i32) -> (i32, i32) {
    %c0_i32 = arith.constant 0 : i32
    %c0_i32_0 = arith.constant 0 : i32
    %c0_i32_1 = arith.constant 0 : i32
    return %c0_i32, %c0_i32_0 : i32, i32
  }
  func.func @transform_11(%arg0: i32) -> (i32, i32) {
    %c0_i32 = arith.constant 0 : i32
    %c0_i32_0 = arith.constant 0 : i32
    %c0_i32_1 = arith.constant 0 : i32
    return %c0_i32, %c0_i32_0 : i32, i32
  }
}

</mosaic_0001>

<bundles_post_ra>
// kernel: lstm_model_forward.1
= control target key start
LH: loop header
LB: loop body
LE: loop exit
PB: predicated region body
PF: predicated region fallthrough
CT: control target
= control target key end

     0   :  { %vm168_vm0 = vcmask 261120   ;;  %v3900_v0 = vmov 0.0   ;;  %vm3901_vm1 = vmmov 0   ;;  %vm82_vm2 = vcmask 130048   ;;  %s3902_s28 = smov 64   ;;  %s3903_s29 = smov 32   ;;  %s4769_s2 = inlined_call_operand.vmem [shape: bf16[16,128], index: 2, kind: input, shape index: {}]   ;;  %s4770_s3 = inlined_call_operand.vmem [shape: bf16[32,128], index: 3, kind: input, shape index: {}]   ;;  %s4771_s0 = inlined_call_operand.vmem [shape: bf16[64,16], index: 0, kind: input, shape index: {}]   ;;  %s4772_s4 = inlined_call_operand.vmem [shape: f32[1,128], index: 4, kind: input, shape index: {}]   ;;  %s4773_s5 = inlined_call_operand.vmem [shape: bf16[32,128], index: 5, kind: input, shape index: {}]   ;;  %s4774_s6 = inlined_call_operand.vmem [shape: bf16[32,128], index: 6, kind: input, shape index: {}]   ;;  %s4775_s7 = inlined_call_operand.vmem [shape: f32[1,128], index: 7, kind: input, shape index: {}]   ;;  %s4776_s8 = inlined_call_operand.vmem [shape: bf16[32,128], index: 8, kind: input, shape index: {}]   ;;  %s4777_s9 = inlined_call_operand.vmem [shape: bf16[32,128], index: 9, kind: input, shape index: {}]   ;;  %s4778_s10 = inlined_call_operand.vmem [shape: f32[1,128], index: 10, kind: input, shape index: {}]   ;;  %s4779_s1 = inlined_call_operand.vmem [shape: s32[8,1], index: 1, kind: input, shape index: {}]   ;;  %s4780_s11 = inlined_call_operand.vmem [shape: f32[64,32], index: 11, kind: output, shape index: {}]  }
   0x1   :  { %3419 = vmatprep.subr.bf16.mxu1 %v3900_v0  ;;  %v3643_v1 = vld [vmem:[%s4769_s2] sm:$0xff]   ;;  %3423 = vmatprep.mubr.msk.bf16.mxu1 %vm3901_vm1, %v3900_v0  ;;  %169 = vst.msk [vmem:[#allocation4] sm:$0xff] %vm168_vm0, %v3900_v0  ;;  %170 = vst.msk [vmem:[#allocation5] sm:$0xff] %vm168_vm0, %v3900_v0  ;;  %v3644_v2 = vld [vmem:[%s4770_s3 + $0x8] sm:$0xff]   ;;  %vm280_vm3 = vcmask 257024  }
   0x2   :  { %3409 = vmatprep.subr.bf16.mxu0 %v3643_v1  ;;  %v3645_v3 = vld [vmem:[%s4771_s0] sm:$0xff]   ;;  %3420 = vmatpush3.bf16.msra.mxu1 %v3644_v2  ;;  %v3646_v4 = vld [vmem:[%s4771_s0 + $0x8] sm:$0xff]   ;;  %v3651_v60 = vld [vmem:[%s4771_s0 + $0x10] sm:$0xff]  }
   0x3   :  { %3410 = vmatpush3.bf16.msra.mxu0 %v3643_v1  ;;  %3411 = vmatprep.mubr.msk.bf16.mxu0 %vm82_vm2, %v3645_v3  ;;  %v3647_v5 = vld [vmem:[%s4770_s3] sm:$0xff]   ;;  %v3648_v30 = vld [vmem:[%s4770_s3 + $0x8] sm:$0xff]   ;;  %v3652_v61 = vld [vmem:[%s4771_s0 + $0x18] sm:$0xff]  }
   0x4   :  { %3421 = vmatprep.subr.bf16.mxu1 %v3900_v0  ;;  %3435 = vmatprep.subr.bf16.mxu0 %v3900_v0  ;;  %v4001_v9 = vld [vmem:[%s4772_s4] ss:$0 sm:$0xff]  ;;  %s3904_s4 = smov 96   ;;  %v3650_v59 = vld [vmem:[%s4770_s3 + $0x8] sm:$0xff]  }
   0x5   :  { %v3649_v31 = vld [vmem:[%s4770_s3] sm:$0xff]  }
   0x6   :  { %3412 = vmatmul.mubr.msk.bf16.vlgmr.msra.gmra.mxu0 %vm82_vm2, %v3646_v4  ;;  %3422 = vmatpush3.bf16.msra.mxu1 %v3647_v5  ;;  %v3653_v62 = vld [vmem:[%s4770_s3] sm:$0xff]  }
   0x7   :  { %3427 = vmatprep.subr.bf16.mxu1 %v3900_v0  ;;  %3436 = vmatpush3.bf16.msra.mxu0 %v3650_v59  ;;  %v3657_v59 = vld [vmem:[%s4770_s3] sm:$0xff]  }
   0x8   :  { %v171_v6 = vld [vmem:[#allocation4] sm:$0xff]  ;;  %v172_v18 = vld [vmem:[#allocation5] sm:$0xff]  ;;  %3415 = vmatprep.mubr.msk.bf16.mxu0 %vm82_vm2, %v3651_v60  ;;  %3437 = vmatprep.subr.bf16.mxu0 %v3900_v0 }
   0x9   :  { %v174_v7 = vpack.c.bf16 %v171_v6, %v171_v6 }
   0xb   :  { %3424 = vmatmul.mubr.msk.bf16.vlgmr.msra.gmra.mxu1 %vm168_vm0, %v174_v7  ;;  %3438 = vmatpush3.bf16.msra.mxu0 %v3653_v62 }
   0xc   :  { %3431 = vmatprep.mubr.msk.bf16.mxu1 %vm3901_vm1, %v3900_v0  ;;  %3428 = vmatpush3.bf16.msra.mxu1 %v3648_v30  ;;  %v3654_v30 = vld [vmem:[%s4770_s3 + $0x8] sm:$0xff]  }
   0xd   :  { %3429 = vmatprep.subr.bf16.mxu1 %v3900_v0  ;;  %3451 = vmatprep.subr.bf16.mxu0 %v3900_v0 }
   0xe   :  { %3416 = vmatmul.mubr.msk.bf16.gmra.mxu0 %vm82_vm2, %v3652_v61 }
   0xf   :  { %3439 = vmatprep.mubr.msk.bf16.mxu0 %vm3901_vm1, %v3900_v0 }
  0x10   :  { %3430 = vmatpush3.bf16.msra.mxu1 %v3649_v31  ;;  %v3655_v31 = vld [vmem:[%s4770_s3] sm:$0xff]  }
  0x11   :  { %3443 = vmatprep.subr.bf16.mxu1 %v3900_v0 }
  0xc6   :  { %v3996_v8 = vpop.f32.mrf.mxu0 }
  0xc8   :  { %v129_v10 = vpop.f32.mrf.mxu0 }
  0xc9   :  { %v130_v11 = vadd.f32 %v4001_v9, %v129_v10 }
  0xca   :  { %v4027_v39 = vpop.f32.mrf.mxu0 }
  0xcb   :  { %v228_v12 = vpop.f32.mrf.mxu1 }
  0xcc   :  { %v234_v13 = vadd.f32 %v228_v12, %v130_v11  ;;  %v132_v40 = vpop.f32.mrf.mxu0 }
  0xcd   :  { %v3425_v14 = vpop.f32.mrf.mxu1  ;;  %v133_v41 = vadd.f32 %v4001_v9, %v132_v40 }
  0xce   :  { %3708 = vtanh.f32 %v234_v13  ;;  %v3166_v19 = vmul.f32 -1.442695, %v234_v13  ;;  %v4062_v7 = vpop.f32.mrf.mxu0  ;;  %v138_v13 = vadd.f32 %v3996_v8, %v4001_v9 }
  0xcf   :  { %v231_v15 = vpop.f32.mrf.mxu1 }
  0xd0   :  { %3710 = vpow2.f32 %v3166_v19  ;;  %v4064_v10 = vpop.f32.mrf.mxu0 }
  0xd1   :  { %v3426_v16 = vpop.f32.mrf.mxu1 }
  0xd2   :  { %v4066_v11 = vpop.f32.mrf.mxu0 }
  0xd4   :  { %v4068_v12 = vpop.f32.mrf.mxu0 }
  0xdb   :  { %v3709_v17 = vpop.eup %3708 }
  0xdc   :  { %248 = vrot.lane.b32.xlu0 %v3709_v17, %s3902_s28 }
  0xdd   :  { %v3711_v20 = vpop.eup %3710 }
  0xde   :  { %v238_v21 = vadd.f32 1.0, %v3711_v20 }
  0xe0   :  { %243 = vrot.lane.b32.xlu0 %v172_v18, %s3903_s29  ;;  %3712 = vrcp.f32 %v238_v21 }
  0xed   :  { %v3713_v22 = vpop.eup %3712 }
 0x14e   :  { %v249_v23 = vpop.permute.xlu0 %248 }
 0x14f   :  { %v251_v24 = vmul.f32 %v3713_v22, %v249_v23 }
 0x151   :  { %253 = vrot.lane.b32.xlu1 %v251_v24, %s3903_s29 }
 0x152   :  { %v244_v25 = vpop.permute.xlu0 %243 }
 0x153   :  { %v246_v26 = vmul.f32 %v3713_v22, %v244_v25 }
 0x1c3   :  { %v254_v27 = vpop.permute.xlu1 %253 }
 0x1c4   :  { %v256_v28 = vadd.f32 %v254_v27, %v246_v26 }
 0x1c6   :  { %3714 = vtanh.f32 %v256_v28 }
 0x1d3   :  { %v3715_v29 = vpop.eup %3714 }
 0x1d4   :  { %259 = vrot.lane.b32.xlu1 %v3715_v29, %s3902_s28 }
 0x1d8   :  { %264 = vrot.lane.b32.xlu1 %v256_v28, %s3904_s4 }
 0x246   :  { %v260_v32 = vpop.permute.xlu1 %259 }
 0x247   :  { %v4017_v33 = vmul.f32 %v3713_v22, %v260_v32 }
 0x249   :  { %269 = vrot.lane.b32.xlu0 %v4017_v33, %s3903_s29 }
 0x24a   :  { %v265_v34 = vpop.permute.xlu1 %264 }
 0x24b   :  { %267 = vst.msk [vmem:[#allocation5] sm:$0xff] %vm168_vm0, %v265_v34 }
 0x252   :  { %v283_v35 = vld [vmem:[#allocation5] sm:$0xff] }
 0x253   :  { %355 = vrot.lane.b32.xlu1 %v283_v35, %s3903_s29 }
 0x2bb   :  { %v270_v36 = vpop.permute.xlu0 %269 }
 0x2bc   :  { %272 = vst.msk [vmem:[#allocation4] sm:$0xff] %vm168_vm0, %v270_v36 }
 0x2c3   :  { %v282_v37 = vld [vmem:[#allocation4] sm:$0xff] }
 0x2c4   :  { %v286_v38 = vpack.c.bf16 %v282_v37, %v282_v37 }
 0x2c5   :  { %v356_v54 = vpop.permute.xlu1 %355 }
 0x2c6   :  { %3432 = vmatmul.mubr.msk.bf16.vlgmr.msra.gmra.mxu1 %vm168_vm0, %v286_v38 }
 0x2c7   :  { %3447 = vmatprep.mubr.msk.bf16.mxu1 %vm3901_vm1, %v3900_v0  ;;  %3444 = vmatpush3.bf16.msra.mxu1 %v3654_v30 }
 0x2c8   :  { %3445 = vmatprep.subr.bf16.mxu1 %v3900_v0 }
 0x2cb   :  { %3446 = vmatpush3.bf16.msra.mxu1 %v3655_v31 }
 0x2cc   :  { %3459 = vmatprep.subr.bf16.mxu1 %v3900_v0 }
 0x386   :  { %v340_v42 = vpop.f32.mrf.mxu1 }
 0x387   :  { %v346_v43 = vadd.f32 %v340_v42, %v133_v41  ;;  %v141_v41 = vadd.f32 %v4027_v39, %v4001_v9 }
 0x388   :  { %v3433_v44 = vpop.f32.mrf.mxu1 }
 0x389   :  { %3716 = vtanh.f32 %v346_v43  ;;  %v3171_v48 = vmul.f32 -1.442695, %v346_v43 }
 0x38a   :  { %v343_v45 = vpop.f32.mrf.mxu1 }
 0x38b   :  { %3718 = vpow2.f32 %v3171_v48 }
 0x38c   :  { %v3434_v46 = vpop.f32.mrf.mxu1 }
 0x396   :  { %v3717_v47 = vpop.eup %3716 }
 0x397   :  { %360 = vrot.lane.b32.xlu0 %v3717_v47, %s3902_s28 }
 0x398   :  { %v3719_v49 = vpop.eup %3718 }
 0x399   :  { %v350_v50 = vadd.f32 1.0, %v3719_v49 }
 0x39b   :  { %3720 = vrcp.f32 %v350_v50 }
 0x3a8   :  { %v3721_v51 = vpop.eup %3720 }
 0x3a9   :  { %v358_v55 = vmul.f32 %v3721_v51, %v356_v54 }
 0x409   :  { %v361_v52 = vpop.permute.xlu0 %360 }
 0x40a   :  { %v363_v53 = vmul.f32 %v3721_v51, %v361_v52 }
 0x40c   :  { %365 = vrot.lane.b32.xlu0 %v363_v53, %s3903_s29 }
 0x47e   :  { %v366_v56 = vpop.permute.xlu0 %365 }
 0x47f   :  { %v368_v57 = vadd.f32 %v366_v56, %v358_v55 }
 0x481   :  { %3722 = vtanh.f32 %v368_v57 }
 0x48e   :  { %v3723_v58 = vpop.eup %3722 }
 0x48f   :  { %371 = vrot.lane.b32.xlu1 %v3723_v58, %s3902_s28  ;;  %v3656_v58 = vld [vmem:[%s4770_s3 + $0x8] sm:$0xff]  }
 0x493   :  { %376 = vrot.lane.b32.xlu1 %v368_v57, %s3904_s4 }
 0x501   :  { %v372_v63 = vpop.permute.xlu1 %371 }
 0x502   :  { %v4052_v1 = vmul.f32 %v3721_v51, %v372_v63 }
 0x504   :  { %381 = vrot.lane.b32.xlu0 %v4052_v1, %s3903_s29 }
 0x505   :  { %v377_v2 = vpop.permute.xlu1 %376 }
 0x506   :  { %379 = vst.msk [vmem:[#allocation5] sm:$0xff] %vm168_vm0, %v377_v2 }
 0x50d   :  { %v395_v3 = vld [vmem:[#allocation5] sm:$0xff] }
 0x50e   :  { %467 = vrot.lane.b32.xlu1 %v395_v3, %s3903_s29 }
 0x576   :  { %v382_v4 = vpop.permute.xlu0 %381 }
 0x577   :  { %384 = vst.msk [vmem:[#allocation4] sm:$0xff] %vm168_vm0, %v382_v4 }
 0x57e   :  { %v394_v5 = vld [vmem:[#allocation4] sm:$0xff] }
 0x57f   :  { %v398_v6 = vpack.c.bf16 %v394_v5, %v394_v5  ;;  %v146_v5 = vadd.f32 %v4001_v9, %v4064_v10 }
 0x580   :  { %v468_v8 = vpop.permute.xlu1 %467 }
 0x581   :  { %3440 = vmatmul.mubr.msk.bf16.vlgmr.msra.gmra.mxu0 %vm168_vm0, %v398_v6 }
 0x582   :  { %3455 = vmatprep.mubr.msk.bf16.mxu0 %vm3901_vm1, %v3900_v0  ;;  %3452 = vmatpush3.bf16.msra.mxu0 %v3656_v58 }
 0x583   :  { %3453 = vmatprep.subr.bf16.mxu0 %v3900_v0 }
 0x586   :  { %3454 = vmatpush3.bf16.msra.mxu0 %v3657_v59 }
 0x587   :  { %3467 = vmatprep.subr.bf16.mxu0 %v3900_v0 }
 0x641   :  { %v452_v14 = vpop.f32.mrf.mxu0 }
 0x642   :  { %v458_v15 = vadd.f32 %v452_v14, %v138_v13 }
 0x643   :  { %v3441_v16 = vpop.f32.mrf.mxu0 }
 0x644   :  { %3724 = vtanh.f32 %v458_v15  ;;  %v3176_v20 = vmul.f32 -1.442695, %v458_v15 }
 0x645   :  { %v455_v17 = vpop.f32.mrf.mxu0 }
 0x646   :  { %3726 = vpow2.f32 %v3176_v20 }
 0x647   :  { %v3442_v18 = vpop.f32.mrf.mxu0 }
 0x651   :  { %v3725_v19 = vpop.eup %3724 }
 0x652   :  { %472 = vrot.lane.b32.xlu0 %v3725_v19, %s3902_s28 }
 0x653   :  { %v3727_v21 = vpop.eup %3726 }
 0x654   :  { %v462_v22 = vadd.f32 1.0, %v3727_v21 }
 0x656   :  { %3728 = vrcp.f32 %v462_v22 }
 0x663   :  { %v3729_v23 = vpop.eup %3728 }
 0x664   :  { %v470_v26 = vmul.f32 %v3729_v23, %v468_v8 }
 0x6c4   :  { %v473_v24 = vpop.permute.xlu0 %472 }
 0x6c5   :  { %v475_v25 = vmul.f32 %v3729_v23, %v473_v24 }
 0x6c7   :  { %477 = vrot.lane.b32.xlu0 %v475_v25, %s3903_s29 }
 0x739   :  { %v478_v27 = vpop.permute.xlu0 %477 }
 0x73a   :  { %v480_v28 = vadd.f32 %v478_v27, %v470_v26  ;;  %v3658_v27 = vld [vmem:[%s4770_s3 + $0x8] sm:$0xff]  }
 0x73c   :  { %3730 = vtanh.f32 %v480_v28 }
 0x749   :  { %v3731_v29 = vpop.eup %3730 }
 0x74a   :  { %483 = vrot.lane.b32.xlu1 %v3731_v29, %s3902_s28 }
 0x74e   :  { %488 = vrot.lane.b32.xlu1 %v480_v28, %s3904_s4  ;;  %v3659_v28 = vld [vmem:[%s4770_s3] sm:$0xff]  }
 0x7bc   :  { %v484_v32 = vpop.permute.xlu1 %483 }
 0x7bd   :  { %v4084_v34 = vmul.f32 %v3729_v23, %v484_v32 }
 0x7bf   :  { %493 = vrot.lane.b32.xlu0 %v4084_v34, %s3903_s29 }
 0x7c0   :  { %v489_v35 = vpop.permute.xlu1 %488 }
 0x7c1   :  { %491 = vst.msk [vmem:[#allocation5] sm:$0xff] %vm168_vm0, %v489_v35 }
 0x7c8   :  { %v507_v36 = vld [vmem:[#allocation5] sm:$0xff] }
 0x7c9   :  { %579 = vrot.lane.b32.xlu1 %v507_v36, %s3903_s29 }
 0x831   :  { %v494_v37 = vpop.permute.xlu0 %493 }
 0x832   :  { %496 = vst.msk [vmem:[#allocation4] sm:$0xff] %vm168_vm0, %v494_v37 }
 0x839   :  { %v506_v38 = vld [vmem:[#allocation4] sm:$0xff] }
 0x83a   :  { %v510_v40 = vpack.c.bf16 %v506_v38, %v506_v38  ;;  %v149_v38 = vadd.f32 %v4001_v9, %v4068_v12 }
 0x83b   :  { %v580_v39 = vpop.permute.xlu1 %579 }
 0x83c   :  { %3448 = vmatmul.mubr.msk.bf16.vlgmr.msra.gmra.mxu1 %vm168_vm0, %v510_v40 }
 0x83d   :  { %3463 = vmatprep.mubr.msk.bf16.mxu1 %vm3901_vm1, %v3900_v0  ;;  %3460 = vmatpush3.bf16.msra.mxu1 %v3658_v27 }
 0x83e   :  { %3461 = vmatprep.subr.bf16.mxu1 %v3900_v0 }
 0x841   :  { %3462 = vmatpush3.bf16.msra.mxu1 %v3659_v28 }
 0x842   :  { %3475 = vmatprep.subr.bf16.mxu1 %v3900_v0 }
 0x8fc   :  { %v564_v42 = vpop.f32.mrf.mxu1 }
 0x8fd   :  { %v570_v43 = vadd.f32 %v564_v42, %v141_v41 }
 0x8fe   :  { %v3449_v44 = vpop.f32.mrf.mxu1 }
 0x8ff   :  { %3732 = vtanh.f32 %v570_v43  ;;  %v3181_v48 = vmul.f32 -1.442695, %v570_v43 }
 0x900   :  { %v567_v45 = vpop.f32.mrf.mxu1 }
 0x901   :  { %3734 = vpow2.f32 %v3181_v48 }
 0x902   :  { %v3450_v46 = vpop.f32.mrf.mxu1 }
 0x90c   :  { %v3733_v47 = vpop.eup %3732 }
 0x90d   :  { %584 = vrot.lane.b32.xlu0 %v3733_v47, %s3902_s28 }
 0x90e   :  { %v3735_v49 = vpop.eup %3734 }
 0x90f   :  { %v574_v50 = vadd.f32 1.0, %v3735_v49 }
 0x911   :  { %3736 = vrcp.f32 %v574_v50 }
 0x91e   :  { %v3737_v51 = vpop.eup %3736 }
 0x91f   :  { %v582_v54 = vmul.f32 %v3737_v51, %v580_v39 }
 0x97f   :  { %v585_v52 = vpop.permute.xlu0 %584 }
 0x980   :  { %v587_v53 = vmul.f32 %v3737_v51, %v585_v52 }
 0x982   :  { %589 = vrot.lane.b32.xlu0 %v587_v53, %s3903_s29 }
 0x9f4   :  { %v590_v55 = vpop.permute.xlu0 %589 }
 0x9f5   :  { %v592_v56 = vadd.f32 %v590_v55, %v582_v54  ;;  %v3660_v55 = vld [vmem:[%s4770_s3 + $0x8] sm:$0xff]  }
 0x9f7   :  { %3738 = vtanh.f32 %v592_v56 }
 0xa04   :  { %v3739_v57 = vpop.eup %3738 }
 0xa05   :  { %595 = vrot.lane.b32.xlu1 %v3739_v57, %s3902_s28 }
 0xa09   :  { %600 = vrot.lane.b32.xlu1 %v592_v56, %s3904_s4  ;;  %v3661_v56 = vld [vmem:[%s4770_s3] sm:$0xff]  }
 0xa77   :  { %v596_v60 = vpop.permute.xlu1 %595 }
 0xa78   :  { %v4108_v61 = vmul.f32 %v3737_v51, %v596_v60 }
 0xa7a   :  { %605 = vrot.lane.b32.xlu0 %v4108_v61, %s3903_s29 }
 0xa7b   :  { %v601_v62 = vpop.permute.xlu1 %600 }
 0xa7c   :  { %603 = vst.msk [vmem:[#allocation5] sm:$0xff] %vm168_vm0, %v601_v62 }
 0xa83   :  { %v619_v63 = vld [vmem:[#allocation5] sm:$0xff] }
 0xa84   :  { %691 = vrot.lane.b32.xlu1 %v619_v63, %s3903_s29 }
 0xaec   :  { %v606_v2 = vpop.permute.xlu0 %605 }
 0xaed   :  { %608 = vst.msk [vmem:[#allocation4] sm:$0xff] %vm168_vm0, %v606_v2 }
 0xaf4   :  { %v618_v3 = vld [vmem:[#allocation4] sm:$0xff] }
 0xaf5   :  { %v622_v4 = vpack.c.bf16 %v618_v3, %v618_v3  ;;  %v154_v3 = vadd.f32 %v4062_v7, %v4001_v9 }
 0xaf6   :  { %v692_v10 = vpop.permute.xlu1 %691 }
 0xaf7   :  { %3456 = vmatmul.mubr.msk.bf16.vlgmr.msra.gmra.mxu0 %vm168_vm0, %v622_v4 }
 0xaf8   :  { %3471 = vmatprep.mubr.msk.bf16.mxu0 %vm3901_vm1, %v3900_v0  ;;  %3468 = vmatpush3.bf16.msra.mxu0 %v3660_v55  ;;  %v3305_v55 = vpack.c.bf16 %v4052_v1, %v4052_v1 }
 0xaf9   :  { %3469 = vmatprep.subr.bf16.mxu0 %v3900_v0 }
 0xafc   :  { %3470 = vmatpush3.bf16.msra.mxu0 %v3661_v56  ;;  %v3307_v56 = vpack.c.bf16 %v4108_v61, %v4108_v61 }
 0xbb7   :  { %v676_v6 = vpop.f32.mrf.mxu0 }
 0xbb8   :  { %v682_v13 = vadd.f32 %v676_v6, %v146_v5 }
 0xbb9   :  { %v3457_v14 = vpop.f32.mrf.mxu0 }
 0xbba   :  { %3740 = vtanh.f32 %v682_v13  ;;  %v3186_v18 = vmul.f32 -1.442695, %v682_v13 }
 0xbbb   :  { %v679_v15 = vpop.f32.mrf.mxu0 }
 0xbbc   :  { %3742 = vpow2.f32 %v3186_v18 }
 0xbbd   :  { %v3458_v16 = vpop.f32.mrf.mxu0 }
 0xbc7   :  { %v3741_v17 = vpop.eup %3740 }
 0xbc8   :  { %696 = vrot.lane.b32.xlu0 %v3741_v17, %s3902_s28 }
 0xbc9   :  { %v3743_v19 = vpop.eup %3742 }
 0xbca   :  { %v686_v20 = vadd.f32 1.0, %v3743_v19 }
 0xbcc   :  { %3744 = vrcp.f32 %v686_v20 }
 0xbd9   :  { %v3745_v21 = vpop.eup %3744 }
 0xbda   :  { %v694_v24 = vmul.f32 %v3745_v21, %v692_v10 }
 0xc3a   :  { %v697_v22 = vpop.permute.xlu0 %696 }
 0xc3b   :  { %v699_v23 = vmul.f32 %v3745_v21, %v697_v22 }
 0xc3d   :  { %701 = vrot.lane.b32.xlu0 %v699_v23, %s3903_s29 }
 0xcaf   :  { %v702_v25 = vpop.permute.xlu0 %701 }
 0xcb0   :  { %v704_v8 = vadd.f32 %v702_v25, %v694_v24  ;;  %v3662_v25 = vld [vmem:[%s4770_s3 + $0x8] sm:$0xff]  }
 0xcb2   :  { %3746 = vtanh.f32 %v704_v8 }
 0xcbf   :  { %v3747_v26 = vpop.eup %3746 }
 0xcc0   :  { %707 = vrot.lane.b32.xlu1 %v3747_v26, %s3902_s28 }
 0xcc4   :  { %712 = vrot.lane.b32.xlu1 %v704_v8, %s3904_s4  ;;  %v3663_v8 = vld [vmem:[%s4770_s3] sm:$0xff]  }
 0xd32   :  { %v708_v29 = vpop.permute.xlu1 %707 }
 0xd33   :  { %v4132_v30 = vmul.f32 %v3745_v21, %v708_v29 }
 0xd35   :  { %717 = vrot.lane.b32.xlu0 %v4132_v30, %s3903_s29 }
 0xd36   :  { %v713_v31 = vpop.permute.xlu1 %712 }
 0xd37   :  { %715 = vst.msk [vmem:[#allocation5] sm:$0xff] %vm168_vm0, %v713_v31 }
 0xd3e   :  { %v731_v32 = vld [vmem:[#allocation5] sm:$0xff] }
 0xd3f   :  { %803 = vrot.lane.b32.xlu1 %v731_v32, %s3903_s29 }
 0xda7   :  { %v718_v35 = vpop.permute.xlu0 %717 }
 0xda8   :  { %720 = vst.msk [vmem:[#allocation4] sm:$0xff] %vm168_vm0, %v718_v35 }
 0xdaf   :  { %v730_v36 = vld [vmem:[#allocation4] sm:$0xff] }
 0xdb0   :  { %v734_v37 = vpack.c.bf16 %v730_v36, %v730_v36  ;;  %v157_v36 = vadd.f32 %v4066_v11, %v4001_v9  ;;  %v3304_v9 = vpack.c.bf16 %v4017_v33, %v4017_v33  ;;  %v3306_v11 = vpack.c.bf16 %v4084_v34, %v4084_v34  ;;  %v3664_v33 = vld [vmem:[%s4773_s5 + $0x8] sm:$0xff]   ;;  %v3665_v34 = vld [vmem:[%s4773_s5] sm:$0xff]  }
 0xdb1   :  { %v804_v12 = vpop.permute.xlu1 %803  ;;  %3483 = vmatprep.subr.bf16.mxu0 %v3664_v33 }
 0xdb2   :  { %3464 = vmatmul.mubr.msk.bf16.vlgmr.msra.gmra.mxu1 %vm168_vm0, %v734_v37 }
 0xdb3   :  { %3479 = vmatprep.mubr.msk.bf16.mxu1 %vm3901_vm1, %v3900_v0  ;;  %3476 = vmatpush3.bf16.msra.mxu1 %v3662_v25 }
 0xdb4   :  { %3477 = vmatprep.subr.bf16.mxu1 %v3900_v0 }
 0xdb7   :  { %3478 = vmatpush3.bf16.msra.mxu1 %v3663_v8 }
 0xdb8   :  { %3495 = vmatprep.subr.bf16.mxu1 %v3900_v0 }
 0xe72   :  { %v788_v40 = vpop.f32.mrf.mxu1 }
 0xe73   :  { %v794_v41 = vadd.f32 %v788_v40, %v149_v38 }
 0xe74   :  { %v3465_v42 = vpop.f32.mrf.mxu1 }
 0xe75   :  { %3748 = vtanh.f32 %v794_v41  ;;  %v3191_v46 = vmul.f32 -1.442695, %v794_v41 }
 0xe76   :  { %v791_v43 = vpop.f32.mrf.mxu1 }
 0xe77   :  { %3750 = vpow2.f32 %v3191_v46 }
 0xe78   :  { %v3466_v44 = vpop.f32.mrf.mxu1 }
 0xe82   :  { %v3749_v45 = vpop.eup %3748 }
 0xe83   :  { %808 = vrot.lane.b32.xlu0 %v3749_v45, %s3902_s28 }
 0xe84   :  { %v3751_v47 = vpop.eup %3750 }
 0xe85   :  { %v798_v48 = vadd.f32 1.0, %v3751_v47 }
 0xe87   :  { %3752 = vrcp.f32 %v798_v48 }
 0xe94   :  { %v3753_v49 = vpop.eup %3752 }
 0xe95   :  { %v806_v52 = vmul.f32 %v3753_v49, %v804_v12 }
 0xef5   :  { %v809_v50 = vpop.permute.xlu0 %808 }
 0xef6   :  { %v811_v51 = vmul.f32 %v3753_v49, %v809_v50 }
 0xef8   :  { %813 = vrot.lane.b32.xlu0 %v811_v51, %s3903_s29 }
 0xf6a   :  { %v814_v53 = vpop.permute.xlu0 %813 }
 0xf6b   :  { %v816_v39 = vadd.f32 %v814_v53, %v806_v52 }
 0xf6d   :  { %3754 = vtanh.f32 %v816_v39 }
 0xf7a   :  { %v3755_v54 = vpop.eup %3754 }
 0xf7b   :  { %819 = vrot.lane.b32.xlu1 %v3755_v54, %s3902_s28 }
 0xf7f   :  { %824 = vrot.lane.b32.xlu1 %v816_v39, %s3904_s4 }
 0xfed   :  { %v820_v57 = vpop.permute.xlu1 %819 }
 0xfee   :  { %v4155_v58 = vmul.f32 %v3753_v49, %v820_v57  ;;  %v3668_v57 = vld [vmem:[%s4774_s6 + $0x8] sm:$0xff]  }
 0xff0   :  { %829 = vrot.lane.b32.xlu0 %v4155_v58, %s3903_s29 }
 0xff1   :  { %v825_v59 = vpop.permute.xlu1 %824 }
 0xff2   :  { %827 = vst.msk [vmem:[#allocation5] sm:$0xff] %vm168_vm0, %v825_v59  ;;  %v3669_v59 = vld [vmem:[%s4774_s6] sm:$0xff]  }
 0xff9   :  { %v843_v60 = vld [vmem:[#allocation5] sm:$0xff] }
 0xffa   :  { %915 = vrot.lane.b32.xlu1 %v843_v60, %s3903_s29 }
0x1062   :  { %v830_v62 = vpop.permute.xlu0 %829 }
0x1063   :  { %832 = vst.msk [vmem:[#allocation4] sm:$0xff] %vm168_vm0, %v830_v62 }
0x106a   :  { %v842_v63 = vld [vmem:[#allocation4] sm:$0xff] }
0x106b   :  { %v846_v2 = vpack.c.bf16 %v842_v63, %v842_v63 }
0x106c   :  { %v916_v7 = vpop.permute.xlu1 %915 }
0x106d   :  { %3472 = vmatmul.mubr.msk.bf16.vlgmr.msra.gmra.mxu0 %vm168_vm0, %v846_v2 }
0x106e   :  { %3484 = vmatpush3.bf16.msra.mxu0 %v3664_v33 }
0x106f   :  { %3485 = vmatprep.subr.bf16.mxu0 %v3665_v34 }
0x1072   :  { %3486 = vmatpush3.bf16.msra.mxu0 %v3665_v34 }
0x1073   :  { %3511 = vmatprep.subr.bf16.mxu0 %v3900_v0 }
0x112d   :  { %v900_v4 = vpop.f32.mrf.mxu0 }
0x112e   :  { %v906_v5 = vadd.f32 %v900_v4, %v154_v3 }
0x112f   :  { %v3473_v6 = vpop.f32.mrf.mxu0 }
0x1130   :  { %3756 = vtanh.f32 %v906_v5  ;;  %v3196_v16 = vmul.f32 -1.442695, %v906_v5 }
0x1131   :  { %v903_v13 = vpop.f32.mrf.mxu0 }
0x1132   :  { %3758 = vpow2.f32 %v3196_v16  ;;  %v4245_v16 = vld [vmem:[%s4775_s7] ss:$0 sm:$0xff] }
0x1133   :  { %v3474_v14 = vpop.f32.mrf.mxu0 }
0x113d   :  { %v3757_v15 = vpop.eup %3756 }
0x113e   :  { %920 = vrot.lane.b32.xlu0 %v3757_v15, %s3902_s28 }
0x113f   :  { %v3759_v17 = vpop.eup %3758 }
0x1140   :  { %v910_v18 = vadd.f32 1.0, %v3759_v17 }
0x1142   :  { %3760 = vrcp.f32 %v910_v18 }
0x114f   :  { %v3761_v19 = vpop.eup %3760 }
0x1150   :  { %v918_v22 = vmul.f32 %v3761_v19, %v916_v7 }
0x11b0   :  { %v921_v20 = vpop.permute.xlu0 %920 }
0x11b1   :  { %v923_v21 = vmul.f32 %v3761_v19, %v921_v20 }
0x11b3   :  { %925 = vrot.lane.b32.xlu0 %v923_v21, %s3903_s29 }
0x1225   :  { %v926_v23 = vpop.permute.xlu0 %925 }
0x1226   :  { %v928_v10 = vadd.f32 %v926_v23, %v918_v22 }
0x1228   :  { %3762 = vtanh.f32 %v928_v10 }
0x1235   :  { %v3763_v24 = vpop.eup %3762 }
0x1236   :  { %931 = vrot.lane.b32.xlu1 %v3763_v24, %s3902_s28 }
0x123a   :  { %936 = vrot.lane.b32.xlu1 %v928_v10, %s3904_s4 }
0x12a8   :  { %v932_v26 = vpop.permute.xlu1 %931 }
0x12a9   :  { %v4177_v27 = vmul.f32 %v3761_v19, %v932_v26 }
0x12ab   :  { %941 = vrot.lane.b32.xlu0 %v4177_v27, %s3903_s29 }
0x12ac   :  { %v937_v28 = vpop.permute.xlu1 %936 }
0x12ad   :  { %939 = vst.msk [vmem:[#allocation5] sm:$0xff] %vm168_vm0, %v937_v28 }
0x12b4   :  { %v955_v29 = vld [vmem:[#allocation5] sm:$0xff] }
0x12b5   :  { %1027 = vrot.lane.b32.xlu1 %v955_v29, %s3903_s29 }
0x131d   :  { %v942_v31 = vpop.permute.xlu0 %941 }
0x131e   :  { %944 = vst.msk [vmem:[#allocation4] sm:$0xff] %vm168_vm0, %v942_v31 }
0x1325   :  { %v954_v32 = vld [vmem:[#allocation4] sm:$0xff] }
0x1326   :  { %v958_v35 = vpack.c.bf16 %v954_v32, %v954_v32 }
0x1327   :  { %v1028_v50 = vpop.permute.xlu1 %1027 }
0x1328   :  { %3480 = vmatmul.mubr.msk.bf16.vlgmr.msra.gmra.mxu1 %vm168_vm0, %v958_v35 }
0x1329   :  { %3499 = vmatprep.mubr.msk.bf16.mxu1 %vm3901_vm1, %v3900_v0  ;;  %3496 = vmatpush3.bf16.msra.mxu1 %v3668_v57 }
0x132a   :  { %3497 = vmatprep.subr.bf16.mxu1 %v3900_v0 }
0x132d   :  { %3498 = vmatpush3.bf16.msra.mxu1 %v3669_v59 }
0x132e   :  { %3503 = vmatprep.subr.bf16.mxu1 %v3900_v0 }
0x13e8   :  { %v1012_v37 = vpop.f32.mrf.mxu1 }
0x13e9   :  { %v1018_v38 = vadd.f32 %v1012_v37, %v157_v36  ;;  %v3670_v36 = vld [vmem:[%s4774_s6 + $0x8] sm:$0xff]   ;;  %v3671_v37 = vld [vmem:[%s4774_s6] sm:$0xff]  }
0x13ea   :  { %v3481_v40 = vpop.f32.mrf.mxu1 }
0x13eb   :  { %3764 = vtanh.f32 %v1018_v38  ;;  %v3201_v44 = vmul.f32 -1.442695, %v1018_v38 }
0x13ec   :  { %v1015_v41 = vpop.f32.mrf.mxu1 }
0x13ed   :  { %3766 = vpow2.f32 %v3201_v44 }
0x13ee   :  { %v3482_v42 = vpop.f32.mrf.mxu1 }
0x13f8   :  { %v3765_v43 = vpop.eup %3764 }
0x13f9   :  { %1032 = vrot.lane.b32.xlu0 %v3765_v43, %s3902_s28 }
0x13fa   :  { %v3767_v45 = vpop.eup %3766 }
0x13fb   :  { %v1022_v46 = vadd.f32 1.0, %v3767_v45 }
0x13fd   :  { %3768 = vrcp.f32 %v1022_v46 }
0x140a   :  { %v3769_v47 = vpop.eup %3768 }
0x140b   :  { %v1030_v51 = vmul.f32 %v3769_v47, %v1028_v50 }
0x146b   :  { %v1033_v48 = vpop.permute.xlu0 %1032 }
0x146c   :  { %v1035_v49 = vmul.f32 %v3769_v47, %v1033_v48 }
0x146e   :  { %1037 = vrot.lane.b32.xlu0 %v1035_v49, %s3903_s29 }
0x1472   :  { %277 = vrot.lane.b32.xlu0 %v3304_v9, %s3903_s29 }
0x1476   :  { %501 = vrot.lane.b32.xlu0 %v3306_v11, %s3903_s29 }
0x14e0   :  { %v1038_v12 = vpop.permute.xlu0 %1037 }
0x14e1   :  { %v1040_v52 = vadd.f32 %v1038_v12, %v1030_v51 }
0x14e3   :  { %3770 = vtanh.f32 %v1040_v52 }
0x14e4   :  { %v278_v53 = vpop.permute.xlu0 %277 }
0x14e5   :  { %281 = vst.msk [vmem:[#allocation2] sm:$0xf] %vm280_vm3, %v278_v53 }
0x14e8   :  { %v502_v39 = vpop.permute.xlu0 %501 }
0x14e9   :  { %505 = vst.msk [vmem:[#allocation2 + $0x8] sm:$0xf] %vm280_vm3, %v502_v39 }
0x14f0   :  { %v3771_v54 = vpop.eup %3770 }
0x14f1   :  { %1043 = vrot.lane.b32.xlu1 %v3771_v54, %s3902_s28 }
0x14f5   :  { %389 = vrot.lane.b32.xlu1 %v3305_v55, %s3903_s29  ;;  %v3308_v55 = vpack.c.bf16 %v4132_v30, %v4132_v30  ;;  %v3309_v30 = vpack.c.bf16 %v4155_v58, %v4155_v58  ;;  %v3675_v58 = vld [vmem:[%s4774_s6] sm:$0xff]  }
0x14f9   :  { %613 = vrot.lane.b32.xlu1 %v3307_v56, %s3903_s29  ;;  %v3310_v56 = vpack.c.bf16 %v4177_v27, %v4177_v27 }
0x14fd   :  { %1048 = vrot.lane.b32.xlu1 %v1040_v52, %s3904_s4 }
0x1563   :  { %v1044_v1 = vpop.permute.xlu1 %1043 }
0x1564   :  { %v4222_v61 = vmul.f32 %v3769_v47, %v1044_v1 }
0x1566   :  { %1053 = vrot.lane.b32.xlu0 %v4222_v61, %s3903_s29  ;;  %v3311_v27 = vpack.c.bf16 %v4222_v61, %v4222_v61 }
0x1567   :  { %v390_v60 = vpop.permute.xlu1 %389 }
0x1568   :  { %393 = vst.msk [vmem:[#allocation2 + $0x4] sm:$0xf] %vm280_vm3, %v390_v60 }
0x156b   :  { %v614_v62 = vpop.permute.xlu1 %613 }
0x156c   :  { %617 = vst.msk [vmem:[#allocation2 + $0xc] sm:$0xf] %vm280_vm3, %v614_v62 }
0x156f   :  { %v1049_v63 = vpop.permute.xlu1 %1048  ;;  %v3666_v2 = vld [vmem:[#allocation2] sm:$0xff]  }
0x1570   :  { %1051 = vst.msk [vmem:[#allocation5] sm:$0xff] %vm168_vm0, %v1049_v63  ;;  %3487 = vmatprep.mubr.msk.bf16.mxu0 %vm168_vm0, %v3666_v2 }
0x1571   :  { %1203 = vst.msk [vmem:[#allocation5] sm:$0xff] %vm168_vm0, %v3900_v0 }
0x1573   :  { %v3667_v3 = vld [vmem:[#allocation2 + $0x8] sm:$0xff]  }
0x1574   :  { %3488 = vmatmul.mubr.msk.bf16.vlgmr.msra.gmra.mxu0 %vm168_vm0, %v3667_v3  ;;  %v3674_v3 = vld [vmem:[%s4774_s6 + $0x8] sm:$0xff]  }
0x1575   :  { %3512 = vmatpush3.bf16.msra.mxu0 %v3674_v3 }
0x1576   :  { %3513 = vmatprep.subr.bf16.mxu0 %v3900_v0 }
0x1578   :  { %v1205_v4 = vld [vmem:[#allocation5] sm:$0xff] }
0x1579   :  { %1276 = vrot.lane.b32.xlu1 %v1205_v4, %s3903_s29  ;;  %3514 = vmatpush3.bf16.msra.mxu0 %v3675_v58  ;;  %v3678_v58 = vld [vmem:[%s4774_s6 + $0x8] sm:$0xff]  }
0x157a   :  { %3527 = vmatprep.subr.bf16.mxu0 %v3900_v0 }
0x15d8   :  { %v1054_v5 = vpop.permute.xlu0 %1053 }
0x15d9   :  { %1056 = vst.msk [vmem:[#allocation4] sm:$0xff] %vm168_vm0, %v1054_v5 }
0x15da   :  { %1202 = vst.msk [vmem:[#allocation4] sm:$0xff] %vm168_vm0, %v3900_v0 }
0x15e1   :  { %v1204_v6 = vld [vmem:[#allocation4] sm:$0xff] }
0x15e2   :  { %v1207_v13 = vpack.c.bf16 %v1204_v6, %v1204_v6 }
0x15e4   :  { %3500 = vmatmul.mubr.msk.bf16.vlgmr.msra.gmra.mxu1 %vm168_vm0, %v1207_v13 }
0x15e5   :  { %3507 = vmatprep.mubr.msk.bf16.mxu1 %vm3901_vm1, %v3900_v0  ;;  %3504 = vmatpush3.bf16.msra.mxu1 %v3670_v36 }
0x15e6   :  { %3505 = vmatprep.subr.bf16.mxu1 %v3900_v0 }
0x15e9   :  { %3506 = vmatpush3.bf16.msra.mxu1 %v3671_v37 }
0x15ea   :  { %3519 = vmatprep.subr.bf16.mxu1 %v3900_v0 }
0x15eb   :  { %v1277_v28 = vpop.permute.xlu1 %1276 }
0x1634   :  { %v4240_v14 = vpop.f32.mrf.mxu0 }
0x1636   :  { %v1163_v15 = vpop.f32.mrf.mxu0 }
0x1637   :  { %v1164_v17 = vadd.f32 %v4245_v16, %v1163_v15 }
0x1638   :  { %v4270_v46 = vpop.f32.mrf.mxu0 }
0x163a   :  { %v1166_v47 = vpop.f32.mrf.mxu0 }
0x163b   :  { %v1167_v48 = vadd.f32 %v4245_v16, %v1166_v47  ;;  %v3676_v47 = vld [vmem:[%s4774_s6 + $0x8] sm:$0xff]  }
0x16a4   :  { %v1261_v18 = vpop.f32.mrf.mxu1 }
0x16a5   :  { %v1267_v19 = vadd.f32 %v1261_v18, %v1164_v17 }
0x16a6   :  { %v3501_v20 = vpop.f32.mrf.mxu1 }
0x16a7   :  { %3772 = vtanh.f32 %v1267_v19  ;;  %v3217_v23 = vmul.f32 -1.442695, %v1267_v19 }
0x16a8   :  { %v1264_v21 = vpop.f32.mrf.mxu1 }
0x16a9   :  { %3774 = vpow2.f32 %v3217_v23 }
0x16aa   :  { %v3502_v7 = vpop.f32.mrf.mxu1 }
0x16b4   :  { %v3773_v22 = vpop.eup %3772 }
0x16b5   :  { %1281 = vrot.lane.b32.xlu0 %v3773_v22, %s3902_s28 }
0x16b6   :  { %v3775_v10 = vpop.eup %3774 }
0x16b7   :  { %v1271_v24 = vadd.f32 1.0, %v3775_v10 }
0x16b9   :  { %3776 = vrcp.f32 %v1271_v24  ;;  %v1172_v24 = vadd.f32 %v4240_v14, %v4245_v16 }
0x16c6   :  { %v3777_v25 = vpop.eup %3776 }
0x16c7   :  { %v1279_v29 = vmul.f32 %v3777_v25, %v1277_v28 }
0x1727   :  { %v1282_v8 = vpop.permute.xlu0 %1281 }
0x1728   :  { %v1284_v26 = vmul.f32 %v3777_v25, %v1282_v8 }
0x172a   :  { %1286 = vrot.lane.b32.xlu0 %v1284_v26, %s3903_s29 }
0x179c   :  { %v1287_v31 = vpop.permute.xlu0 %1286 }
0x179d   :  { %v1289_v32 = vadd.f32 %v1287_v31, %v1279_v29 }
0x179f   :  { %3778 = vtanh.f32 %v1289_v32 }
0x17ac   :  { %v3779_v35 = vpop.eup %3778 }
0x17ad   :  { %1292 = vrot.lane.b32.xlu1 %v3779_v35, %s3902_s28 }
0x17b1   :  { %1297 = vrot.lane.b32.xlu1 %v1289_v32, %s3904_s4 }
0x181f   :  { %v1293_v38 = vpop.permute.xlu1 %1292 }
0x1820   :  { %v4260_v40 = vmul.f32 %v3777_v25, %v1293_v38 }
0x1822   :  { %1302 = vrot.lane.b32.xlu0 %v4260_v40, %s3903_s29 }
0x1823   :  { %v1298_v41 = vpop.permute.xlu1 %1297 }
0x1824   :  { %1300 = vst.msk [vmem:[#allocation5] sm:$0xff] %vm168_vm0, %v1298_v41 }
0x182b   :  { %v1315_v42 = vld [vmem:[#allocation5] sm:$0xff] }
0x182c   :  { %1386 = vrot.lane.b32.xlu1 %v1315_v42, %s3903_s29 }
0x1894   :  { %v1303_v43 = vpop.permute.xlu0 %1302 }
0x1895   :  { %1305 = vst.msk [vmem:[#allocation4] sm:$0xff] %vm168_vm0, %v1303_v43 }
0x189c   :  { %v1314_v44 = vld [vmem:[#allocation4] sm:$0xff] }
0x189d   :  { %v1317_v45 = vpack.c.bf16 %v1314_v44, %v1314_v44 }
0x189e   :  { %v1387_v57 = vpop.permute.xlu1 %1386 }
0x189f   :  { %3508 = vmatmul.mubr.msk.bf16.vlgmr.msra.gmra.mxu1 %vm168_vm0, %v1317_v45 }
0x18a0   :  { %3523 = vmatprep.mubr.msk.bf16.mxu1 %vm3901_vm1, %v3900_v0  ;;  %3520 = vmatpush3.bf16.msra.mxu1 %v3676_v47 }
0x18a1   :  { %3521 = vmatprep.subr.bf16.mxu1 %v3900_v0 }
0x195f   :  { %v1371_v49 = vpop.f32.mrf.mxu1 }
0x1960   :  { %v1377_v9 = vadd.f32 %v1371_v49, %v1167_v48  ;;  %v3677_v48 = vld [vmem:[%s4774_s6] sm:$0xff]  }
0x1961   :  { %v3509_v11 = vpop.f32.mrf.mxu1  ;;  %3522 = vmatpush3.bf16.msra.mxu1 %v3677_v48 }
0x1962   :  { %3780 = vtanh.f32 %v1377_v9  ;;  %v3222_v52 = vmul.f32 -1.442695, %v1377_v9  ;;  %3535 = vmatprep.subr.bf16.mxu1 %v3900_v0 }
0x1963   :  { %v1374_v50 = vpop.f32.mrf.mxu1 }
0x1964   :  { %3782 = vpow2.f32 %v3222_v52 }
0x1965   :  { %v3510_v51 = vpop.f32.mrf.mxu1 }
0x196f   :  { %v3781_v12 = vpop.eup %3780 }
0x1970   :  { %1391 = vrot.lane.b32.xlu0 %v3781_v12, %s3902_s28 }
0x1971   :  { %v3783_v53 = vpop.eup %3782 }
0x1972   :  { %v1381_v39 = vadd.f32 1.0, %v3783_v53  ;;  %v1175_v53 = vadd.f32 %v4270_v46, %v4245_v16 }
0x1974   :  { %3784 = vrcp.f32 %v1381_v39 }
0x1981   :  { %v3785_v33 = vpop.eup %3784 }
0x1982   :  { %v1389_v59 = vmul.f32 %v3785_v33, %v1387_v57 }
0x19e2   :  { %v1392_v34 = vpop.permute.xlu0 %1391 }
0x19e3   :  { %v1394_v54 = vmul.f32 %v3785_v33, %v1392_v34 }
0x19e5   :  { %1396 = vrot.lane.b32.xlu0 %v1394_v54, %s3903_s29 }
0x19e9   :  { %725 = vrot.lane.b32.xlu0 %v3308_v55, %s3903_s29 }
0x19ed   :  { %949 = vrot.lane.b32.xlu0 %v3310_v56, %s3903_s29 }
0x1a57   :  { %v1397_v1 = vpop.permute.xlu0 %1396 }
0x1a58   :  { %v1399_v60 = vadd.f32 %v1397_v1, %v1389_v59 }
0x1a5a   :  { %3786 = vtanh.f32 %v1399_v60 }
0x1a5b   :  { %v726_v62 = vpop.permute.xlu0 %725 }
0x1a5c   :  { %729 = vst.msk [vmem:[#allocation2 + $0x10] sm:$0xf] %vm280_vm3, %v726_v62 }
0x1a5f   :  { %v950_v63 = vpop.permute.xlu0 %949 }
0x1a60   :  { %953 = vst.msk [vmem:[#allocation2 + $0x18] sm:$0xf] %vm280_vm3, %v950_v63 }
0x1a67   :  { %v3787_v2 = vpop.eup %3786 }
0x1a68   :  { %1402 = vrot.lane.b32.xlu1 %v3787_v2, %s3902_s28 }
0x1a6c   :  { %837 = vrot.lane.b32.xlu1 %v3309_v30, %s3903_s29 }
0x1a70   :  { %1061 = vrot.lane.b32.xlu1 %v3311_v27, %s3903_s29 }
0x1a74   :  { %1407 = vrot.lane.b32.xlu1 %v1399_v60, %s3904_s4 }
0x1ada   :  { %v1403_v4 = vpop.permute.xlu1 %1402 }
0x1adb   :  { %v4299_v61 = vmul.f32 %v3785_v33, %v1403_v4  ;;  %v3679_v4 = vld [vmem:[%s4774_s6] sm:$0xff]  }
0x1add   :  { %1412 = vrot.lane.b32.xlu0 %v4299_v61, %s3903_s29 }
0x1ade   :  { %v838_v5 = vpop.permute.xlu1 %837 }
0x1adf   :  { %841 = vst.msk [vmem:[#allocation2 + $0x14] sm:$0xf] %vm280_vm3, %v838_v5 }
0x1ae2   :  { %v1062_v6 = vpop.permute.xlu1 %1061 }
0x1ae3   :  { %1065 = vst.msk [vmem:[#allocation2 + $0x1c] sm:$0xf] %vm280_vm3, %v1062_v6 }
0x1ae6   :  { %v1408_v13 = vpop.permute.xlu1 %1407  ;;  %v3672_v15 = vld [vmem:[#allocation2 + $0x10] sm:$0xff]  }
0x1ae7   :  { %1410 = vst.msk [vmem:[#allocation5] sm:$0xff] %vm168_vm0, %v1408_v13  ;;  %3491 = vmatprep.mubr.msk.bf16.mxu0 %vm168_vm0, %v3672_v15 }
0x1aea   :  { %v3673_v17 = vld [vmem:[#allocation2 + $0x18] sm:$0xff]  }
0x1aeb   :  { %3492 = vmatmul.mubr.msk.bf16.gmra.mxu0 %vm168_vm0, %v3673_v17 }
0x1aec   :  { %3515 = vmatprep.mubr.msk.bf16.mxu0 %vm3901_vm1, %v3900_v0 }
0x1aee   :  { %v1425_v18 = vld [vmem:[#allocation5] sm:$0xff] }
0x1aef   :  { %1496 = vrot.lane.b32.xlu1 %v1425_v18, %s3903_s29 }
0x1b4f   :  { %v1413_v19 = vpop.permute.xlu0 %1412 }
0x1b50   :  { %1415 = vst.msk [vmem:[#allocation4] sm:$0xff] %vm168_vm0, %v1413_v19 }
0x1b57   :  { %v1424_v20 = vld [vmem:[#allocation4] sm:$0xff] }
0x1b58   :  { %v1427_v21 = vpack.c.bf16 %v1424_v20, %v1424_v20 }
0x1b5a   :  { %3516 = vmatmul.mubr.msk.bf16.vlgmr.msra.gmra.mxu0 %vm168_vm0, %v1427_v21 }
0x1b5b   :  { %3531 = vmatprep.mubr.msk.bf16.mxu0 %vm3901_vm1, %v3900_v0  ;;  %3528 = vmatpush3.bf16.msra.mxu0 %v3678_v58 }
0x1b5c   :  { %3529 = vmatprep.subr.bf16.mxu0 %v3900_v0 }
0x1b5f   :  { %3530 = vmatpush3.bf16.msra.mxu0 %v3679_v4 }
0x1b60   :  { %3543 = vmatprep.subr.bf16.mxu0 %v3900_v0 }
0x1b61   :  { %v1497_v14 = vpop.permute.xlu1 %1496 }
0x1bab   :  { %v4315_v7 = vpop.f32.mrf.mxu0 }
0x1bad   :  { %v4317_v22 = vpop.f32.mrf.mxu0 }
0x1bae   :  { %v1180_v20 = vadd.f32 %v4245_v16, %v4317_v22 }
0x1baf   :  { %v4319_v23 = vpop.f32.mrf.mxu0 }
0x1bb1   :  { %v4321_v10 = vpop.f32.mrf.mxu0 }
0x1c1a   :  { %v1481_v25 = vpop.f32.mrf.mxu0 }
0x1c1b   :  { %v1487_v8 = vadd.f32 %v1481_v25, %v1172_v24 }
0x1c1c   :  { %v3517_v26 = vpop.f32.mrf.mxu0 }
0x1c1d   :  { %3788 = vtanh.f32 %v1487_v8  ;;  %v3227_v32 = vmul.f32 -1.442695, %v1487_v8 }
0x1c1e   :  { %v1484_v28 = vpop.f32.mrf.mxu0 }
0x1c1f   :  { %3790 = vpow2.f32 %v3227_v32 }
0x1c20   :  { %v3518_v29 = vpop.f32.mrf.mxu0 }
0x1c2a   :  { %v3789_v31 = vpop.eup %3788 }
0x1c2b   :  { %1501 = vrot.lane.b32.xlu0 %v3789_v31, %s3902_s28 }
0x1c2c   :  { %v3791_v35 = vpop.eup %3790 }
0x1c2d   :  { %v1491_v36 = vadd.f32 1.0, %v3791_v35 }
0x1c2f   :  { %3792 = vrcp.f32 %v1491_v36 }
0x1c3c   :  { %v3793_v37 = vpop.eup %3792 }
0x1c3d   :  { %v1499_v42 = vmul.f32 %v3793_v37, %v1497_v14 }
0x1c9d   :  { %v1502_v38 = vpop.permute.xlu0 %1501 }
0x1c9e   :  { %v1504_v41 = vmul.f32 %v3793_v37, %v1502_v38 }
0x1ca0   :  { %1506 = vrot.lane.b32.xlu0 %v1504_v41, %s3903_s29 }
0x1d12   :  { %v1507_v43 = vpop.permute.xlu0 %1506 }
0x1d13   :  { %v1509_v44 = vadd.f32 %v1507_v43, %v1499_v42  ;;  %v3680_v43 = vld [vmem:[%s4774_s6 + $0x8] sm:$0xff]  }
0x1d15   :  { %3794 = vtanh.f32 %v1509_v44 }
0x1d22   :  { %v3795_v45 = vpop.eup %3794 }
0x1d23   :  { %1512 = vrot.lane.b32.xlu1 %v3795_v45, %s3902_s28 }
0x1d27   :  { %1517 = vrot.lane.b32.xlu1 %v1509_v44, %s3904_s4  ;;  %v3681_v44 = vld [vmem:[%s4774_s6] sm:$0xff]  }
0x1d95   :  { %v1513_v49 = vpop.permute.xlu1 %1512 }
0x1d96   :  { %v4337_v9 = vmul.f32 %v3793_v37, %v1513_v49 }
0x1d98   :  { %1522 = vrot.lane.b32.xlu0 %v4337_v9, %s3903_s29 }
0x1d99   :  { %v1518_v11 = vpop.permute.xlu1 %1517 }
0x1d9a   :  { %1520 = vst.msk [vmem:[#allocation5] sm:$0xff] %vm168_vm0, %v1518_v11 }
0x1da1   :  { %v1535_v50 = vld [vmem:[#allocation5] sm:$0xff] }
0x1da2   :  { %1606 = vrot.lane.b32.xlu1 %v1535_v50, %s3903_s29 }
0x1e0a   :  { %v1523_v51 = vpop.permute.xlu0 %1522 }
0x1e0b   :  { %1525 = vst.msk [vmem:[#allocation4] sm:$0xff] %vm168_vm0, %v1523_v51 }
0x1e12   :  { %v1534_v12 = vld [vmem:[#allocation4] sm:$0xff] }
0x1e13   :  { %v1537_v52 = vpack.c.bf16 %v1534_v12, %v1534_v12  ;;  %v1183_v12 = vadd.f32 %v4245_v16, %v4321_v10 }
0x1e14   :  { %v1607_v46 = vpop.permute.xlu1 %1606 }
0x1e15   :  { %3524 = vmatmul.mubr.msk.bf16.vlgmr.msra.gmra.mxu1 %vm168_vm0, %v1537_v52 }
0x1e16   :  { %3539 = vmatprep.mubr.msk.bf16.mxu1 %vm3901_vm1, %v3900_v0  ;;  %3536 = vmatpush3.bf16.msra.mxu1 %v3680_v43 }
0x1e17   :  { %3537 = vmatprep.subr.bf16.mxu1 %v3900_v0 }
0x1e1a   :  { %3538 = vmatpush3.bf16.msra.mxu1 %v3681_v44 }
0x1e1b   :  { %3551 = vmatprep.subr.bf16.mxu1 %v3900_v0 }
0x1ed5   :  { %v1591_v39 = vpop.f32.mrf.mxu1 }
0x1ed6   :  { %v1597_v33 = vadd.f32 %v1591_v39, %v1175_v53 }
0x1ed7   :  { %v3525_v34 = vpop.f32.mrf.mxu1 }
0x1ed8   :  { %3796 = vtanh.f32 %v1597_v33  ;;  %v3232_v57 = vmul.f32 -1.442695, %v1597_v33 }
0x1ed9   :  { %v1594_v54 = vpop.f32.mrf.mxu1 }
0x1eda   :  { %3798 = vpow2.f32 %v3232_v57 }
0x1edb   :  { %v3526_v55 = vpop.f32.mrf.mxu1 }
0x1ee5   :  { %v3797_v56 = vpop.eup %3796 }
0x1ee6   :  { %1611 = vrot.lane.b32.xlu0 %v3797_v56, %s3902_s28 }
0x1ee7   :  { %v3799_v59 = vpop.eup %3798 }
0x1ee8   :  { %v1601_v1 = vadd.f32 1.0, %v3799_v59 }
0x1eea   :  { %3800 = vrcp.f32 %v1601_v1 }
0x1ef7   :  { %v3801_v60 = vpop.eup %3800 }
0x1ef8   :  { %v1609_v2 = vmul.f32 %v3801_v60, %v1607_v46 }
0x1f58   :  { %v1612_v62 = vpop.permute.xlu0 %1611 }
0x1f59   :  { %v1614_v63 = vmul.f32 %v3801_v60, %v1612_v62 }
0x1f5b   :  { %1616 = vrot.lane.b32.xlu0 %v1614_v63, %s3903_s29 }
0x1fcd   :  { %v1617_v30 = vpop.permute.xlu0 %1616 }
0x1fce   :  { %v1619_v27 = vadd.f32 %v1617_v30, %v1609_v2  ;;  %v3682_v30 = vld [vmem:[%s4774_s6 + $0x8] sm:$0xff]  }
0x1fd0   :  { %3802 = vtanh.f32 %v1619_v27 }
0x1fdd   :  { %v3803_v3 = vpop.eup %3802 }
0x1fde   :  { %1622 = vrot.lane.b32.xlu1 %v3803_v3, %s3902_s28 }
0x1fe2   :  { %1627 = vrot.lane.b32.xlu1 %v1619_v27, %s3904_s4  ;;  %v3683_v27 = vld [vmem:[%s4774_s6] sm:$0xff]  }
0x2050   :  { %v1623_v5 = vpop.permute.xlu1 %1622 }
0x2051   :  { %v4361_v6 = vmul.f32 %v3801_v60, %v1623_v5 }
0x2053   :  { %1632 = vrot.lane.b32.xlu0 %v4361_v6, %s3903_s29 }
0x2054   :  { %v1628_v13 = vpop.permute.xlu1 %1627 }
0x2055   :  { %1630 = vst.msk [vmem:[#allocation5] sm:$0xff] %vm168_vm0, %v1628_v13 }
0x205c   :  { %v1645_v15 = vld [vmem:[#allocation5] sm:$0xff] }
0x205d   :  { %1716 = vrot.lane.b32.xlu1 %v1645_v15, %s3903_s29 }
0x20c5   :  { %v1633_v17 = vpop.permute.xlu0 %1632 }
0x20c6   :  { %1635 = vst.msk [vmem:[#allocation4] sm:$0xff] %vm168_vm0, %v1633_v17 }
0x20cd   :  { %v1644_v18 = vld [vmem:[#allocation4] sm:$0xff] }
0x20ce   :  { %v1647_v19 = vpack.c.bf16 %v1644_v18, %v1644_v18  ;;  %v1188_v18 = vadd.f32 %v4315_v7, %v4245_v16 }
0x20cf   :  { %v1717_v22 = vpop.permute.xlu1 %1716 }
0x20d0   :  { %3532 = vmatmul.mubr.msk.bf16.vlgmr.msra.gmra.mxu0 %vm168_vm0, %v1647_v19 }
0x20d1   :  { %3547 = vmatprep.mubr.msk.bf16.mxu0 %vm3901_vm1, %v3900_v0  ;;  %3544 = vmatpush3.bf16.msra.mxu0 %v3682_v30  ;;  %v3313_v30 = vpack.c.bf16 %v4299_v61, %v4299_v61 }
0x20d2   :  { %3545 = vmatprep.subr.bf16.mxu0 %v3900_v0 }
0x20d5   :  { %3546 = vmatpush3.bf16.msra.mxu0 %v3683_v27  ;;  %v3315_v27 = vpack.c.bf16 %v4361_v6, %v4361_v6 }
0x2190   :  { %v1701_v21 = vpop.f32.mrf.mxu0 }
0x2191   :  { %v1707_v24 = vadd.f32 %v1701_v21, %v1180_v20 }
0x2192   :  { %v3533_v25 = vpop.f32.mrf.mxu0 }
0x2193   :  { %3804 = vtanh.f32 %v1707_v24  ;;  %v3237_v29 = vmul.f32 -1.442695, %v1707_v24 }
0x2194   :  { %v1704_v8 = vpop.f32.mrf.mxu0 }
0x2195   :  { %3806 = vpow2.f32 %v3237_v29 }
0x2196   :  { %v3534_v26 = vpop.f32.mrf.mxu0 }
0x21a0   :  { %v3805_v28 = vpop.eup %3804 }
0x21a1   :  { %1721 = vrot.lane.b32.xlu0 %v3805_v28, %s3902_s28 }
0x21a2   :  { %v3807_v31 = vpop.eup %3806 }
0x21a3   :  { %v1711_v32 = vadd.f32 1.0, %v3807_v31 }
0x21a5   :  { %3808 = vrcp.f32 %v1711_v32 }
0x21b2   :  { %v3809_v35 = vpop.eup %3808 }
0x21b3   :  { %v1719_v38 = vmul.f32 %v3809_v35, %v1717_v22 }
0x2213   :  { %v1722_v36 = vpop.permute.xlu0 %1721 }
0x2214   :  { %v1724_v37 = vmul.f32 %v3809_v35, %v1722_v36 }
0x2216   :  { %1726 = vrot.lane.b32.xlu0 %v1724_v37, %s3903_s29 }
0x2288   :  { %v1727_v41 = vpop.permute.xlu0 %1726 }
0x2289   :  { %v1729_v14 = vadd.f32 %v1727_v41, %v1719_v38  ;;  %v3684_v41 = vld [vmem:[%s4774_s6 + $0x8] sm:$0xff]  }
0x228b   :  { %3810 = vtanh.f32 %v1729_v14 }
0x2298   :  { %v3811_v42 = vpop.eup %3810 }
0x2299   :  { %1732 = vrot.lane.b32.xlu1 %v3811_v42, %s3902_s28 }
0x229d   :  { %1737 = vrot.lane.b32.xlu1 %v1729_v14, %s3904_s4  ;;  %v3685_v14 = vld [vmem:[%s4774_s6] sm:$0xff]  }
0x230b   :  { %v1733_v45 = vpop.permute.xlu1 %1732 }
0x230c   :  { %v4385_v47 = vmul.f32 %v3809_v35, %v1733_v45 }
0x230e   :  { %1742 = vrot.lane.b32.xlu0 %v4385_v47, %s3903_s29 }
0x230f   :  { %v1738_v48 = vpop.permute.xlu1 %1737 }
0x2310   :  { %1740 = vst.msk [vmem:[#allocation5] sm:$0xff] %vm168_vm0, %v1738_v48 }
0x2317   :  { %v1755_v49 = vld [vmem:[#allocation5] sm:$0xff] }
0x2318   :  { %1826 = vrot.lane.b32.xlu1 %v1755_v49, %s3903_s29 }
0x2380   :  { %v1743_v11 = vpop.permute.xlu0 %1742 }
0x2381   :  { %1745 = vst.msk [vmem:[#allocation4] sm:$0xff] %vm168_vm0, %v1743_v11 }
0x2388   :  { %v1754_v50 = vld [vmem:[#allocation4] sm:$0xff] }
0x2389   :  { %v1757_v51 = vpack.c.bf16 %v1754_v50, %v1754_v50  ;;  %v1191_v50 = vadd.f32 %v4319_v23, %v4245_v16  ;;  %v3312_v16 = vpack.c.bf16 %v4260_v40, %v4260_v40  ;;  %v3314_v23 = vpack.c.bf16 %v4337_v9, %v4337_v9  ;;  %v3686_v40 = vld [vmem:[%s4776_s8 + $0x8] sm:$0xff]   ;;  %v3687_v9 = vld [vmem:[%s4776_s8] sm:$0xff]  }
0x238a   :  { %v1827_v10 = vpop.permute.xlu1 %1826  ;;  %3559 = vmatprep.subr.bf16.mxu0 %v3686_v40 }
0x238b   :  { %3540 = vmatmul.mubr.msk.bf16.vlgmr.msra.gmra.mxu1 %vm168_vm0, %v1757_v51 }
0x238c   :  { %3555 = vmatprep.mubr.msk.bf16.mxu1 %vm3901_vm1, %v3900_v0  ;;  %3552 = vmatpush3.bf16.msra.mxu1 %v3684_v41 }
0x238d   :  { %3553 = vmatprep.subr.bf16.mxu1 %v3900_v0 }
0x2390   :  { %3554 = vmatpush3.bf16.msra.mxu1 %v3685_v14 }
0x2391   :  { %3571 = vmatprep.subr.bf16.mxu1 %v3900_v0 }
0x244b   :  { %v1811_v52 = vpop.f32.mrf.mxu1 }
0x244c   :  { %v1817_v53 = vadd.f32 %v1811_v52, %v1183_v12 }
0x244d   :  { %v3541_v39 = vpop.f32.mrf.mxu1 }
0x244e   :  { %3812 = vtanh.f32 %v1817_v53  ;;  %v3242_v55 = vmul.f32 -1.442695, %v1817_v53 }
0x244f   :  { %v1814_v33 = vpop.f32.mrf.mxu1 }
0x2450   :  { %3814 = vpow2.f32 %v3242_v55 }
0x2451   :  { %v3542_v34 = vpop.f32.mrf.mxu1 }
0x245b   :  { %v3813_v54 = vpop.eup %3812 }
0x245c   :  { %1831 = vrot.lane.b32.xlu0 %v3813_v54, %s3902_s28 }
0x245d   :  { %v3815_v56 = vpop.eup %3814 }
0x245e   :  { %v1821_v57 = vadd.f32 1.0, %v3815_v56 }
0x2460   :  { %3816 = vrcp.f32 %v1821_v57 }
0x246d   :  { %v3817_v59 = vpop.eup %3816 }
0x246e   :  { %v1829_v62 = vmul.f32 %v3817_v59, %v1827_v10 }
0x24ce   :  { %v1832_v1 = vpop.permute.xlu0 %1831 }
0x24cf   :  { %v1834_v60 = vmul.f32 %v3817_v59, %v1832_v1 }
0x24d1   :  { %1836 = vrot.lane.b32.xlu0 %v1834_v60, %s3903_s29 }
0x2543   :  { %v1837_v63 = vpop.permute.xlu0 %1836 }
0x2544   :  { %v1839_v46 = vadd.f32 %v1837_v63, %v1829_v62 }
0x2546   :  { %3818 = vtanh.f32 %v1839_v46 }
0x2553   :  { %v3819_v2 = vpop.eup %3818 }
0x2554   :  { %1842 = vrot.lane.b32.xlu1 %v3819_v2, %s3902_s28 }
0x2558   :  { %1847 = vrot.lane.b32.xlu1 %v1839_v46, %s3904_s4 }
0x25c6   :  { %v1843_v3 = vpop.permute.xlu1 %1842 }
0x25c7   :  { %v4408_v58 = vmul.f32 %v3817_v59, %v1843_v3  ;;  %v3690_v3 = vld [vmem:[%s4777_s9 + $0x8] sm:$0xff]  }
0x25c9   :  { %1852 = vrot.lane.b32.xlu0 %v4408_v58, %s3903_s29 }
0x25ca   :  { %v1848_v4 = vpop.permute.xlu1 %1847 }
0x25cb   :  { %1850 = vst.msk [vmem:[#allocation5] sm:$0xff] %vm168_vm0, %v1848_v4  ;;  %v3691_v4 = vld [vmem:[%s4777_s9] sm:$0xff]  }
0x25d2   :  { %v1865_v5 = vld [vmem:[#allocation5] sm:$0xff] }
0x25d3   :  { %1936 = vrot.lane.b32.xlu1 %v1865_v5, %s3903_s29 }
0x263b   :  { %v1853_v13 = vpop.permute.xlu0 %1852 }
0x263c   :  { %1855 = vst.msk [vmem:[#allocation4] sm:$0xff] %vm168_vm0, %v1853_v13 }
0x2643   :  { %v1864_v15 = vld [vmem:[#allocation4] sm:$0xff] }
0x2644   :  { %v1867_v17 = vpack.c.bf16 %v1864_v15, %v1864_v15 }
0x2645   :  { %v1937_v7 = vpop.permute.xlu1 %1936 }
0x2646   :  { %3548 = vmatmul.mubr.msk.bf16.vlgmr.msra.gmra.mxu0 %vm168_vm0, %v1867_v17 }
0x2647   :  { %3560 = vmatpush3.bf16.msra.mxu0 %v3686_v40 }
0x2648   :  { %3561 = vmatprep.subr.bf16.mxu0 %v3687_v9 }
0x264b   :  { %3562 = vmatpush3.bf16.msra.mxu0 %v3687_v9 }
0x264c   :  { %3587 = vmatprep.subr.bf16.mxu0 %v3900_v0 }
0x2706   :  { %v1921_v19 = vpop.f32.mrf.mxu0 }
0x2707   :  { %v1927_v20 = vadd.f32 %v1921_v19, %v1188_v18 }
0x2708   :  { %v3549_v21 = vpop.f32.mrf.mxu0 }
0x2709   :  { %3820 = vtanh.f32 %v1927_v20  ;;  %v3247_v26 = vmul.f32 -1.442695, %v1927_v20 }
0x270a   :  { %v1924_v24 = vpop.f32.mrf.mxu0 }
0x270b   :  { %3822 = vpow2.f32 %v3247_v26  ;;  %v4498_v26 = vld [vmem:[%s4778_s10] ss:$0 sm:$0xff] }
0x270c   :  { %v3550_v25 = vpop.f32.mrf.mxu0 }
0x2716   :  { %v3821_v8 = vpop.eup %3820 }
0x2717   :  { %1941 = vrot.lane.b32.xlu0 %v3821_v8, %s3902_s28 }
0x2718   :  { %v3823_v28 = vpop.eup %3822 }
0x2719   :  { %v1931_v29 = vadd.f32 1.0, %v3823_v28 }
0x271b   :  { %3824 = vrcp.f32 %v1931_v29 }
0x2728   :  { %v3825_v31 = vpop.eup %3824 }
0x2729   :  { %v1939_v36 = vmul.f32 %v3825_v31, %v1937_v7 }
0x2789   :  { %v1942_v32 = vpop.permute.xlu0 %1941 }
0x278a   :  { %v1944_v35 = vmul.f32 %v3825_v31, %v1942_v32 }
0x278c   :  { %1946 = vrot.lane.b32.xlu0 %v1944_v35, %s3903_s29 }
0x27fe   :  { %v1947_v37 = vpop.permute.xlu0 %1946 }
0x27ff   :  { %v1949_v22 = vadd.f32 %v1947_v37, %v1939_v36 }
0x2801   :  { %3826 = vtanh.f32 %v1949_v22 }
0x280e   :  { %v3827_v38 = vpop.eup %3826 }
0x280f   :  { %1952 = vrot.lane.b32.xlu1 %v3827_v38, %s3902_s28 }
0x2813   :  { %1957 = vrot.lane.b32.xlu1 %v1949_v22, %s3904_s4 }
0x2881   :  { %v1953_v42 = vpop.permute.xlu1 %1952 }
0x2882   :  { %v4430_v43 = vmul.f32 %v3825_v31, %v1953_v42 }
0x2884   :  { %1962 = vrot.lane.b32.xlu0 %v4430_v43, %s3903_s29 }
0x2885   :  { %v1958_v44 = vpop.permute.xlu1 %1957 }
0x2886   :  { %1960 = vst.msk [vmem:[#allocation5] sm:$0xff] %vm168_vm0, %v1958_v44 }
0x288d   :  { %v1975_v45 = vld [vmem:[#allocation5] sm:$0xff] }
0x288e   :  { %2046 = vrot.lane.b32.xlu1 %v1975_v45, %s3903_s29 }
0x28f6   :  { %v1963_v48 = vpop.permute.xlu0 %1962 }
0x28f7   :  { %1965 = vst.msk [vmem:[#allocation4] sm:$0xff] %vm168_vm0, %v1963_v48 }
0x28fe   :  { %v1974_v49 = vld [vmem:[#allocation4] sm:$0xff] }
0x28ff   :  { %v1977_v11 = vpack.c.bf16 %v1974_v49, %v1974_v49 }
0x2900   :  { %v2047_v1 = vpop.permute.xlu1 %2046 }
0x2901   :  { %3556 = vmatmul.mubr.msk.bf16.vlgmr.msra.gmra.mxu1 %vm168_vm0, %v1977_v11 }
0x2902   :  { %3575 = vmatprep.mubr.msk.bf16.mxu1 %vm3901_vm1, %v3900_v0  ;;  %3572 = vmatpush3.bf16.msra.mxu1 %v3690_v3 }
0x2903   :  { %3573 = vmatprep.subr.bf16.mxu1 %v3900_v0 }
0x2906   :  { %3574 = vmatpush3.bf16.msra.mxu1 %v3691_v4 }
0x2907   :  { %3579 = vmatprep.subr.bf16.mxu1 %v3900_v0 }
0x29c1   :  { %v2031_v51 = vpop.f32.mrf.mxu1 }
0x29c2   :  { %v2037_v12 = vadd.f32 %v2031_v51, %v1191_v50  ;;  %v3692_v50 = vld [vmem:[%s4777_s9 + $0x8] sm:$0xff]   ;;  %v3693_v51 = vld [vmem:[%s4777_s9] sm:$0xff]  }
0x29c3   :  { %v3557_v52 = vpop.f32.mrf.mxu1 }
0x29c4   :  { %3828 = vtanh.f32 %v2037_v12  ;;  %v3252_v34 = vmul.f32 -1.442695, %v2037_v12 }
0x29c5   :  { %v2034_v53 = vpop.f32.mrf.mxu1 }
0x29c6   :  { %3830 = vpow2.f32 %v3252_v34 }
0x29c7   :  { %v3558_v39 = vpop.f32.mrf.mxu1 }
0x29d1   :  { %v3829_v33 = vpop.eup %3828 }
0x29d2   :  { %2051 = vrot.lane.b32.xlu0 %v3829_v33, %s3902_s28 }
0x29d3   :  { %v3831_v54 = vpop.eup %3830 }
0x29d4   :  { %v2041_v55 = vadd.f32 1.0, %v3831_v54 }
0x29d6   :  { %3832 = vrcp.f32 %v2041_v55 }
0x29e3   :  { %v3833_v56 = vpop.eup %3832 }
0x29e4   :  { %v2049_v60 = vmul.f32 %v3833_v56, %v2047_v1 }
0x2a44   :  { %v2052_v57 = vpop.permute.xlu0 %2051 }
0x2a45   :  { %v2054_v59 = vmul.f32 %v3833_v56, %v2052_v57 }
0x2a47   :  { %2056 = vrot.lane.b32.xlu0 %v2054_v59, %s3903_s29 }
0x2a4b   :  { %1310 = vrot.lane.b32.xlu0 %v3312_v16, %s3903_s29 }
0x2a4f   :  { %1530 = vrot.lane.b32.xlu0 %v3314_v23, %s3903_s29 }
0x2ab9   :  { %v2057_v10 = vpop.permute.xlu0 %2056 }
0x2aba   :  { %v2059_v62 = vadd.f32 %v2057_v10, %v2049_v60 }
0x2abc   :  { %3834 = vtanh.f32 %v2059_v62 }
0x2abd   :  { %v1311_v63 = vpop.permute.xlu0 %1310 }
0x2abe   :  { %1313 = vst.msk [vmem:[#allocation2] sm:$0xf] %vm280_vm3, %v1311_v63 }
0x2ac1   :  { %v1531_v46 = vpop.permute.xlu0 %1530 }
0x2ac2   :  { %1533 = vst.msk [vmem:[#allocation2 + $0x8] sm:$0xf] %vm280_vm3, %v1531_v46 }
0x2ac9   :  { %v3835_v2 = vpop.eup %3834 }
0x2aca   :  { %2062 = vrot.lane.b32.xlu1 %v3835_v2, %s3902_s28 }
0x2ace   :  { %1420 = vrot.lane.b32.xlu1 %v3313_v30, %s3903_s29  ;;  %v3316_v30 = vpack.c.bf16 %v4385_v47, %v4385_v47  ;;  %v3317_v47 = vpack.c.bf16 %v4408_v58, %v4408_v58  ;;  %v3697_v58 = vld [vmem:[%s4777_s9] sm:$0xff]  }
0x2ad2   :  { %1640 = vrot.lane.b32.xlu1 %v3315_v27, %s3903_s29  ;;  %v3318_v27 = vpack.c.bf16 %v4430_v43, %v4430_v43 }
0x2ad6   :  { %2067 = vrot.lane.b32.xlu1 %v2059_v62, %s3904_s4 }
0x2b3c   :  { %v2063_v61 = vpop.permute.xlu1 %2062 }
0x2b3d   :  { %v4475_v6 = vmul.f32 %v3833_v56, %v2063_v61 }
0x2b3f   :  { %2072 = vrot.lane.b32.xlu0 %v4475_v6, %s3903_s29  ;;  %v3319_v43 = vpack.c.bf16 %v4475_v6, %v4475_v6 }
0x2b40   :  { %v1421_v5 = vpop.permute.xlu1 %1420 }
0x2b41   :  { %1423 = vst.msk [vmem:[#allocation2 + $0x4] sm:$0xf] %vm280_vm3, %v1421_v5 }
0x2b44   :  { %v1641_v13 = vpop.permute.xlu1 %1640 }
0x2b45   :  { %1643 = vst.msk [vmem:[#allocation2 + $0xc] sm:$0xf] %vm280_vm3, %v1641_v13 }
0x2b48   :  { %v2068_v15 = vpop.permute.xlu1 %2067  ;;  %v3688_v17 = vld [vmem:[#allocation2] sm:$0xff]  }
0x2b49   :  { %2070 = vst.msk [vmem:[#allocation5] sm:$0xff] %vm168_vm0, %v2068_v15  ;;  %3563 = vmatprep.mubr.msk.bf16.mxu0 %vm168_vm0, %v3688_v17 }
0x2b4a   :  { %2221 = vst.msk [vmem:[#allocation5] sm:$0xff] %vm168_vm0, %v3900_v0 }
0x2b4c   :  { %v3689_v18 = vld [vmem:[#allocation2 + $0x8] sm:$0xff]  }
0x2b4d   :  { %3564 = vmatmul.mubr.msk.bf16.vlgmr.msra.gmra.mxu0 %vm168_vm0, %v3689_v18  ;;  %v3696_v18 = vld [vmem:[%s4777_s9 + $0x8] sm:$0xff]  }
0x2b4e   :  { %3588 = vmatpush3.bf16.msra.mxu0 %v3696_v18 }
0x2b4f   :  { %3589 = vmatprep.subr.bf16.mxu0 %v3900_v0 }
0x2b51   :  { %v2223_v19 = vld [vmem:[#allocation5] sm:$0xff] }
0x2b52   :  { %2294 = vrot.lane.b32.xlu1 %v2223_v19, %s3903_s29  ;;  %3590 = vmatpush3.bf16.msra.mxu0 %v3697_v58  ;;  %v3700_v58 = vld [vmem:[%s4777_s9 + $0x8] sm:$0xff]  }
0x2b53   :  { %3603 = vmatprep.subr.bf16.mxu0 %v3900_v0 }
0x2bb1   :  { %v2073_v20 = vpop.permute.xlu0 %2072 }
0x2bb2   :  { %2075 = vst.msk [vmem:[#allocation4] sm:$0xff] %vm168_vm0, %v2073_v20 }
0x2bb3   :  { %2220 = vst.msk [vmem:[#allocation4] sm:$0xff] %vm168_vm0, %v3900_v0 }
0x2bba   :  { %v2222_v21 = vld [vmem:[#allocation4] sm:$0xff] }
0x2bbb   :  { %v2225_v24 = vpack.c.bf16 %v2222_v21, %v2222_v21 }
0x2bbd   :  { %3576 = vmatmul.mubr.msk.bf16.vlgmr.msra.gmra.mxu1 %vm168_vm0, %v2225_v24 }
0x2bbe   :  { %3583 = vmatprep.mubr.msk.bf16.mxu1 %vm3901_vm1, %v3900_v0  ;;  %3580 = vmatpush3.bf16.msra.mxu1 %v3692_v50 }
0x2bbf   :  { %3581 = vmatprep.subr.bf16.mxu1 %v3900_v0 }
0x2bc2   :  { %3582 = vmatpush3.bf16.msra.mxu1 %v3693_v51 }
0x2bc3   :  { %3595 = vmatprep.subr.bf16.mxu1 %v3900_v0 }
0x2bc4   :  { %v2295_v44 = vpop.permute.xlu1 %2294 }
0x2c0d   :  { %v4493_v25 = vpop.f32.mrf.mxu0 }
0x2c0f   :  { %v2181_v8 = vpop.f32.mrf.mxu0 }
0x2c10   :  { %v2182_v28 = vadd.f32 %v4498_v26, %v2181_v8 }
0x2c11   :  { %v4523_v55 = vpop.f32.mrf.mxu0 }
0x2c13   :  { %v2184_v56 = vpop.f32.mrf.mxu0 }
0x2c14   :  { %v2185_v57 = vadd.f32 %v4498_v26, %v2184_v56  ;;  %v3698_v56 = vld [vmem:[%s4777_s9 + $0x8] sm:$0xff]  }
0x2c7d   :  { %v2279_v29 = vpop.f32.mrf.mxu1 }
0x2c7e   :  { %v2285_v31 = vadd.f32 %v2279_v29, %v2182_v28 }
0x2c7f   :  { %v3577_v32 = vpop.f32.mrf.mxu1 }
0x2c80   :  { %3836 = vtanh.f32 %v2285_v31  ;;  %v3268_v37 = vmul.f32 -1.442695, %v2285_v31 }
0x2c81   :  { %v2282_v35 = vpop.f32.mrf.mxu1 }
0x2c82   :  { %3838 = vpow2.f32 %v3268_v37 }
0x2c83   :  { %v3578_v7 = vpop.f32.mrf.mxu1 }
0x2c8d   :  { %v3837_v36 = vpop.eup %3836 }
0x2c8e   :  { %2299 = vrot.lane.b32.xlu0 %v3837_v36, %s3902_s28 }
0x2c8f   :  { %v3839_v22 = vpop.eup %3838 }
0x2c90   :  { %v2289_v38 = vadd.f32 1.0, %v3839_v22 }
0x2c92   :  { %3840 = vrcp.f32 %v2289_v38  ;;  %v2190_v38 = vadd.f32 %v4493_v25, %v4498_v26 }
0x2c9f   :  { %v3841_v41 = vpop.eup %3840 }
0x2ca0   :  { %v2297_v45 = vmul.f32 %v3841_v41, %v2295_v44 }
0x2d00   :  { %v2300_v14 = vpop.permute.xlu0 %2299 }
0x2d01   :  { %v2302_v42 = vmul.f32 %v3841_v41, %v2300_v14 }
0x2d03   :  { %2304 = vrot.lane.b32.xlu0 %v2302_v42, %s3903_s29 }
0x2d75   :  { %v2305_v48 = vpop.permute.xlu0 %2304 }
0x2d76   :  { %v2307_v49 = vadd.f32 %v2305_v48, %v2297_v45 }
0x2d78   :  { %3842 = vtanh.f32 %v2307_v49 }
0x2d85   :  { %v3843_v11 = vpop.eup %3842 }
0x2d86   :  { %2310 = vrot.lane.b32.xlu1 %v3843_v11, %s3902_s28 }
0x2d8a   :  { %2315 = vrot.lane.b32.xlu1 %v2307_v49, %s3904_s4 }
0x2df8   :  { %v2311_v12 = vpop.permute.xlu1 %2310 }
0x2df9   :  { %v4513_v52 = vmul.f32 %v3841_v41, %v2311_v12 }
0x2dfb   :  { %2320 = vrot.lane.b32.xlu0 %v4513_v52, %s3903_s29 }
0x2dfc   :  { %v2316_v53 = vpop.permute.xlu1 %2315 }
0x2dfd   :  { %2318 = vst.msk [vmem:[#allocation5] sm:$0xff] %vm168_vm0, %v2316_v53 }
0x2e04   :  { %v2338_v39 = vld [vmem:[#allocation5] sm:$0xff] }
0x2e05   :  { %2409 = vrot.lane.b32.xlu1 %v2338_v39, %s3903_s29 }
0x2e6d   :  { %v2321_v33 = vpop.permute.xlu0 %2320 }
0x2e6e   :  { %2323 = vst.msk [vmem:[#allocation4] sm:$0xff] %vm168_vm0, %v2321_v33 }
0x2e75   :  { %v2337_v34 = vld [vmem:[#allocation4] sm:$0xff] }
0x2e76   :  { %v2340_v54 = vpack.c.bf16 %v2337_v34, %v2337_v34 }
0x2e77   :  { %v2410_v3 = vpop.permute.xlu1 %2409 }
0x2e78   :  { %3584 = vmatmul.mubr.msk.bf16.vlgmr.msra.gmra.mxu1 %vm168_vm0, %v2340_v54 }
0x2e79   :  { %3599 = vmatprep.mubr.msk.bf16.mxu1 %vm3901_vm1, %v3900_v0  ;;  %3596 = vmatpush3.bf16.msra.mxu1 %v3698_v56 }
0x2e7a   :  { %3597 = vmatprep.subr.bf16.mxu1 %v3900_v0 }
0x2f38   :  { %v2394_v59 = vpop.f32.mrf.mxu1 }
0x2f39   :  { %v2400_v16 = vadd.f32 %v2394_v59, %v2185_v57  ;;  %v3699_v57 = vld [vmem:[%s4777_s9] sm:$0xff]  }
0x2f3a   :  { %v3585_v23 = vpop.f32.mrf.mxu1  ;;  %3598 = vmatpush3.bf16.msra.mxu1 %v3699_v57 }
0x2f3b   :  { %3844 = vtanh.f32 %v2400_v16  ;;  %v3272_v62 = vmul.f32 -1.442695, %v2400_v16  ;;  %3611 = vmatprep.subr.bf16.mxu1 %v3900_v0 }
0x2f3c   :  { %v2397_v1 = vpop.f32.mrf.mxu1 }
0x2f3d   :  { %3846 = vpow2.f32 %v3272_v62 }
0x2f3e   :  { %v3586_v60 = vpop.f32.mrf.mxu1 }
0x2f48   :  { %v3845_v10 = vpop.eup %3844 }
0x2f49   :  { %2414 = vrot.lane.b32.xlu0 %v3845_v10, %s3902_s28 }
0x2f4a   :  { %v3847_v63 = vpop.eup %3846 }
0x2f4b   :  { %v2404_v46 = vadd.f32 1.0, %v3847_v63  ;;  %v2193_v63 = vadd.f32 %v4523_v55, %v4498_v26 }
0x2f4d   :  { %3848 = vrcp.f32 %v2404_v46 }
0x2f5a   :  { %v3849_v40 = vpop.eup %3848 }
0x2f5b   :  { %v2412_v4 = vmul.f32 %v3849_v40, %v2410_v3 }
0x2fbb   :  { %v2415_v9 = vpop.permute.xlu0 %2414 }
0x2fbc   :  { %v2417_v2 = vmul.f32 %v3849_v40, %v2415_v9 }
0x2fbe   :  { %2419 = vrot.lane.b32.xlu0 %v2417_v2, %s3903_s29 }
0x2fc2   :  { %1750 = vrot.lane.b32.xlu0 %v3316_v30, %s3903_s29 }
0x2fc6   :  { %1970 = vrot.lane.b32.xlu0 %v3318_v27, %s3903_s29 }
0x3030   :  { %v2420_v61 = vpop.permute.xlu0 %2419 }
0x3031   :  { %v2422_v5 = vadd.f32 %v2420_v61, %v2412_v4 }
0x3033   :  { %3850 = vtanh.f32 %v2422_v5 }
0x3034   :  { %v1751_v13 = vpop.permute.xlu0 %1750 }
0x3035   :  { %1753 = vst.msk [vmem:[#allocation2 + $0x10] sm:$0xf] %vm280_vm3, %v1751_v13 }
0x3038   :  { %v1971_v15 = vpop.permute.xlu0 %1970 }
0x3039   :  { %1973 = vst.msk [vmem:[#allocation2 + $0x18] sm:$0xf] %vm280_vm3, %v1971_v15 }
0x3040   :  { %v3851_v17 = vpop.eup %3850 }
0x3041   :  { %2425 = vrot.lane.b32.xlu1 %v3851_v17, %s3902_s28 }
0x3045   :  { %1860 = vrot.lane.b32.xlu1 %v3317_v47, %s3903_s29 }
0x3049   :  { %2080 = vrot.lane.b32.xlu1 %v3319_v43, %s3903_s29 }
0x304d   :  { %2430 = vrot.lane.b32.xlu1 %v2422_v5, %s3904_s4 }
0x30b3   :  { %v2426_v19 = vpop.permute.xlu1 %2425 }
0x30b4   :  { %v4552_v6 = vmul.f32 %v3849_v40, %v2426_v19  ;;  %v3701_v19 = vld [vmem:[%s4777_s9] sm:$0xff]  }
0x30b6   :  { %2435 = vrot.lane.b32.xlu0 %v4552_v6, %s3903_s29 }
0x30b7   :  { %v1861_v20 = vpop.permute.xlu1 %1860 }
0x30b8   :  { %1863 = vst.msk [vmem:[#allocation2 + $0x14] sm:$0xf] %vm280_vm3, %v1861_v20 }
0x30bb   :  { %v2081_v21 = vpop.permute.xlu1 %2080 }
0x30bc   :  { %2083 = vst.msk [vmem:[#allocation2 + $0x1c] sm:$0xf] %vm280_vm3, %v2081_v21 }
0x30bf   :  { %v2431_v24 = vpop.permute.xlu1 %2430  ;;  %v3694_v8 = vld [vmem:[#allocation2 + $0x10] sm:$0xff]  }
0x30c0   :  { %2433 = vst.msk [vmem:[#allocation5] sm:$0xff] %vm168_vm0, %v2431_v24  ;;  %3567 = vmatprep.mubr.msk.bf16.mxu0 %vm168_vm0, %v3694_v8 }
0x30c3   :  { %v3695_v28 = vld [vmem:[#allocation2 + $0x18] sm:$0xff]  }
0x30c4   :  { %3568 = vmatmul.mubr.msk.bf16.gmra.mxu0 %vm168_vm0, %v3695_v28 }
0x30c5   :  { %3591 = vmatprep.mubr.msk.bf16.mxu0 %vm3901_vm1, %v3900_v0 }
0x30c7   :  { %v2454_v29 = vld [vmem:[#allocation5] sm:$0xff] }
0x30c8   :  { %2525 = vrot.lane.b32.xlu1 %v2454_v29, %s3903_s29 }
0x3128   :  { %v2436_v31 = vpop.permute.xlu0 %2435 }
0x3129   :  { %2438 = vst.msk [vmem:[#allocation4] sm:$0xff] %vm168_vm0, %v2436_v31 }
0x3130   :  { %v2453_v32 = vld [vmem:[#allocation4] sm:$0xff] }
0x3131   :  { %v2456_v35 = vpack.c.bf16 %v2453_v32, %v2453_v32 }
0x3133   :  { %3592 = vmatmul.mubr.msk.bf16.vlgmr.msra.gmra.mxu0 %vm168_vm0, %v2456_v35 }
0x3134   :  { %3607 = vmatprep.mubr.msk.bf16.mxu0 %vm3901_vm1, %v3900_v0  ;;  %3604 = vmatpush3.bf16.msra.mxu0 %v3700_v58 }
0x3135   :  { %3605 = vmatprep.subr.bf16.mxu0 %v3900_v0 }
0x3138   :  { %3606 = vmatpush3.bf16.msra.mxu0 %v3701_v19 }
0x3139   :  { %3619 = vmatprep.subr.bf16.mxu0 %v3900_v0 }
0x313a   :  { %v2526_v25 = vpop.permute.xlu1 %2525 }
0x3184   :  { %v4568_v7 = vpop.f32.mrf.mxu0 }
0x3186   :  { %v4570_v36 = vpop.f32.mrf.mxu0 }
0x3187   :  { %v2198_v32 = vadd.f32 %v4498_v26, %v4570_v36 }
0x3188   :  { %v4572_v37 = vpop.f32.mrf.mxu0 }
0x318a   :  { %v4574_v22 = vpop.f32.mrf.mxu0 }
0x31f3   :  { %v2510_v41 = vpop.f32.mrf.mxu0 }
0x31f4   :  { %v2516_v14 = vadd.f32 %v2510_v41, %v2190_v38 }
0x31f5   :  { %v3593_v42 = vpop.f32.mrf.mxu0 }
0x31f6   :  { %3852 = vtanh.f32 %v2516_v14  ;;  %v3277_v49 = vmul.f32 -1.442695, %v2516_v14 }
0x31f7   :  { %v2513_v44 = vpop.f32.mrf.mxu0 }
0x31f8   :  { %3854 = vpow2.f32 %v3277_v49 }
0x31f9   :  { %v3594_v45 = vpop.f32.mrf.mxu0 }
0x3203   :  { %v3853_v48 = vpop.eup %3852 }
0x3204   :  { %2530 = vrot.lane.b32.xlu0 %v3853_v48, %s3902_s28 }
0x3205   :  { %v3855_v11 = vpop.eup %3854 }
0x3206   :  { %v2520_v50 = vadd.f32 1.0, %v3855_v11 }
0x3208   :  { %3856 = vrcp.f32 %v2520_v50 }
0x3215   :  { %v3857_v51 = vpop.eup %3856 }
0x3216   :  { %v2528_v39 = vmul.f32 %v3857_v51, %v2526_v25 }
0x3276   :  { %v2531_v12 = vpop.permute.xlu0 %2530 }
0x3277   :  { %v2533_v53 = vmul.f32 %v3857_v51, %v2531_v12 }
0x3279   :  { %2535 = vrot.lane.b32.xlu0 %v2533_v53, %s3903_s29 }
0x32eb   :  { %v2536_v33 = vpop.permute.xlu0 %2535 }
0x32ec   :  { %v2538_v34 = vadd.f32 %v2536_v33, %v2528_v39  ;;  %v3702_v33 = vld [vmem:[%s4777_s9 + $0x8] sm:$0xff]  }
0x32ee   :  { %3858 = vtanh.f32 %v2538_v34 }
0x32fb   :  { %v3859_v54 = vpop.eup %3858 }
0x32fc   :  { %2541 = vrot.lane.b32.xlu1 %v3859_v54, %s3902_s28 }
0x3300   :  { %2546 = vrot.lane.b32.xlu1 %v2538_v34, %s3904_s4  ;;  %v3703_v34 = vld [vmem:[%s4777_s9] sm:$0xff]  }
0x336e   :  { %v2542_v59 = vpop.permute.xlu1 %2541 }
0x336f   :  { %v4590_v16 = vmul.f32 %v3857_v51, %v2542_v59 }
0x3371   :  { %2551 = vrot.lane.b32.xlu0 %v4590_v16, %s3903_s29 }
0x3372   :  { %v2547_v23 = vpop.permute.xlu1 %2546 }
0x3373   :  { %2549 = vst.msk [vmem:[#allocation5] sm:$0xff] %vm168_vm0, %v2547_v23 }
0x337a   :  { %v2570_v1 = vld [vmem:[#allocation5] sm:$0xff] }
0x337b   :  { %2641 = vrot.lane.b32.xlu1 %v2570_v1, %s3903_s29 }
0x33e3   :  { %v2552_v60 = vpop.permute.xlu0 %2551 }
0x33e4   :  { %2554 = vst.msk [vmem:[#allocation4] sm:$0xff] %vm168_vm0, %v2552_v60 }
0x33eb   :  { %v2569_v10 = vld [vmem:[#allocation4] sm:$0xff] }
0x33ec   :  { %v2572_v62 = vpack.c.bf16 %v2569_v10, %v2569_v10  ;;  %v2201_v10 = vadd.f32 %v4498_v26, %v4574_v22 }
0x33ed   :  { %v2642_v55 = vpop.permute.xlu1 %2641 }
0x33ee   :  { %3600 = vmatmul.mubr.msk.bf16.vlgmr.msra.gmra.mxu1 %vm168_vm0, %v2572_v62 }
0x33ef   :  { %3615 = vmatprep.mubr.msk.bf16.mxu1 %vm3901_vm1, %v3900_v0  ;;  %3612 = vmatpush3.bf16.msra.mxu1 %v3702_v33 }
0x33f0   :  { %3613 = vmatprep.subr.bf16.mxu1 %v3900_v0 }
0x33f3   :  { %3614 = vmatpush3.bf16.msra.mxu1 %v3703_v34 }
0x33f4   :  { %3627 = vmatprep.subr.bf16.mxu1 %v3900_v0 }
0x34ae   :  { %v2626_v46 = vpop.f32.mrf.mxu1 }
0x34af   :  { %v2632_v40 = vadd.f32 %v2626_v46, %v2193_v63 }
0x34b0   :  { %v3601_v9 = vpop.f32.mrf.mxu1 }
0x34b1   :  { %3860 = vtanh.f32 %v2632_v40  ;;  %v3282_v3 = vmul.f32 -1.442695, %v2632_v40 }
0x34b2   :  { %v2629_v2 = vpop.f32.mrf.mxu1 }
0x34b3   :  { %3862 = vpow2.f32 %v3282_v3 }
0x34b4   :  { %v3602_v30 = vpop.f32.mrf.mxu1 }
0x34be   :  { %v3861_v27 = vpop.eup %3860 }
0x34bf   :  { %2646 = vrot.lane.b32.xlu0 %v3861_v27, %s3902_s28 }
0x34c0   :  { %v3863_v4 = vpop.eup %3862 }
0x34c1   :  { %v2636_v61 = vadd.f32 1.0, %v3863_v4 }
0x34c3   :  { %3864 = vrcp.f32 %v2636_v61 }
0x34d0   :  { %v3865_v5 = vpop.eup %3864 }
0x34d1   :  { %v2644_v17 = vmul.f32 %v3865_v5, %v2642_v55 }
0x3531   :  { %v2647_v13 = vpop.permute.xlu0 %2646 }
0x3532   :  { %v2649_v15 = vmul.f32 %v3865_v5, %v2647_v13 }
0x3534   :  { %2651 = vrot.lane.b32.xlu0 %v2649_v15, %s3903_s29 }
0x35a6   :  { %v2652_v47 = vpop.permute.xlu0 %2651 }
0x35a7   :  { %v2654_v43 = vadd.f32 %v2652_v47, %v2644_v17  ;;  %v3704_v47 = vld [vmem:[%s4777_s9 + $0x8] sm:$0xff]  }
0x35a9   :  { %3866 = vtanh.f32 %v2654_v43 }
0x35b6   :  { %v3867_v18 = vpop.eup %3866 }
0x35b7   :  { %2657 = vrot.lane.b32.xlu1 %v3867_v18, %s3902_s28 }
0x35bb   :  { %2662 = vrot.lane.b32.xlu1 %v2654_v43, %s3904_s4  ;;  %v3705_v43 = vld [vmem:[%s4777_s9] sm:$0xff]  }
0x3629   :  { %v2658_v20 = vpop.permute.xlu1 %2657 }
0x362a   :  { %v4614_v21 = vmul.f32 %v3865_v5, %v2658_v20 }
0x362c   :  { %2667 = vrot.lane.b32.xlu0 %v4614_v21, %s3903_s29 }
0x362d   :  { %v2663_v24 = vpop.permute.xlu1 %2662 }
0x362e   :  { %2665 = vst.msk [vmem:[#allocation5] sm:$0xff] %vm168_vm0, %v2663_v24 }
0x3635   :  { %v2686_v8 = vld [vmem:[#allocation5] sm:$0xff] }
0x3636   :  { %2757 = vrot.lane.b32.xlu1 %v2686_v8, %s3903_s29 }
0x369e   :  { %v2668_v28 = vpop.permute.xlu0 %2667 }
0x369f   :  { %2670 = vst.msk [vmem:[#allocation4] sm:$0xff] %vm168_vm0, %v2668_v28 }
0x36a6   :  { %v2685_v29 = vld [vmem:[#allocation4] sm:$0xff] }
0x36a7   :  { %v2688_v31 = vpack.c.bf16 %v2685_v29, %v2685_v29  ;;  %v2206_v29 = vadd.f32 %v4568_v7, %v4498_v26 }
0x36a8   :  { %v2758_v36 = vpop.permute.xlu1 %2757 }
0x36a9   :  { %3608 = vmatmul.mubr.msk.bf16.vlgmr.msra.gmra.mxu0 %vm168_vm0, %v2688_v31 }
0x36aa   :  { %3623 = vmatprep.mubr.msk.bf16.mxu0 %vm3901_vm1, %v3900_v0  ;;  %3620 = vmatpush3.bf16.msra.mxu0 %v3704_v47 }
0x36ab   :  { %3621 = vmatprep.subr.bf16.mxu0 %v3900_v0 }
0x36ae   :  { %3622 = vmatpush3.bf16.msra.mxu0 %v3705_v43 }
0x3769   :  { %v2742_v35 = vpop.f32.mrf.mxu0 }
0x376a   :  { %v2748_v38 = vadd.f32 %v2742_v35, %v2198_v32 }
0x376b   :  { %v3609_v41 = vpop.f32.mrf.mxu0 }
0x376c   :  { %3868 = vtanh.f32 %v2748_v38  ;;  %v3287_v45 = vmul.f32 -1.442695, %v2748_v38 }
0x376d   :  { %v2745_v14 = vpop.f32.mrf.mxu0 }
0x376e   :  { %3870 = vpow2.f32 %v3287_v45 }
0x376f   :  { %v3610_v42 = vpop.f32.mrf.mxu0 }
0x3779   :  { %v3869_v44 = vpop.eup %3868 }
0x377a   :  { %2762 = vrot.lane.b32.xlu0 %v3869_v44, %s3902_s28 }
0x377b   :  { %v3871_v48 = vpop.eup %3870 }
0x377c   :  { %v2752_v49 = vadd.f32 1.0, %v3871_v48 }
0x377e   :  { %3872 = vrcp.f32 %v2752_v49 }
0x378b   :  { %v3873_v11 = vpop.eup %3872 }
0x378c   :  { %v2760_v12 = vmul.f32 %v3873_v11, %v2758_v36 }
0x37ec   :  { %v2763_v50 = vpop.permute.xlu0 %2762 }
0x37ed   :  { %v2765_v51 = vmul.f32 %v3873_v11, %v2763_v50 }
0x37ef   :  { %2767 = vrot.lane.b32.xlu0 %v2765_v51, %s3903_s29 }
0x3861   :  { %v2768_v53 = vpop.permute.xlu0 %2767 }
0x3862   :  { %v2770_v25 = vadd.f32 %v2768_v53, %v2760_v12  ;;  %v3905_v53 = vmov 0  }
0x3863   :  { %3642 = vset.pattern.permute.xlu0 %v3905_v53  ;;  %3641 = vset.pattern.permute.xlu1 %v3905_v53 }
0x3864   :  { %3874 = vtanh.f32 %v2770_v25 }
0x3871   :  { %v3875_v39 = vpop.eup %3874 }
0x3872   :  { %2773 = vrot.lane.b32.xlu1 %v3875_v39, %s3902_s28  ;;  %v3707_v39 = vld [vmem:[%s4777_s9] sm:$0xff]  }
0x3876   :  { %2778 = vrot.lane.b32.xlu1 %v2770_v25, %s3904_s4  ;;  %v3706_v25 = vld [vmem:[%s4777_s9 + $0x8] sm:$0xff]  }
0x38e4   :  { %v2774_v54 = vpop.permute.xlu1 %2773 }
0x38e5   :  { %v4638_v56 = vmul.f32 %v3873_v11, %v2774_v54 }
0x38e7   :  { %2783 = vrot.lane.b32.xlu0 %v4638_v56, %s3903_s29 }
0x38e8   :  { %v2779_v57 = vpop.permute.xlu1 %2778 }
0x38e9   :  { %2781 = vst.msk [vmem:[#allocation5] sm:$0xff] %vm168_vm0, %v2779_v57  ;;  %v4692_v57 = vld [vmem:[%s4779_s1] sm:$0xff] }
0x38ea   :  { %vm2325_vm4 = vcmp.gt.s32.totalorder %v4692_v57, 0  ;;  %vm2556_vm5 = vcmp.gt.s32.totalorder %v4692_v57, 2  ;;  %vm2672_vm6 = vcmp.gt.s32.totalorder %v4692_v57, 3  ;;  %vm2904_vm7 = vcmp.gt.s32.totalorder %v4692_v57, 5 }
0x38eb   :  { %vm3136_vm8 = vcmp.gt.s32.totalorder %v4692_v57, 7  ;;  %vm2440_vm11 = vcmp.gt.s32.totalorder %v4692_v57, 1  ;;  %vm2788_vm12 = vcmp.gt.s32.totalorder %v4692_v57, 4  ;;  %vm3020_vm13 = vcmp.gt.s32.totalorder %v4692_v57, 6 }
0x38f0   :  { %v2802_v59 = vld [vmem:[#allocation5] sm:$0xff] }
0x38f1   :  { %2873 = vrot.lane.b32.xlu1 %v2802_v59, %s3903_s29 }
0x3959   :  { %v2784_v23 = vpop.permute.xlu0 %2783 }
0x395a   :  { %2786 = vst.msk [vmem:[#allocation4] sm:$0xff] %vm168_vm0, %v2784_v23  ;;  %v2557_v23 = vsel %vm2556_vm5, 1, %v3905_v53 }
0x3961   :  { %v2801_v1 = vld [vmem:[#allocation4] sm:$0xff] }
0x3962   :  { %v2804_v60 = vpack.c.bf16 %v2801_v1, %v2801_v1  ;;  %v2673_v1 = vsel %vm2672_vm6, 1, %v3905_v53 }
0x3963   :  { %v2874_v22 = vpop.permute.xlu1 %2873 }
0x3964   :  { %3616 = vmatmul.mubr.msk.bf16.vlgmr.msra.gmra.mxu1 %vm168_vm0, %v2804_v60  ;;  %v2905_v60 = vsel %vm2904_vm7, 1, %v3905_v53 }
0x3965   :  { %3631 = vmatprep.mubr.msk.bf16.mxu1 %vm3901_vm1, %v3900_v0  ;;  %3628 = vmatpush3.bf16.msra.mxu1 %v3706_v25 }
0x3966   :  { %3629 = vmatprep.subr.bf16.mxu1 %v3900_v0  ;;  %v2326_v0 = vsel %vm2325_vm4, 1, %v3905_v53 }
0x3969   :  { %3630 = vmatpush3.bf16.msra.mxu1 %v3707_v39 }
0x3a24   :  { %v2858_v62 = vpop.f32.mrf.mxu1 }
0x3a25   :  { %v2864_v63 = vadd.f32 %v2858_v62, %v2201_v10  ;;  %v3137_v10 = vsel %vm3136_vm8, 1, %v3905_v53 }
0x3a26   :  { %v3617_v46 = vpop.f32.mrf.mxu1 }
0x3a27   :  { %3876 = vtanh.f32 %v2864_v63  ;;  %v3292_v30 = vmul.f32 -1.442695, %v2864_v63 }
0x3a28   :  { %v2861_v40 = vpop.f32.mrf.mxu1 }
0x3a29   :  { %3878 = vpow2.f32 %v3292_v30 }
0x3a2a   :  { %v3618_v9 = vpop.f32.mrf.mxu1 }
0x3a34   :  { %v3877_v2 = vpop.eup %3876 }
0x3a35   :  { %2878 = vrot.lane.b32.xlu0 %v3877_v2, %s3902_s28 }
0x3a36   :  { %v3879_v27 = vpop.eup %3878 }
0x3a37   :  { %v2868_v3 = vadd.f32 1.0, %v3879_v27 }
0x3a39   :  { %3880 = vrcp.f32 %v2868_v3 }
0x3a46   :  { %v3881_v4 = vpop.eup %3880 }
0x3a47   :  { %v2876_v13 = vmul.f32 %v3881_v4, %v2874_v22 }
0x3aa7   :  { %v2879_v61 = vpop.permute.xlu0 %2878 }
0x3aa8   :  { %v2881_v5 = vmul.f32 %v3881_v4, %v2879_v61 }
0x3aaa   :  { %2883 = vrot.lane.b32.xlu0 %v2881_v5, %s3903_s29 }
0x3b1c   :  { %v2884_v15 = vpop.permute.xlu0 %2883 }
0x3b1d   :  { %v2886_v55 = vadd.f32 %v2884_v15, %v2876_v13 }
0x3b1f   :  { %3882 = vtanh.f32 %v2886_v55 }
0x3b2c   :  { %v3883_v17 = vpop.eup %3882 }
0x3b2d   :  { %2889 = vrot.lane.b32.xlu1 %v3883_v17, %s3902_s28 }
0x3b31   :  { %2894 = vrot.lane.b32.xlu1 %v2886_v55, %s3904_s4 }
0x3b9f   :  { %v2890_v18 = vpop.permute.xlu1 %2889 }
0x3ba0   :  { %v4661_v58 = vmul.f32 %v3881_v4, %v2890_v18 }
0x3ba2   :  { %2899 = vrot.lane.b32.xlu0 %v4661_v58, %s3903_s29 }
0x3ba3   :  { %v2895_v19 = vpop.permute.xlu1 %2894 }
0x3ba4   :  { %2897 = vst.msk [vmem:[#allocation5] sm:$0xff] %vm168_vm0, %v2895_v19 }
0x3bab   :  { %v2918_v20 = vld [vmem:[#allocation5] sm:$0xff] }
0x3bac   :  { %2989 = vrot.lane.b32.xlu1 %v2918_v20, %s3903_s29 }
0x3c14   :  { %v2900_v24 = vpop.permute.xlu0 %2899 }
0x3c15   :  { %2902 = vst.msk [vmem:[#allocation4] sm:$0xff] %vm168_vm0, %v2900_v24 }
0x3c1c   :  { %v2917_v8 = vld [vmem:[#allocation4] sm:$0xff] }
0x3c1d   :  { %v2920_v28 = vpack.c.bf16 %v2917_v8, %v2917_v8 }
0x3c1e   :  { %v2990_v7 = vpop.permute.xlu1 %2989 }
0x3c1f   :  { %3624 = vmatmul.mubr.msk.bf16.vlgmr.msra.gmra.mxu0 %vm168_vm0, %v2920_v28  ;;  %v3021_v28 = vsel %vm3020_vm13, 1, %v3905_v53 }
0x3cdf   :  { %v2974_v31 = vpop.f32.mrf.mxu0 }
0x3ce0   :  { %v2980_v32 = vadd.f32 %v2974_v31, %v2206_v29 }
0x3ce1   :  { %v3625_v35 = vpop.f32.mrf.mxu0 }
0x3ce2   :  { %3884 = vtanh.f32 %v2980_v32  ;;  %v3297_v42 = vmul.f32 -1.442695, %v2980_v32 }
0x3ce3   :  { %v2977_v38 = vpop.f32.mrf.mxu0 }
0x3ce4   :  { %3886 = vpow2.f32 %v3297_v42 }
0x3ce5   :  { %v3626_v41 = vpop.f32.mrf.mxu0 }
0x3cef   :  { %v3885_v14 = vpop.eup %3884 }
0x3cf0   :  { %2994 = vrot.lane.b32.xlu0 %v3885_v14, %s3902_s28 }
0x3cf1   :  { %v3887_v44 = vpop.eup %3886 }
0x3cf2   :  { %v2984_v45 = vadd.f32 1.0, %v3887_v44 }
0x3cf4   :  { %3888 = vrcp.f32 %v2984_v45 }
0x3d01   :  { %v3889_v48 = vpop.eup %3888 }
0x3d02   :  { %v2992_v50 = vmul.f32 %v3889_v48, %v2990_v7 }
0x3d62   :  { %v2995_v49 = vpop.permute.xlu0 %2994 }
0x3d63   :  { %v2997_v11 = vmul.f32 %v3889_v48, %v2995_v49 }
0x3d65   :  { %2999 = vrot.lane.b32.xlu0 %v2997_v11, %s3903_s29 }
0x3dd7   :  { %v3000_v51 = vpop.permute.xlu0 %2999 }
0x3dd8   :  { %v3002_v36 = vadd.f32 %v3000_v51, %v2992_v50 }
0x3dda   :  { %3890 = vtanh.f32 %v3002_v36 }
0x3de7   :  { %v3891_v12 = vpop.eup %3890 }
0x3de8   :  { %3005 = vrot.lane.b32.xlu1 %v3891_v12, %s3902_s28 }
0x3dec   :  { %3010 = vrot.lane.b32.xlu1 %v3002_v36, %s3904_s4 }
0x3e5a   :  { %v3006_v33 = vpop.permute.xlu1 %3005 }
0x3e5b   :  { %v4684_v34 = vmul.f32 %v3889_v48, %v3006_v33 }
0x3e5d   :  { %3015 = vrot.lane.b32.xlu0 %v4684_v34, %s3903_s29 }
0x3e5e   :  { %v3011_v54 = vpop.permute.xlu1 %3010 }
0x3e5f   :  { %3013 = vst.msk [vmem:[#allocation5] sm:$0xff] %vm168_vm0, %v3011_v54 }
0x3e66   :  { %v3034_v59 = vld [vmem:[#allocation5] sm:$0xff] }
0x3e67   :  { %3105 = vrot.lane.b32.xlu1 %v3034_v59, %s3903_s29 }
0x3e6b   :  { %2328 = vperm.xlu1 %3641, %v2326_v0  }
0x3e6f   :  { %2559 = vperm.xlu1 %3641, %v2557_v23  }
0x3e73   :  { %2675 = vperm.xlu1 %3641, %v2673_v1  }
0x3e77   :  { %2907 = vperm.xlu1 %3641, %v2905_v60  }
0x3e7b   :  { %3139 = vperm.xlu1 %3641, %v3137_v10  }
0x3ecf   :  { %v3016_v62 = vpop.permute.xlu0 %3015 }
0x3ed0   :  { %3018 = vst.msk [vmem:[#allocation4] sm:$0xff] %vm168_vm0, %v3016_v62 }
0x3ed7   :  { %v3033_v63 = vld [vmem:[#allocation4] sm:$0xff] }
0x3ed8   :  { %v3036_v46 = vpack.c.bf16 %v3033_v63, %v3033_v63 }
0x3ed9   :  { %v3106_v40 = vpop.permute.xlu1 %3105 }
0x3eda   :  { %3632 = vmatmul.mubr.msk.bf16.vlgmr.msra.gmra.mxu1 %vm168_vm0, %v3036_v46 }
0x3ee6   :  { %v2329_v9 = vpop.permute.xlu1 %2328 }
0x3ee7   :  { %vm2330_vm9 = vcmp.eq.s32.totalorder %v2329_v9, 1 }
0x3ee8   :  { %v2331_v2 = vsel %vm2330_vm9, %v4513_v52, 0.0  ;;  %v2209_v52 = vadd.f32 %v4572_v37, %v4498_v26  ;;  %v2441_v26 = vsel %vm2440_vm11, 1, %v3905_v53  ;;  %v2789_v37 = vsel %vm2788_vm12, 1, %v3905_v53 }
0x3ee9   :  { %2333 = vrot.lane.b32.xlu1 %v2331_v2, %s3903_s29 }
0x3eea   :  { %v2560_v30 = vpop.permute.xlu1 %2559 }
0x3eeb   :  { %vm2561_vm10 = vcmp.eq.s32.totalorder %v2560_v30, 1 }
0x3eec   :  { %v2562_v27 = vsel %vm2561_vm10, %v4590_v16, 0.0 }
0x3eed   :  { %2564 = vrot.lane.b32.xlu1 %v2562_v27, %s3903_s29 }
0x3eee   :  { %v2676_v3 = vpop.permute.xlu1 %2675 }
0x3eef   :  { %vm2677_vm1 = vcmp.eq.s32.totalorder %v2676_v3, 1 }
0x3ef0   :  { %v2678_v48 = vsel %vm2677_vm1, %v4614_v21, 0.0 }
0x3ef2   :  { %v2908_v4 = vpop.permute.xlu1 %2907 }
0x3ef3   :  { %vm2909_vm3 = vcmp.eq.s32.totalorder %v2908_v4, 1 }
0x3ef6   :  { %v3140_v61 = vpop.permute.xlu1 %3139 }
0x3ef7   :  { %vm3141_vm4 = vcmp.eq.s32.totalorder %v3140_v61, 1 }
0x3f5b   :  { %v2334_v5 = vpop.permute.xlu1 %2333 }
0x3f5c   :  { %2336 = vst.msk [vmem:[%s4780_s11] sm:$0xff] %vm168_vm0, %v2334_v5 }
0x3f5f   :  { %v2565_v22 = vpop.permute.xlu1 %2564 }
0x3f60   :  { %3278 = vst.msk [vmem:[%s4780_s11 + $0x10] sm:$0xff] %vm168_vm0, %v2565_v22 }
0x3f9a   :  { %v3090_v16 = vpop.f32.mrf.mxu1 }
0x3f9b   :  { %v3096_v13 = vadd.f32 %v3090_v16, %v2209_v52 }
0x3f9c   :  { %v3633_v15 = vpop.f32.mrf.mxu1 }
0x3f9d   :  { %3892 = vtanh.f32 %v3096_v13  ;;  %v3302_v43 = vmul.f32 -1.442695, %v3096_v13 }
0x3f9e   :  { %v3093_v55 = vpop.f32.mrf.mxu1 }
0x3f9f   :  { %3894 = vpow2.f32 %v3302_v43 }
0x3fa0   :  { %v3634_v17 = vpop.f32.mrf.mxu1 }
0x3faa   :  { %v3893_v47 = vpop.eup %3892 }
0x3fab   :  { %3110 = vrot.lane.b32.xlu0 %v3893_v47, %s3902_s28 }
0x3fac   :  { %v3895_v18 = vpop.eup %3894 }
0x3fad   :  { %v3100_v19 = vadd.f32 1.0, %v3895_v18 }
0x3faf   :  { %3896 = vrcp.f32 %v3100_v19 }
0x3fbc   :  { %v3897_v20 = vpop.eup %3896 }
0x3fbd   :  { %v3108_v29 = vmul.f32 %v3897_v20, %v3106_v40 }
0x401d   :  { %v3111_v24 = vpop.permute.xlu0 %3110 }
0x401e   :  { %v3113_v8 = vmul.f32 %v3897_v20, %v3111_v24 }
0x4020   :  { %3115 = vrot.lane.b32.xlu0 %v3113_v8, %s3903_s29 }
0x4024   :  { %2443 = vperm.xlu0 %3642, %v2441_v26  }
0x4028   :  { %2791 = vperm.xlu0 %3642, %v2789_v37  }
0x402c   :  { %3023 = vperm.xlu0 %3642, %v3021_v28  }
0x4092   :  { %v3116_v31 = vpop.permute.xlu0 %3115 }
0x4093   :  { %v3118_v32 = vadd.f32 %v3116_v31, %v3108_v29 }
0x4095   :  { %3898 = vtanh.f32 %v3118_v32 }
0x409f   :  { %v2444_v35 = vpop.permute.xlu0 %2443 }
0x40a0   :  { %vm2445_vm14 = vcmp.eq.s32.totalorder %v2444_v35, 1 }
0x40a1   :  { %v2446_v42 = vsel %vm2445_vm14, %v4552_v6, 0.0 }
0x40a2   :  { %v3899_v38 = vpop.eup %3898 }
0x40a3   :  { %v2792_v41 = vpop.permute.xlu0 %2791  ;;  %3121 = vrot.lane.b32.xlu0 %v3899_v38, %s3902_s28 }
0x40a4   :  { %vm2793_vm15 = vcmp.eq.s32.totalorder %v2792_v41, 1 }
0x40a5   :  { %v2794_v14 = vsel %vm2793_vm15, %v4638_v56, 0.0  ;;  %v2910_v56 = vsel %vm2909_vm3, %v4661_v58, 0.0 }
0x40a6   :  { %2796 = vrot.lane.b32.xlu1 %v2794_v14, %s3903_s29 }
0x40a7   :  { %v3024_v44 = vpop.permute.xlu0 %3023  ;;  %2448 = vrot.lane.b32.xlu0 %v2446_v42, %s3903_s29 }
0x40a8   :  { %vm3025_vm2 = vcmp.eq.s32.totalorder %v3024_v44, 1 }
0x40a9   :  { %v3026_v45 = vsel %vm3025_vm2, %v4684_v34, 0.0 }
0x40aa   :  { %3028 = vrot.lane.b32.xlu1 %v3026_v45, %s3903_s29 }
0x40ab   :  { %2680 = vrot.lane.b32.xlu0 %v2678_v48, %s3903_s29 }
0x40af   :  { %2912 = vrot.lane.b32.xlu0 %v2910_v56, %s3903_s29 }
0x40b3   :  { %3126 = vrot.lane.b32.xlu0 %v3118_v32, %s3904_s4 }
0x4115   :  { %v3122_v6 = vpop.permute.xlu0 %3121 }
0x4116   :  { %v3124_v49 = vmul.f32 %v3897_v20, %v3122_v6 }
0x4118   :  { %v3142_v11 = vsel %vm3141_vm4, %v3124_v49, 0.0  ;;  %3131 = vrot.lane.b32.xlu1 %v3124_v49, %s3903_s29  ;;  %v2797_v7 = vpop.permute.xlu1 %2796 }
0x4119   :  { %3288 = vst.msk [vmem:[%s4780_s11 + $0x20] sm:$0xff] %vm168_vm0, %v2797_v7  ;;  %v2449_v21 = vpop.permute.xlu0 %2448  ;;  %3144 = vrot.lane.b32.xlu0 %v3142_v11, %s3903_s29 }
0x411a   :  { %3273 = vst.msk [vmem:[%s4780_s11 + $0x8] sm:$0xff] %vm168_vm0, %v2449_v21 }
0x411c   :  { %v3029_v58 = vpop.permute.xlu1 %3028 }
0x411d   :  { %3298 = vst.msk [vmem:[%s4780_s11 + $0x30] sm:$0xff] %vm168_vm0, %v3029_v58  ;;  %v2681_v50 = vpop.permute.xlu0 %2680 }
0x411e   :  { %3283 = vst.msk [vmem:[%s4780_s11 + $0x18] sm:$0xff] %vm168_vm0, %v2681_v50 }
0x4121   :  { %v2913_v51 = vpop.permute.xlu0 %2912 }
0x4122   :  { %3293 = vst.msk [vmem:[%s4780_s11 + $0x28] sm:$0xff] %vm168_vm0, %v2913_v51 }
0x4125   :  { %v3127_v36 = vpop.permute.xlu0 %3126 }
0x4126   :  { %3129 = vst.msk [vmem:[#allocation5] sm:$0xff] %vm168_vm0, %v3127_v36 }
0x418a   :  { %v3132_v12 = vpop.permute.xlu1 %3131 }
0x418b   :  { %3134 = vst.msk [vmem:[#allocation4] sm:$0xff] %vm168_vm0, %v3132_v12  ;;  %v3145_v53 = vpop.permute.xlu0 %3144 }
0x418c   :  { %3303 = vst.msk [vmem:[%s4780_s11 + $0x38] sm:$0xff] %vm168_vm0, %v3145_v53 }

</bundles_post_ra>
